<compile_context>
chip_gen: v7x
topology: tpu7x:2x2x1
jax: 0.10.0
libtpu: 0.0.40
codegen_flags: <defaults>
</compile_context>

<pallas_src>
import jax
import jax.numpy as jnp
from jax.experimental import pallas as pl
from jax.experimental.pallas import tpu as pltpu

LRELU_SLOPE = 0.2   # LeakyReLU negative slope in Conv2dBlock
RES_SCALE = 0.2     # ResBlock.forward: 0.2 * x + model(x)
BN_EPS = 1e-5
KH = KW = 3         # 'basic' ResBlock uses 3x3, stride 1, pad 1 convolutions


# ---------------------------------------------------------------------------
# Fused ResBlock kernel (one grid step == one batch element)
# ---------------------------------------------------------------------------
def _resblock_kernel(x_ref, w1_ref, b1_ref, w2_ref, b2_ref, o_ref, hpad_ref):
    """Refs per grid step:
      x_ref    : (1, H+2, W+2, C)    f32   spatially zero-padded input
      w1_ref   : (9, C,   C//2)      bf16  conv1 weight, BN1 scale folded in
      b1_ref   : (1, C//2)           f32   folded BN1 shift
      w2_ref   : (9, C//2, C)        bf16  conv2 weight, BN2 scale folded in
      b2_ref   : (1, C)              f32   folded BN2 shift
      o_ref    : (1, H, W, C)        f32   output
      hpad_ref : (1, H+2, W+2, C//2) f32   VMEM scratch: padded conv1 activation
    """
    _, hp2, wp2, cin = x_ref.shape
    H, W = hp2 - 2, wp2 - 2
    cmid = w1_ref.shape[2]
    cout = w2_ref.shape[2]
    M = H * W

    # ---- conv1 (3x3, s1, p1) + folded BN1 + LeakyReLU(0.2) ------------------
    # Tap reduction runs in-kernel: no im2col blow-up in HBM, one MXU dot per tap.
    acc1 = jnp.zeros((M, cmid), jnp.float32)
    for kh in range(KH):
        for kw in range(KW):
            xt = x_ref[0, kh:kh + H, kw:kw + W, :].reshape(M, cin)
            acc1 = acc1 + jnp.dot(
                xt.astype(jnp.bfloat16),
                w1_ref[kh * KW + kw],
                preferred_element_type=jnp.float32,
            )
    h = acc1 + b1_ref[...]                       # BN scale already folded into w1
    h = jnp.where(h >= 0.0, h, LRELU_SLOPE * h)  # LeakyReLU(0.2)

    # Stage the conv1 activation, zero-padded, in VMEM so conv2's tap windows
    # are plain slices of scratch (the intermediate never round-trips HBM).
    hpad_ref[...] = jnp.zeros_like(hpad_ref)
    hpad_ref[:, 1:1 + H, 1:1 + W, :] = h.reshape(1, H, W, cmid)

    # ---- conv2 (3x3, s1, p1) + folded BN2, activation 'none' ----------------
    acc2 = jnp.zeros((M, cout), jnp.float32)
    for kh in range(KH):
        for kw in range(KW):
            ht = hpad_ref[0, kh:kh + H, kw:kw + W, :].reshape(M, cmid)
            acc2 = acc2 + jnp.dot(
                ht.astype(jnp.bfloat16),
                w2_ref[kh * KW + kw],
                preferred_element_type=jnp.float32,
            )
    y = acc2 + b2_ref[...]

    # ---- fused residual epilogue: out = 0.2 * x + y --------------------------
    x_in = x_ref[0, 1:1 + H, 1:1 + W, :].reshape(M, cout)
    o_ref[...] = (RES_SCALE * x_in + y).reshape(1, H, W, cout)


def resblock_forward(x_nhwc, params, *, interpret=False):
    """Fused ResBlock forward. x_nhwc: (N, H, W, C) f32."""
    N, H, W, C = x_nhwc.shape
    cmid = params["w1"].shape[2]

    # Single spatial zero-pad of the input; it doubles as the conv1 operand and
    # (its interior) as the residual term, so there is no separate residual read.
    x_pad = jnp.pad(x_nhwc, ((0, 0), (1, 1), (1, 1), (0, 0)))

    return pl.pallas_call(
        _resblock_kernel,
        out_shape=jax.ShapeDtypeStruct((N, H, W, C), jnp.float32),
        grid=(N,),
        in_specs=[
            pl.BlockSpec((1, H + 2, W + 2, C), lambda n: (n, 0, 0, 0)),
            pl.BlockSpec((KH * KW, C, cmid), lambda n: (0, 0, 0)),
            pl.BlockSpec((1, cmid), lambda n: (0, 0)),
            pl.BlockSpec((KH * KW, cmid, C), lambda n: (0, 0, 0)),
            pl.BlockSpec((1, C), lambda n: (0, 0)),
        ],
        out_specs=pl.BlockSpec((1, H, W, C), lambda n: (n, 0, 0, 0)),
        scratch_shapes=[pltpu.VMEM((1, H + 2, W + 2, cmid), jnp.float32)],
        compiler_params=pltpu.CompilerParams(
            dimension_semantics=("parallel",),  # batch axis -> both TCs on v7x
        ),
        interpret=interpret,
    )(x_pad, params["w1"], params["b1"], params["w2"], params["b2"])


# ---------------------------------------------------------------------------
# Deterministic parameter construction (eval-mode BN folded once, bf16 weights)
# ---------------------------------------------------------------------------
def make_resblock_params(key, dim):
    """ResBlock(dim, norm='bn', activation='lrelu', res_type='basic') params.

    BN running stats are folded into a per-channel scale (multiplied into the
    conv weight) and shift (the kernel's only epilogue add). Weights are stored
    tap-major (KH*KW, Cin, Cout) and cast to bf16 once here.
    Returns (kernel_params, f32_reference_params).
    """
    cmid = dim // 2

    def conv_bn(k, cin, cout):
        k_w, k_g, k_b, k_m, k_v = jax.random.split(k, 5)
        fan_in = KH * KW * cin
        w = jax.random.normal(k_w, (KH, KW, cin, cout), jnp.float32) / jnp.sqrt(fan_in)
        gamma = 1.0 + 0.1 * jax.random.normal(k_g, (cout,), jnp.float32)
        beta = 0.1 * jax.random.normal(k_b, (cout,), jnp.float32)
        mean = 0.1 * jax.random.normal(k_m, (cout,), jnp.float32)
        var = 1.0 + 0.1 * jnp.abs(jax.random.normal(k_v, (cout,), jnp.float32))
        scale = gamma * jax.lax.rsqrt(var + BN_EPS)
        shift = beta - mean * scale
        w_folded = w * scale[None, None, None, :]   # fold BN scale into the weight
        w_taps_bf16 = w_folded.reshape(KH * KW, cin, cout).astype(jnp.bfloat16)
        return w_folded, w_taps_bf16, shift

    k1, k2 = jax.random.split(key)
    w1_f32, w1, b1 = conv_bn(k1, dim, cmid)
    w2_f32, w2, b2 = conv_bn(k2, cmid, dim)

    kernel_params = dict(
        w1=w1, b1=b1.reshape(1, cmid),
        w2=w2, b2=b2.reshape(1, dim),
    )
    ref_params = dict(w1=w1_f32, b1=b1, w2=w2_f32, b2=b2)
    return kernel_params, ref_params


# ---------------------------------------------------------------------------
# Pure-JAX f32 reference (for a sanity check only)
# ---------------------------------------------------------------------------
def resblock_reference(x_nhwc, ref_params):
    def conv(x, w, b, act):
        y = jax.lax.conv_general_dilated(
            x, w, window_strides=(1, 1), padding=((1, 1), (1, 1)),
            dimension_numbers=("NHWC", "HWIO", "NHWC"))
        y = y + b.reshape(1, 1, 1, -1)
        if act == "lrelu":
            y = jnp.where(y >= 0.0, y, LRELU_SLOPE * y)
        return y

    h = conv(x_nhwc, ref_params["w1"], ref_params["b1"], "lrelu")
    y = conv(h, ref_params["w2"], ref_params["b2"], "none")
    return RES_SCALE * x_nhwc + y


if __name__ == "__main__":
    key = jax.random.PRNGKey(0)
    k_x, k_p = jax.random.split(key)

    # ResBlock(dim=128) at a small spatial size; PyTorch-layout NCHW input.
    N, C, H, W = 2, 128, 16, 16
    x_nchw = jax.random.normal(k_x, (N, C, H, W), jnp.float32)
    params, ref_params = make_resblock_params(k_p, C)

    x_nhwc = jnp.transpose(x_nchw, (0, 2, 3, 1))
    y_nhwc = jax.jit(resblock_forward)(x_nhwc, params)
    y_nchw = jnp.transpose(y_nhwc, (0, 3, 1, 2))
    jax.block_until_ready(y_nchw)
    assert y_nchw.shape == (N, C, H, W), y_nchw.shape

    # Sanity check vs. pure-JAX f32 reference (kernel uses bf16 MXU inputs).
    y_ref = resblock_reference(x_nhwc, ref_params)
    max_err = float(jnp.max(jnp.abs(y_nhwc - y_ref)))
    assert max_err < 0.15, f"max abs error vs reference too large: {max_err}"

    print("KERNEL_OK")
</pallas_src>

<mosaic_0001>
module attributes {stable_mosaic.version = 11 : i64} {
  func.func @_resblock_kernel(%arg0: i32, %arg1: memref<1x18x18x128xf32, #tpu.memory_space<vmem>>, %arg2: memref<9x128x64xbf16, #tpu.memory_space<vmem>>, %arg3: memref<1x64xf32, #tpu.memory_space<vmem>>, %arg4: memref<9x64x128xbf16, #tpu.memory_space<vmem>>, %arg5: memref<1x128xf32, #tpu.memory_space<vmem>>, %arg6: memref<1x16x16x128xf32, #tpu.memory_space<vmem>>, %arg7: memref<1x18x18x64xf32, #tpu.memory_space<vmem>>) attributes {dimension_semantics = [#tpu.dimension_semantics<parallel>], iteration_bounds = array<i64: 2>, scalar_prefetch = 0 : i64, scratch_operands = 1 : i64, tpu.core_type = #tpu.core_type<tc>, window_params = [{transform_indices = @transform_0, window_bounds = array<i64: 1, 18, 18, 128>}, {pipeline_mode = #tpu.pipeline_mode<synchronous>, transform_indices = @transform_1, window_bounds = array<i64: 9, 128, 64>}, {pipeline_mode = #tpu.pipeline_mode<synchronous>, transform_indices = @transform_2, window_bounds = array<i64: 1, 64>}, {pipeline_mode = #tpu.pipeline_mode<synchronous>, transform_indices = @transform_3, window_bounds = array<i64: 9, 64, 128>}, {pipeline_mode = #tpu.pipeline_mode<synchronous>, transform_indices = @transform_4, window_bounds = array<i64: 1, 128>}, {transform_indices = @transform_5, window_bounds = array<i64: 1, 16, 16, 128>}]} {
    %cst = arith.constant 0.000000e+00 : f32
    %0 = vector.broadcast %cst : f32 to vector<256x64xf32>
    %c0 = arith.constant 0 : index
    %c0_0 = arith.constant 0 : index
    %c0_1 = arith.constant 0 : index
    %c0_2 = arith.constant 0 : index
    %1 = vector.load %arg1[%c0, %c0_0, %c0_1, %c0_2] : memref<1x18x18x128xf32, #tpu.memory_space<vmem>>, vector<1x16x16x128xf32>
    %2 = vector.shape_cast %1 : vector<1x16x16x128xf32> to vector<16x16x128xf32>
    %3 = vector.shape_cast %2 : vector<16x16x128xf32> to vector<256x128xf32>
    %4 = arith.truncf %3 : vector<256x128xf32> to vector<256x128xbf16>
    %c0_3 = arith.constant 0 : index
    %c0_4 = arith.constant 0 : index
    %c0_5 = arith.constant 0 : index
    %5 = vector.load %arg2[%c0_3, %c0_4, %c0_5] : memref<9x128x64xbf16, #tpu.memory_space<vmem>>, vector<1x128x64xbf16>
    %6 = vector.shape_cast %5 : vector<1x128x64xbf16> to vector<128x64xbf16>
    %cst_6 = arith.constant dense<0.000000e+00> : vector<256x64xf32>
    %7 = tpu.matmul %4, %6, %cst_6 {dimension_numbers = #tpu.dot_dimension_numbers<[1], [0], [0], [1], [0, 0, 1, 1], [], []>} : vector<256x128xbf16>, vector<128x64xbf16>, vector<256x64xf32> -> vector<256x64xf32>
    %8 = arith.addf %0, %7 : vector<256x64xf32>
    %c0_7 = arith.constant 0 : index
    %c0_8 = arith.constant 0 : index
    %c1 = arith.constant 1 : index
    %c0_9 = arith.constant 0 : index
    %9 = vector.load %arg1[%c0_7, %c0_8, %c1, %c0_9] : memref<1x18x18x128xf32, #tpu.memory_space<vmem>>, vector<1x16x16x128xf32>
    %10 = vector.shape_cast %9 : vector<1x16x16x128xf32> to vector<16x16x128xf32>
    %11 = vector.shape_cast %10 : vector<16x16x128xf32> to vector<256x128xf32>
    %12 = arith.truncf %11 : vector<256x128xf32> to vector<256x128xbf16>
    %c1_10 = arith.constant 1 : index
    %c0_11 = arith.constant 0 : index
    %c0_12 = arith.constant 0 : index
    %13 = vector.load %arg2[%c1_10, %c0_11, %c0_12] : memref<9x128x64xbf16, #tpu.memory_space<vmem>>, vector<1x128x64xbf16>
    %14 = vector.shape_cast %13 : vector<1x128x64xbf16> to vector<128x64xbf16>
    %cst_13 = arith.constant dense<0.000000e+00> : vector<256x64xf32>
    %15 = tpu.matmul %12, %14, %cst_13 {dimension_numbers = #tpu.dot_dimension_numbers<[1], [0], [0], [1], [0, 0, 1, 1], [], []>} : vector<256x128xbf16>, vector<128x64xbf16>, vector<256x64xf32> -> vector<256x64xf32>
    %16 = arith.addf %8, %15 : vector<256x64xf32>
    %c0_14 = arith.constant 0 : index
    %c0_15 = arith.constant 0 : index
    %c2 = arith.constant 2 : index
    %c0_16 = arith.constant 0 : index
    %17 = vector.load %arg1[%c0_14, %c0_15, %c2, %c0_16] : memref<1x18x18x128xf32, #tpu.memory_space<vmem>>, vector<1x16x16x128xf32>
    %18 = vector.shape_cast %17 : vector<1x16x16x128xf32> to vector<16x16x128xf32>
    %19 = vector.shape_cast %18 : vector<16x16x128xf32> to vector<256x128xf32>
    %20 = arith.truncf %19 : vector<256x128xf32> to vector<256x128xbf16>
    %c2_17 = arith.constant 2 : index
    %c0_18 = arith.constant 0 : index
    %c0_19 = arith.constant 0 : index
    %21 = vector.load %arg2[%c2_17, %c0_18, %c0_19] : memref<9x128x64xbf16, #tpu.memory_space<vmem>>, vector<1x128x64xbf16>
    %22 = vector.shape_cast %21 : vector<1x128x64xbf16> to vector<128x64xbf16>
    %cst_20 = arith.constant dense<0.000000e+00> : vector<256x64xf32>
    %23 = tpu.matmul %20, %22, %cst_20 {dimension_numbers = #tpu.dot_dimension_numbers<[1], [0], [0], [1], [0, 0, 1, 1], [], []>} : vector<256x128xbf16>, vector<128x64xbf16>, vector<256x64xf32> -> vector<256x64xf32>
    %24 = arith.addf %16, %23 : vector<256x64xf32>
    %c0_21 = arith.constant 0 : index
    %c1_22 = arith.constant 1 : index
    %c0_23 = arith.constant 0 : index
    %c0_24 = arith.constant 0 : index
    %25 = vector.load %arg1[%c0_21, %c1_22, %c0_23, %c0_24] : memref<1x18x18x128xf32, #tpu.memory_space<vmem>>, vector<1x16x16x128xf32>
    %26 = vector.shape_cast %25 : vector<1x16x16x128xf32> to vector<16x16x128xf32>
    %27 = vector.shape_cast %26 : vector<16x16x128xf32> to vector<256x128xf32>
    %28 = arith.truncf %27 : vector<256x128xf32> to vector<256x128xbf16>
    %c3 = arith.constant 3 : index
    %c0_25 = arith.constant 0 : index
    %c0_26 = arith.constant 0 : index
    %29 = vector.load %arg2[%c3, %c0_25, %c0_26] : memref<9x128x64xbf16, #tpu.memory_space<vmem>>, vector<1x128x64xbf16>
    %30 = vector.shape_cast %29 : vector<1x128x64xbf16> to vector<128x64xbf16>
    %cst_27 = arith.constant dense<0.000000e+00> : vector<256x64xf32>
    %31 = tpu.matmul %28, %30, %cst_27 {dimension_numbers = #tpu.dot_dimension_numbers<[1], [0], [0], [1], [0, 0, 1, 1], [], []>} : vector<256x128xbf16>, vector<128x64xbf16>, vector<256x64xf32> -> vector<256x64xf32>
    %32 = arith.addf %24, %31 : vector<256x64xf32>
    %c0_28 = arith.constant 0 : index
    %c1_29 = arith.constant 1 : index
    %c1_30 = arith.constant 1 : index
    %c0_31 = arith.constant 0 : index
    %33 = vector.load %arg1[%c0_28, %c1_29, %c1_30, %c0_31] : memref<1x18x18x128xf32, #tpu.memory_space<vmem>>, vector<1x16x16x128xf32>
    %34 = vector.shape_cast %33 : vector<1x16x16x128xf32> to vector<16x16x128xf32>
    %35 = vector.shape_cast %34 : vector<16x16x128xf32> to vector<256x128xf32>
    %36 = arith.truncf %35 : vector<256x128xf32> to vector<256x128xbf16>
    %c4 = arith.constant 4 : index
    %c0_32 = arith.constant 0 : index
    %c0_33 = arith.constant 0 : index
    %37 = vector.load %arg2[%c4, %c0_32, %c0_33] : memref<9x128x64xbf16, #tpu.memory_space<vmem>>, vector<1x128x64xbf16>
    %38 = vector.shape_cast %37 : vector<1x128x64xbf16> to vector<128x64xbf16>
    %cst_34 = arith.constant dense<0.000000e+00> : vector<256x64xf32>
    %39 = tpu.matmul %36, %38, %cst_34 {dimension_numbers = #tpu.dot_dimension_numbers<[1], [0], [0], [1], [0, 0, 1, 1], [], []>} : vector<256x128xbf16>, vector<128x64xbf16>, vector<256x64xf32> -> vector<256x64xf32>
    %40 = arith.addf %32, %39 : vector<256x64xf32>
    %c0_35 = arith.constant 0 : index
    %c1_36 = arith.constant 1 : index
    %c2_37 = arith.constant 2 : index
    %c0_38 = arith.constant 0 : index
    %41 = vector.load %arg1[%c0_35, %c1_36, %c2_37, %c0_38] : memref<1x18x18x128xf32, #tpu.memory_space<vmem>>, vector<1x16x16x128xf32>
    %42 = vector.shape_cast %41 : vector<1x16x16x128xf32> to vector<16x16x128xf32>
    %43 = vector.shape_cast %42 : vector<16x16x128xf32> to vector<256x128xf32>
    %44 = arith.truncf %43 : vector<256x128xf32> to vector<256x128xbf16>
    %c5 = arith.constant 5 : index
    %c0_39 = arith.constant 0 : index
    %c0_40 = arith.constant 0 : index
    %45 = vector.load %arg2[%c5, %c0_39, %c0_40] : memref<9x128x64xbf16, #tpu.memory_space<vmem>>, vector<1x128x64xbf16>
    %46 = vector.shape_cast %45 : vector<1x128x64xbf16> to vector<128x64xbf16>
    %cst_41 = arith.constant dense<0.000000e+00> : vector<256x64xf32>
    %47 = tpu.matmul %44, %46, %cst_41 {dimension_numbers = #tpu.dot_dimension_numbers<[1], [0], [0], [1], [0, 0, 1, 1], [], []>} : vector<256x128xbf16>, vector<128x64xbf16>, vector<256x64xf32> -> vector<256x64xf32>
    %48 = arith.addf %40, %47 : vector<256x64xf32>
    %c0_42 = arith.constant 0 : index
    %c2_43 = arith.constant 2 : index
    %c0_44 = arith.constant 0 : index
    %c0_45 = arith.constant 0 : index
    %49 = vector.load %arg1[%c0_42, %c2_43, %c0_44, %c0_45] : memref<1x18x18x128xf32, #tpu.memory_space<vmem>>, vector<1x16x16x128xf32>
    %50 = vector.shape_cast %49 : vector<1x16x16x128xf32> to vector<16x16x128xf32>
    %51 = vector.shape_cast %50 : vector<16x16x128xf32> to vector<256x128xf32>
    %52 = arith.truncf %51 : vector<256x128xf32> to vector<256x128xbf16>
    %c6 = arith.constant 6 : index
    %c0_46 = arith.constant 0 : index
    %c0_47 = arith.constant 0 : index
    %53 = vector.load %arg2[%c6, %c0_46, %c0_47] : memref<9x128x64xbf16, #tpu.memory_space<vmem>>, vector<1x128x64xbf16>
    %54 = vector.shape_cast %53 : vector<1x128x64xbf16> to vector<128x64xbf16>
    %cst_48 = arith.constant dense<0.000000e+00> : vector<256x64xf32>
    %55 = tpu.matmul %52, %54, %cst_48 {dimension_numbers = #tpu.dot_dimension_numbers<[1], [0], [0], [1], [0, 0, 1, 1], [], []>} : vector<256x128xbf16>, vector<128x64xbf16>, vector<256x64xf32> -> vector<256x64xf32>
    %56 = arith.addf %48, %55 : vector<256x64xf32>
    %c0_49 = arith.constant 0 : index
    %c2_50 = arith.constant 2 : index
    %c1_51 = arith.constant 1 : index
    %c0_52 = arith.constant 0 : index
    %57 = vector.load %arg1[%c0_49, %c2_50, %c1_51, %c0_52] : memref<1x18x18x128xf32, #tpu.memory_space<vmem>>, vector<1x16x16x128xf32>
    %58 = vector.shape_cast %57 : vector<1x16x16x128xf32> to vector<16x16x128xf32>
    %59 = vector.shape_cast %58 : vector<16x16x128xf32> to vector<256x128xf32>
    %60 = arith.truncf %59 : vector<256x128xf32> to vector<256x128xbf16>
    %c7 = arith.constant 7 : index
    %c0_53 = arith.constant 0 : index
    %c0_54 = arith.constant 0 : index
    %61 = vector.load %arg2[%c7, %c0_53, %c0_54] : memref<9x128x64xbf16, #tpu.memory_space<vmem>>, vector<1x128x64xbf16>
    %62 = vector.shape_cast %61 : vector<1x128x64xbf16> to vector<128x64xbf16>
    %cst_55 = arith.constant dense<0.000000e+00> : vector<256x64xf32>
    %63 = tpu.matmul %60, %62, %cst_55 {dimension_numbers = #tpu.dot_dimension_numbers<[1], [0], [0], [1], [0, 0, 1, 1], [], []>} : vector<256x128xbf16>, vector<128x64xbf16>, vector<256x64xf32> -> vector<256x64xf32>
    %64 = arith.addf %56, %63 : vector<256x64xf32>
    %c0_56 = arith.constant 0 : index
    %c2_57 = arith.constant 2 : index
    %c2_58 = arith.constant 2 : index
    %c0_59 = arith.constant 0 : index
    %65 = vector.load %arg1[%c0_56, %c2_57, %c2_58, %c0_59] : memref<1x18x18x128xf32, #tpu.memory_space<vmem>>, vector<1x16x16x128xf32>
    %66 = vector.shape_cast %65 : vector<1x16x16x128xf32> to vector<16x16x128xf32>
    %67 = vector.shape_cast %66 : vector<16x16x128xf32> to vector<256x128xf32>
    %68 = arith.truncf %67 : vector<256x128xf32> to vector<256x128xbf16>
    %c8 = arith.constant 8 : index
    %c0_60 = arith.constant 0 : index
    %c0_61 = arith.constant 0 : index
    %69 = vector.load %arg2[%c8, %c0_60, %c0_61] : memref<9x128x64xbf16, #tpu.memory_space<vmem>>, vector<1x128x64xbf16>
    %70 = vector.shape_cast %69 : vector<1x128x64xbf16> to vector<128x64xbf16>
    %cst_62 = arith.constant dense<0.000000e+00> : vector<256x64xf32>
    %71 = tpu.matmul %68, %70, %cst_62 {dimension_numbers = #tpu.dot_dimension_numbers<[1], [0], [0], [1], [0, 0, 1, 1], [], []>} : vector<256x128xbf16>, vector<128x64xbf16>, vector<256x64xf32> -> vector<256x64xf32>
    %72 = arith.addf %64, %71 : vector<256x64xf32>
    %c0_63 = arith.constant 0 : index
    %c0_64 = arith.constant 0 : index
    %73 = vector.load %arg3[%c0_63, %c0_64] : memref<1x64xf32, #tpu.memory_space<vmem>>, vector<1x64xf32>
    %74 = vector.broadcast %73 : vector<1x64xf32> to vector<256x64xf32>
    %75 = arith.addf %72, %74 : vector<256x64xf32>
    %cst_65 = arith.constant 0.000000e+00 : f32
    %76 = vector.broadcast %cst_65 : f32 to vector<256x64xf32>
    %77 = arith.cmpf oge, %75, %76 : vector<256x64xf32>
    %cst_66 = arith.constant 2.000000e-01 : f32
    %78 = vector.broadcast %cst_66 : f32 to vector<256x64xf32>
    %79 = arith.mulf %78, %75 : vector<256x64xf32>
    %80 = arith.select %77, %75, %79 : vector<256x64xi1>, vector<256x64xf32>
    %cst_67 = arith.constant 0.000000e+00 : f32
    %81 = vector.broadcast %cst_67 : f32 to vector<1x18x18x64xf32>
    %c0_68 = arith.constant 0 : index
    %c0_69 = arith.constant 0 : index
    %c0_70 = arith.constant 0 : index
    %c0_71 = arith.constant 0 : index
    %82 = vector.load %arg7[%c0_68, %c0_69, %c0_70, %c0_71] : memref<1x18x18x64xf32, #tpu.memory_space<vmem>>, vector<1x18x18x64xf32>
    tpu.vector_store %arg7[%c0_68, %c0_69, %c0_70, %c0_71], %81 {strides = array<i32>} : memref<1x18x18x64xf32, #tpu.memory_space<vmem>>, vector<1x18x18x64xf32>,
    %83 = vector.shape_cast %80 : vector<256x64xf32> to vector<1x16x16x64xf32>
    %c0_72 = arith.constant 0 : index
    %c1_73 = arith.constant 1 : index
    %c1_74 = arith.constant 1 : index
    %c0_75 = arith.constant 0 : index
    %84 = vector.load %arg7[%c0_72, %c1_73, %c1_74, %c0_75] : memref<1x18x18x64xf32, #tpu.memory_space<vmem>>, vector<1x16x16x64xf32>
    tpu.vector_store %arg7[%c0_72, %c1_73, %c1_74, %c0_75], %83 {strides = array<i32>} : memref<1x18x18x64xf32, #tpu.memory_space<vmem>>, vector<1x16x16x64xf32>,
    %cst_76 = arith.constant 0.000000e+00 : f32
    %85 = vector.broadcast %cst_76 : f32 to vector<256x128xf32>
    %c0_77 = arith.constant 0 : index
    %c0_78 = arith.constant 0 : index
    %c0_79 = arith.constant 0 : index
    %c0_80 = arith.constant 0 : index
    %86 = vector.load %arg7[%c0_77, %c0_78, %c0_79, %c0_80] : memref<1x18x18x64xf32, #tpu.memory_space<vmem>>, vector<1x16x16x64xf32>
    %87 = vector.shape_cast %86 : vector<1x16x16x64xf32> to vector<16x16x64xf32>
    %88 = vector.shape_cast %87 : vector<16x16x64xf32> to vector<256x64xf32>
    %89 = arith.truncf %88 : vector<256x64xf32> to vector<256x64xbf16>
    %c0_81 = arith.constant 0 : index
    %c0_82 = arith.constant 0 : index
    %c0_83 = arith.constant 0 : index
    %90 = vector.load %arg4[%c0_81, %c0_82, %c0_83] : memref<9x64x128xbf16, #tpu.memory_space<vmem>>, vector<1x64x128xbf16>
    %91 = vector.shape_cast %90 : vector<1x64x128xbf16> to vector<64x128xbf16>
    %cst_84 = arith.constant dense<0.000000e+00> : vector<256x128xf32>
    %92 = tpu.matmul %89, %91, %cst_84 {dimension_numbers = #tpu.dot_dimension_numbers<[1], [0], [0], [1], [0, 0, 1, 1], [], []>} : vector<256x64xbf16>, vector<64x128xbf16>, vector<256x128xf32> -> vector<256x128xf32>
    %93 = arith.addf %85, %92 : vector<256x128xf32>
    %c0_85 = arith.constant 0 : index
    %c0_86 = arith.constant 0 : index
    %c1_87 = arith.constant 1 : index
    %c0_88 = arith.constant 0 : index
    %94 = vector.load %arg7[%c0_85, %c0_86, %c1_87, %c0_88] : memref<1x18x18x64xf32, #tpu.memory_space<vmem>>, vector<1x16x16x64xf32>
    %95 = vector.shape_cast %94 : vector<1x16x16x64xf32> to vector<16x16x64xf32>
    %96 = vector.shape_cast %95 : vector<16x16x64xf32> to vector<256x64xf32>
    %97 = arith.truncf %96 : vector<256x64xf32> to vector<256x64xbf16>
    %c1_89 = arith.constant 1 : index
    %c0_90 = arith.constant 0 : index
    %c0_91 = arith.constant 0 : index
    %98 = vector.load %arg4[%c1_89, %c0_90, %c0_91] : memref<9x64x128xbf16, #tpu.memory_space<vmem>>, vector<1x64x128xbf16>
    %99 = vector.shape_cast %98 : vector<1x64x128xbf16> to vector<64x128xbf16>
    %cst_92 = arith.constant dense<0.000000e+00> : vector<256x128xf32>
    %100 = tpu.matmul %97, %99, %cst_92 {dimension_numbers = #tpu.dot_dimension_numbers<[1], [0], [0], [1], [0, 0, 1, 1], [], []>} : vector<256x64xbf16>, vector<64x128xbf16>, vector<256x128xf32> -> vector<256x128xf32>
    %101 = arith.addf %93, %100 : vector<256x128xf32>
    %c0_93 = arith.constant 0 : index
    %c0_94 = arith.constant 0 : index
    %c2_95 = arith.constant 2 : index
    %c0_96 = arith.constant 0 : index
    %102 = vector.load %arg7[%c0_93, %c0_94, %c2_95, %c0_96] : memref<1x18x18x64xf32, #tpu.memory_space<vmem>>, vector<1x16x16x64xf32>
    %103 = vector.shape_cast %102 : vector<1x16x16x64xf32> to vector<16x16x64xf32>
    %104 = vector.shape_cast %103 : vector<16x16x64xf32> to vector<256x64xf32>
    %105 = arith.truncf %104 : vector<256x64xf32> to vector<256x64xbf16>
    %c2_97 = arith.constant 2 : index
    %c0_98 = arith.constant 0 : index
    %c0_99 = arith.constant 0 : index
    %106 = vector.load %arg4[%c2_97, %c0_98, %c0_99] : memref<9x64x128xbf16, #tpu.memory_space<vmem>>, vector<1x64x128xbf16>
    %107 = vector.shape_cast %106 : vector<1x64x128xbf16> to vector<64x128xbf16>
    %cst_100 = arith.constant dense<0.000000e+00> : vector<256x128xf32>
    %108 = tpu.matmul %105, %107, %cst_100 {dimension_numbers = #tpu.dot_dimension_numbers<[1], [0], [0], [1], [0, 0, 1, 1], [], []>} : vector<256x64xbf16>, vector<64x128xbf16>, vector<256x128xf32> -> vector<256x128xf32>
    %109 = arith.addf %101, %108 : vector<256x128xf32>
    %c0_101 = arith.constant 0 : index
    %c1_102 = arith.constant 1 : index
    %c0_103 = arith.constant 0 : index
    %c0_104 = arith.constant 0 : index
    %110 = vector.load %arg7[%c0_101, %c1_102, %c0_103, %c0_104] : memref<1x18x18x64xf32, #tpu.memory_space<vmem>>, vector<1x16x16x64xf32>
    %111 = vector.shape_cast %110 : vector<1x16x16x64xf32> to vector<16x16x64xf32>
    %112 = vector.shape_cast %111 : vector<16x16x64xf32> to vector<256x64xf32>
    %113 = arith.truncf %112 : vector<256x64xf32> to vector<256x64xbf16>
    %c3_105 = arith.constant 3 : index
    %c0_106 = arith.constant 0 : index
    %c0_107 = arith.constant 0 : index
    %114 = vector.load %arg4[%c3_105, %c0_106, %c0_107] : memref<9x64x128xbf16, #tpu.memory_space<vmem>>, vector<1x64x128xbf16>
    %115 = vector.shape_cast %114 : vector<1x64x128xbf16> to vector<64x128xbf16>
    %cst_108 = arith.constant dense<0.000000e+00> : vector<256x128xf32>
    %116 = tpu.matmul %113, %115, %cst_108 {dimension_numbers = #tpu.dot_dimension_numbers<[1], [0], [0], [1], [0, 0, 1, 1], [], []>} : vector<256x64xbf16>, vector<64x128xbf16>, vector<256x128xf32> -> vector<256x128xf32>
    %117 = arith.addf %109, %116 : vector<256x128xf32>
    %c0_109 = arith.constant 0 : index
    %c1_110 = arith.constant 1 : index
    %c1_111 = arith.constant 1 : index
    %c0_112 = arith.constant 0 : index
    %118 = vector.load %arg7[%c0_109, %c1_110, %c1_111, %c0_112] : memref<1x18x18x64xf32, #tpu.memory_space<vmem>>, vector<1x16x16x64xf32>
    %119 = vector.shape_cast %118 : vector<1x16x16x64xf32> to vector<16x16x64xf32>
    %120 = vector.shape_cast %119 : vector<16x16x64xf32> to vector<256x64xf32>
    %121 = arith.truncf %120 : vector<256x64xf32> to vector<256x64xbf16>
    %c4_113 = arith.constant 4 : index
    %c0_114 = arith.constant 0 : index
    %c0_115 = arith.constant 0 : index
    %122 = vector.load %arg4[%c4_113, %c0_114, %c0_115] : memref<9x64x128xbf16, #tpu.memory_space<vmem>>, vector<1x64x128xbf16>
    %123 = vector.shape_cast %122 : vector<1x64x128xbf16> to vector<64x128xbf16>
    %cst_116 = arith.constant dense<0.000000e+00> : vector<256x128xf32>
    %124 = tpu.matmul %121, %123, %cst_116 {dimension_numbers = #tpu.dot_dimension_numbers<[1], [0], [0], [1], [0, 0, 1, 1], [], []>} : vector<256x64xbf16>, vector<64x128xbf16>, vector<256x128xf32> -> vector<256x128xf32>
    %125 = arith.addf %117, %124 : vector<256x128xf32>
    %c0_117 = arith.constant 0 : index
    %c1_118 = arith.constant 1 : index
    %c2_119 = arith.constant 2 : index
    %c0_120 = arith.constant 0 : index
    %126 = vector.load %arg7[%c0_117, %c1_118, %c2_119, %c0_120] : memref<1x18x18x64xf32, #tpu.memory_space<vmem>>, vector<1x16x16x64xf32>
    %127 = vector.shape_cast %126 : vector<1x16x16x64xf32> to vector<16x16x64xf32>
    %128 = vector.shape_cast %127 : vector<16x16x64xf32> to vector<256x64xf32>
    %129 = arith.truncf %128 : vector<256x64xf32> to vector<256x64xbf16>
    %c5_121 = arith.constant 5 : index
    %c0_122 = arith.constant 0 : index
    %c0_123 = arith.constant 0 : index
    %130 = vector.load %arg4[%c5_121, %c0_122, %c0_123] : memref<9x64x128xbf16, #tpu.memory_space<vmem>>, vector<1x64x128xbf16>
    %131 = vector.shape_cast %130 : vector<1x64x128xbf16> to vector<64x128xbf16>
    %cst_124 = arith.constant dense<0.000000e+00> : vector<256x128xf32>
    %132 = tpu.matmul %129, %131, %cst_124 {dimension_numbers = #tpu.dot_dimension_numbers<[1], [0], [0], [1], [0, 0, 1, 1], [], []>} : vector<256x64xbf16>, vector<64x128xbf16>, vector<256x128xf32> -> vector<256x128xf32>
    %133 = arith.addf %125, %132 : vector<256x128xf32>
    %c0_125 = arith.constant 0 : index
    %c2_126 = arith.constant 2 : index
    %c0_127 = arith.constant 0 : index
    %c0_128 = arith.constant 0 : index
    %134 = vector.load %arg7[%c0_125, %c2_126, %c0_127, %c0_128] : memref<1x18x18x64xf32, #tpu.memory_space<vmem>>, vector<1x16x16x64xf32>
    %135 = vector.shape_cast %134 : vector<1x16x16x64xf32> to vector<16x16x64xf32>
    %136 = vector.shape_cast %135 : vector<16x16x64xf32> to vector<256x64xf32>
    %137 = arith.truncf %136 : vector<256x64xf32> to vector<256x64xbf16>
    %c6_129 = arith.constant 6 : index
    %c0_130 = arith.constant 0 : index
    %c0_131 = arith.constant 0 : index
    %138 = vector.load %arg4[%c6_129, %c0_130, %c0_131] : memref<9x64x128xbf16, #tpu.memory_space<vmem>>, vector<1x64x128xbf16>
    %139 = vector.shape_cast %138 : vector<1x64x128xbf16> to vector<64x128xbf16>
    %cst_132 = arith.constant dense<0.000000e+00> : vector<256x128xf32>
    %140 = tpu.matmul %137, %139, %cst_132 {dimension_numbers = #tpu.dot_dimension_numbers<[1], [0], [0], [1], [0, 0, 1, 1], [], []>} : vector<256x64xbf16>, vector<64x128xbf16>, vector<256x128xf32> -> vector<256x128xf32>
    %141 = arith.addf %133, %140 : vector<256x128xf32>
    %c0_133 = arith.constant 0 : index
    %c2_134 = arith.constant 2 : index
    %c1_135 = arith.constant 1 : index
    %c0_136 = arith.constant 0 : index
    %142 = vector.load %arg7[%c0_133, %c2_134, %c1_135, %c0_136] : memref<1x18x18x64xf32, #tpu.memory_space<vmem>>, vector<1x16x16x64xf32>
    %143 = vector.shape_cast %142 : vector<1x16x16x64xf32> to vector<16x16x64xf32>
    %144 = vector.shape_cast %143 : vector<16x16x64xf32> to vector<256x64xf32>
    %145 = arith.truncf %144 : vector<256x64xf32> to vector<256x64xbf16>
    %c7_137 = arith.constant 7 : index
    %c0_138 = arith.constant 0 : index
    %c0_139 = arith.constant 0 : index
    %146 = vector.load %arg4[%c7_137, %c0_138, %c0_139] : memref<9x64x128xbf16, #tpu.memory_space<vmem>>, vector<1x64x128xbf16>
    %147 = vector.shape_cast %146 : vector<1x64x128xbf16> to vector<64x128xbf16>
    %cst_140 = arith.constant dense<0.000000e+00> : vector<256x128xf32>
    %148 = tpu.matmul %145, %147, %cst_140 {dimension_numbers = #tpu.dot_dimension_numbers<[1], [0], [0], [1], [0, 0, 1, 1], [], []>} : vector<256x64xbf16>, vector<64x128xbf16>, vector<256x128xf32> -> vector<256x128xf32>
    %149 = arith.addf %141, %148 : vector<256x128xf32>
    %c0_141 = arith.constant 0 : index
    %c2_142 = arith.constant 2 : index
    %c2_143 = arith.constant 2 : index
    %c0_144 = arith.constant 0 : index
    %150 = vector.load %arg7[%c0_141, %c2_142, %c2_143, %c0_144] : memref<1x18x18x64xf32, #tpu.memory_space<vmem>>, vector<1x16x16x64xf32>
    %151 = vector.shape_cast %150 : vector<1x16x16x64xf32> to vector<16x16x64xf32>
    %152 = vector.shape_cast %151 : vector<16x16x64xf32> to vector<256x64xf32>
    %153 = arith.truncf %152 : vector<256x64xf32> to vector<256x64xbf16>
    %c8_145 = arith.constant 8 : index
    %c0_146 = arith.constant 0 : index
    %c0_147 = arith.constant 0 : index
    %154 = vector.load %arg4[%c8_145, %c0_146, %c0_147] : memref<9x64x128xbf16, #tpu.memory_space<vmem>>, vector<1x64x128xbf16>
    %155 = vector.shape_cast %154 : vector<1x64x128xbf16> to vector<64x128xbf16>
    %cst_148 = arith.constant dense<0.000000e+00> : vector<256x128xf32>
    %156 = tpu.matmul %153, %155, %cst_148 {dimension_numbers = #tpu.dot_dimension_numbers<[1], [0], [0], [1], [0, 0, 1, 1], [], []>} : vector<256x64xbf16>, vector<64x128xbf16>, vector<256x128xf32> -> vector<256x128xf32>
    %157 = arith.addf %149, %156 : vector<256x128xf32>
    %c0_149 = arith.constant 0 : index
    %c0_150 = arith.constant 0 : index
    %158 = vector.load %arg5[%c0_149, %c0_150] : memref<1x128xf32, #tpu.memory_space<vmem>>, vector<1x128xf32>
    %159 = vector.broadcast %158 : vector<1x128xf32> to vector<256x128xf32>
    %160 = arith.addf %157, %159 : vector<256x128xf32>
    %c0_151 = arith.constant 0 : index
    %c1_152 = arith.constant 1 : index
    %c1_153 = arith.constant 1 : index
    %c0_154 = arith.constant 0 : index
    %161 = vector.load %arg1[%c0_151, %c1_152, %c1_153, %c0_154] : memref<1x18x18x128xf32, #tpu.memory_space<vmem>>, vector<1x16x16x128xf32>
    %162 = vector.shape_cast %161 : vector<1x16x16x128xf32> to vector<16x16x128xf32>
    %163 = vector.shape_cast %162 : vector<16x16x128xf32> to vector<256x128xf32>
    %cst_155 = arith.constant 2.000000e-01 : f32
    %164 = vector.broadcast %cst_155 : f32 to vector<256x128xf32>
    %165 = arith.mulf %164, %163 : vector<256x128xf32>
    %166 = arith.addf %165, %160 : vector<256x128xf32>
    %167 = vector.shape_cast %166 : vector<256x128xf32> to vector<1x16x16x128xf32>
    %c0_156 = arith.constant 0 : index
    %c0_157 = arith.constant 0 : index
    %c0_158 = arith.constant 0 : index
    %c0_159 = arith.constant 0 : index
    %168 = vector.load %arg6[%c0_156, %c0_157, %c0_158, %c0_159] : memref<1x16x16x128xf32, #tpu.memory_space<vmem>>, vector<1x16x16x128xf32>
    tpu.vector_store %arg6[%c0_156, %c0_157, %c0_158, %c0_159], %167 {strides = array<i32>} : memref<1x16x16x128xf32, #tpu.memory_space<vmem>>, vector<1x16x16x128xf32>,
    return
  }
  func.func @transform_0(%arg0: i32) -> (i32, i32, i32, i32) {
    %c0_i32 = arith.constant 0 : i32
    %c0_i32_0 = arith.constant 0 : i32
    %c0_i32_1 = arith.constant 0 : i32
    %c0_i32_2 = arith.constant 0 : i32
    return %arg0, %c0_i32, %c0_i32_0, %c0_i32_1 : i32, i32, i32, i32
  }
  func.func @transform_1(%arg0: i32) -> (i32, i32, i32) {
    %c0_i32 = arith.constant 0 : i32
    %c0_i32_0 = arith.constant 0 : i32
    %c0_i32_1 = arith.constant 0 : i32
    %c0_i32_2 = arith.constant 0 : i32
    return %c0_i32, %c0_i32_0, %c0_i32_1 : i32, i32, i32
  }
  func.func @transform_2(%arg0: i32) -> (i32, i32) {
    %c0_i32 = arith.constant 0 : i32
    %c0_i32_0 = arith.constant 0 : i32
    %c0_i32_1 = arith.constant 0 : i32
    return %c0_i32, %c0_i32_0 : i32, i32
  }
  func.func @transform_3(%arg0: i32) -> (i32, i32, i32) {
    %c0_i32 = arith.constant 0 : i32
    %c0_i32_0 = arith.constant 0 : i32
    %c0_i32_1 = arith.constant 0 : i32
    %c0_i32_2 = arith.constant 0 : i32
    return %c0_i32, %c0_i32_0, %c0_i32_1 : i32, i32, i32
  }
  func.func @transform_4(%arg0: i32) -> (i32, i32) {
    %c0_i32 = arith.constant 0 : i32
    %c0_i32_0 = arith.constant 0 : i32
    %c0_i32_1 = arith.constant 0 : i32
    return %c0_i32, %c0_i32_0 : i32, i32
  }
  func.func @transform_5(%arg0: i32) -> (i32, i32, i32, i32) {
    %c0_i32 = arith.constant 0 : i32
    %c0_i32_0 = arith.constant 0 : i32
    %c0_i32_1 = arith.constant 0 : i32
    %c0_i32_2 = arith.constant 0 : i32
    return %arg0, %c0_i32, %c0_i32_0, %c0_i32_1 : i32, i32, i32, i32
  }
}

</mosaic_0001>

<bundles_post_ra>
// kernel: resblock_forward.1
= control target key start
LH: loop header
LB: loop body
LE: loop exit
PB: predicated region body
PF: predicated region fallthrough
CT: control target
= control target key end

     0   :  { %10 = vsyncpa [#allocation4], 0  ;;  %s10249_s0 = inlined_call_operand.vmem [shape: f32[2,18,18,128], index: 0, kind: input, shape index: {}]   ;;  %s10250_s1 = inlined_call_operand.vmem [shape: bf16[9,128,64], index: 1, kind: input, shape index: {}]   ;;  %s10251_s2 = inlined_call_operand.vmem [shape: f32[1,64], index: 2, kind: input, shape index: {}]   ;;  %s10252_s3 = inlined_call_operand.vmem [shape: bf16[9,64,128], index: 3, kind: input, shape index: {}]   ;;  %s10253_s4 = inlined_call_operand.vmem [shape: f32[1,128], index: 4, kind: input, shape index: {}]   ;;  %s10254_s5 = inlined_call_operand.hbm [shape: f32[2,16,16,128], index: 5, kind: output, shape index: {}]  }
   0x1   :  { %12 = vsyncpa [#allocation4 + $0x1], 0  ;;  %s8847_s18 = smov 0   ;;  %s8849_s19 = smov 0  }
   0x2   :  { %s8851_s20 = smov 0   ;;  %s8853_s21 = smov 0  }
   0x3 LB: > { %s8868_s22 = sadd.s32 4294967295, %s8811_s21   ;;  %s6216_s23 = sadd.s32 4294967294, %s8811_s21   ;;  %s8811_s21 = sphi %s8853_s21, %s10260_s21   ;;  %s8807_s20 = sphi %s8851_s20, %s10259_s20   ;;  %s8803_s19 = sphi %s8849_s19, %s10258_s19   ;;  %s8799_s18 = sphi %s8847_s18, %s10257_s18  }
   0x4   : > { %s8872_s24 = sadd.s32 1, %s8811_s21   ;;  %s135_s25 = sadd.s32 1, %s8807_s20 }
   0x5   : > { %s132_s26 = ssub.s32 %s8811_s21, %s8872_s24  ;;  %p145_p0 = scmp.ne.s32.totalorder %s8807_s20, %s8803_s19 }
   0x6   : > { %p133_p1 = scmp.eq.s32.totalorder %s132_s26, 0  ;;  %p146_p2 = scmp.eq.s32.totalorder %s8868_s22, 1 }
   0x7   : > { %p151_p3 = scmp.ne.s32.totalorder %s8803_s19, %s8799_s18  ;;  %p152_p4 = scmp.eq.s32.totalorder %s6216_s23, 1 }
   0x8   : > { %s8883_s27 = scalar_select %p133_p1, %s8807_s20, %s135_s25  }
   0x9   : > { %p8885_p5 = por %p146_p2, %p145_p0  ;;  %p8889_p6 = por %p152_p4, %p151_p3 }
   0xa   : > { %p6219_p7 = scmp.ge.s32.totalorder %s8811_s21, 1  ;;  %p190_p8 = scmp.lt.s32.totalorder %s8811_s21, 3 }
   0xc   : > { %p191_p9 = pnand %p6219_p7, %p190_p8 }
   0xd   : > { %v8641_v0 = vld [vmem:[%s10250_s1 + $0x40] sm:$0xff] (!%p191_p9)   ;;  %p218_p10 = scmp.lt.s32.totalorder (!%p191_p9), %s8868_s22, 1  ;;  %v8642_v1 = vld [vmem:[%s10250_s1 + $0x48] sm:$0xff] (!%p191_p9)   ;;  %v8643_v2 = vld [vmem:[%s10250_s1 + $0x50] sm:$0xff] (!%p191_p9)   ;;  %vm3050_vm0 = vcmask (!%p191_p9), 523264   ;;  %vm3053_vm1 = vcmask (!%p191_p9), 517120  }
   0xe   : > { %194 = sbr.rel (%p191_p9) target bundleno = 1590 (0x636), region = 40  ;;  %7294 = vmatprep.subr.bf16.mxu0 (!%p191_p9), %v8641_v0  ;;  %v8644_v3 = vld [vmem:[%s10250_s1 + $0x58] sm:$0xff] (!%p191_p9)   ;;  %v8645_v7 = vld [vmem:[%s10250_s1 + $0x60] sm:$0xff] (!%p191_p9)   ;;  %v8646_v8 = vld [vmem:[%s10250_s1 + $0x68] sm:$0xff] (!%p191_p9)   ;;  %s215_s23 = sand.u32 (!%p191_p9), 1, %s8803_s19  }
   0xf   : > { %7295 = vmatpush3.bf16.msra.mxu0 (!%p191_p9), %v8641_v0  ;;  %v8647_v9 = vld [vmem:[%s10250_s1 + $0x70] sm:$0xff] (!%p191_p9)   ;;  %v8648_v10 = vld [vmem:[%s10250_s1 + $0x78] sm:$0xff] (!%p191_p9)   ;;  %v8649_v13 = vld [vmem:[%s10250_s1] sm:$0xff] (!%p191_p9)   ;;  %s6220_s30 = sshll.u32 (!%p191_p9), %s215_s23, 8  ;;  %s6897_s7 = sshll.u32 (!%p191_p9), %s8868_s22, 12 }
  0x10   : > { %7296 = vmatprep.subr.bf16.mxu0 (!%p191_p9), %v8642_v1  ;;  %v8650_v18 = vld [vmem:[%s10250_s1 + $0x8] sm:$0xff] (!%p191_p9)   ;;  %v8651_v23 = vld [vmem:[%s10250_s1 + $0x10] sm:$0xff] (!%p191_p9)   ;;  %v8652_v26 = vld [vmem:[%s10250_s1 + $0x18] sm:$0xff] (!%p191_p9)   ;;  %s10108_s6 = scalar_lea.vmem (!%p191_p9), [#allocation3], %s6220_s30  ;;  %s10199_s10 = scalar_lea.hbm (!%p191_p9), %s10254_s5, %s6897_s7 }
  0x11   : > { %v8653_v31 = vld [vmem:[%s10250_s1 + $0x20] sm:$0xff] (!%p191_p9)   ;;  %v8654_v34 = vld [vmem:[%s10250_s1 + $0x28] sm:$0xff] (!%p191_p9)   ;;  %v8655_v39 = vld [vmem:[%s10250_s1 + $0x30] sm:$0xff] (!%p191_p9)   ;;  %s6154_s8 = sshll.u32 (!%p191_p9), %s10108_s6, 4  ;;  %s10201_s8 = int_to_ptr.vmem [resolvable:$true] %s6154_s8 }
  0x12   : > { %v8656_v41 = vld [vmem:[%s10250_s1 + $0x38] sm:$0xff] (!%p191_p9)   ;;  %v8657_v47 = vld [vmem:[%s10250_s1 + $0x80] sm:$0xff] (!%p191_p9)   ;;  %s8749_s11 = scalar_lea.vmem (!%p191_p9), %s10201_s8, 4096 }
  0x13   : > { %7297 = vmatpush3.bf16.msra.mxu0 (!%p191_p9), %v8642_v1  ;;  %p8750_p11 = scmp.ne.s32.totalorder (!%p191_p9), %s10201_s8, %s8749_s11 }
  0x14   : > { %7298 = vmatprep.subr.bf16.mxu0 (!%p191_p9), %v8643_v2 }
  0x15   : > { %s219_s9 = scalar_select %p218_p10, %s8868_s22, 1 }
  0x16   : > { %s10208_s22 = scalar_lea.sflag [#allocation4], %s215_s23  ;;  %p8751_p12 = pnand %p8750_p11, %p8885_p5 }
  0x17   : > { %s8598_s12 = smul.u32 432, %s219_s9  ;;  %7299 = vmatpush3.bf16.msra.mxu0 %v8643_v2 }
  0x18   : > { %7300 = vmatprep.subr.bf16.mxu0 %v8644_v3  ;;  %p8752_p13 = pneg %p8751_p12 }
  0x19   : > { %s8909_s15 = scalar_lea.vmem %s10249_s0, %s8598_s12  ;;  %s8814_s12 = smov [#allocation3]  }
  0x1a   : > { %v288_v4 = vld [vmem:[%s8909_s15 + $0x1] sm:$0xff]  ;;  %v289_v5 = vld [vmem:[%s8909_s15 + $0x9] sm:$0xff]  ;;  %v290_v11 = vld [vmem:[%s8909_s15 + $0x19] sm:$0xff]  ;;  %s8753_s13 = sshll.u32 %s8814_s12, 4  ;;  %s8754_s13 = int_to_ptr.vmem [resolvable:$false] %s8753_s13 }
  0x1b   : > { %v320_v6 = vpack.c.bf16 %v289_v5, %v288_v4  ;;  %7301 = vmatpush3.bf16.msra.mxu0 %v8644_v3  ;;  %v291_v12 = vld [vmem:[%s8909_s15 + $0x21] sm:$0xff]  ;;  %v292_v14 = vld [vmem:[%s8909_s15 + $0x31] sm:$0xff]  ;;  %v293_v15 = vld [vmem:[%s8909_s15 + $0x39] sm:$0xff]  ;;  %s8755_s14 = scalar_lea.vmem %s8754_s13, 8192  ;;  %p8756_p0 = scmp.lt.s32.totalorder %s10201_s8, %s8754_s13 }
  0x1c   : > { %7302 = vmatprep.subr.bf16.mxu0 %v8645_v7  ;;  %v8935_v16 = vpack.c.bf16 %v291_v12, %v290_v11  ;;  %v8937_v17 = vpack.c.bf16 %v293_v15, %v292_v14  ;;  %v294_v19 = vld [vmem:[%s8909_s15 + $0x49] sm:$0xff]  ;;  %v295_v20 = vld [vmem:[%s8909_s15 + $0x51] sm:$0xff]  ;;  %v296_v21 = vld [vmem:[%s8909_s15 + $0x61] sm:$0xff]  ;;  %p8757_p1 = scmp.lt.s32.totalorder %s8755_s14, %s8749_s11 }
  0x1d   : > { %7310 = vmatprep.mubr.bf16.mxu0 %v320_v6  ;;  %v297_v22 = vld [vmem:[%s8909_s15 + $0x69] sm:$0xff]  ;;  %v8951_v24 = vpack.c.bf16 %v295_v20, %v294_v19  ;;  %v298_v27 = vld [vmem:[%s8909_s15 + $0x79] sm:$0xff]  ;;  %v299_v28 = vld [vmem:[%s8909_s15 + $0x81] sm:$0xff] }
  0x1e   : > { %v8953_v25 = vpack.c.bf16 %v297_v22, %v296_v21  ;;  %v300_v29 = vld [vmem:[%s8909_s15 + $0x91] sm:$0xff]  ;;  %v301_v30 = vld [vmem:[%s8909_s15 + $0x99] sm:$0xff]  ;;  %v8967_v32 = vpack.c.bf16 %v299_v28, %v298_v27  ;;  %v302_v35 = vld [vmem:[%s8909_s15 + $0xa9] sm:$0xff]  ;;  %p8758_p2 = por %p8757_p1, %p8756_p0 }
  0x1f   : > { %7303 = vmatpush3.bf16.msra.mxu0 %v8645_v7  ;;  %v8969_v33 = vpack.c.bf16 %v301_v30, %v300_v29  ;;  %v303_v36 = vld [vmem:[%s8909_s15 + $0xb1] sm:$0xff]  ;;  %v304_v37 = vld [vmem:[%s8909_s15 + $0xc1] sm:$0xff]  ;;  %v305_v38 = vld [vmem:[%s8909_s15 + $0xc9] sm:$0xff] }
  0x20   : > { %7304 = vmatprep.subr.bf16.mxu0 %v8646_v8  ;;  %v8983_v40 = vpack.c.bf16 %v303_v36, %v302_v35  ;;  %v8988_v42 = vpack.c.bf16 %v305_v38, %v304_v37  ;;  %v306_v43 = vld [vmem:[%s8909_s15 + $0xd9] sm:$0xff]  ;;  %v307_v44 = vld [vmem:[%s8909_s15 + $0xe1] sm:$0xff]  ;;  %v308_v45 = vld [vmem:[%s8909_s15 + $0xf1] sm:$0xff]  ;;  %p8759_p3 = pnand %p8758_p2, %p8752_p13 }
  0x21   : > { %v309_v46 = vld [vmem:[%s8909_s15 + $0xf9] sm:$0xff]  ;;  %v8999_v48 = vpack.c.bf16 %v307_v44, %v306_v43  ;;  %v310_v50 = vld [vmem:[%s8909_s15 + $0x109] sm:$0xff]  ;;  %v311_v51 = vld [vmem:[%s8909_s15 + $0x111] sm:$0xff] }
  0x22   : > { %v9001_v49 = vpack.c.bf16 %v309_v46, %v308_v45  ;;  %v312_v52 = vld [vmem:[%s8909_s15 + $0x121] sm:$0xff]  ;;  %v313_v53 = vld [vmem:[%s8909_s15 + $0x129] sm:$0xff]  ;;  %v9009_v54 = vpack.c.bf16 %v311_v51, %v310_v50  ;;  %v314_v56 = vld [vmem:[%s8909_s15 + $0x139] sm:$0xff] }
  0x23   : > { %7305 = vmatpush3.bf16.msra.mxu0 %v8646_v8  ;;  %v9011_v55 = vpack.c.bf16 %v313_v53, %v312_v52  ;;  %v315_v57 = vld [vmem:[%s8909_s15 + $0x141] sm:$0xff]  ;;  %v316_v58 = vld [vmem:[%s8909_s15 + $0x151] sm:$0xff]  ;;  %v317_v59 = vld [vmem:[%s8909_s15 + $0x159] sm:$0xff] }
  0x24   : > { %7306 = vmatprep.subr.bf16.mxu0 %v8647_v9  ;;  %v9019_v60 = vpack.c.bf16 %v315_v57, %v314_v56  ;;  %v9021_v61 = vpack.c.bf16 %v317_v59, %v316_v58  ;;  %v318_v62 = vld [vmem:[%s8909_s15 + $0x169] sm:$0xff]  ;;  %v319_v63 = vld [vmem:[%s8909_s15 + $0x171] sm:$0xff]  ;;  %v224_v0 = vld [vmem:[%s8909_s15] sm:$0xff] }
  0x25   : > { %v225_v1 = vld [vmem:[%s8909_s15 + $0x8] sm:$0xff]  ;;  %v9029_v2 = vpack.c.bf16 %v319_v63, %v318_v62  ;;  %v226_v4 = vld [vmem:[%s8909_s15 + $0x18] sm:$0xff]  ;;  %v227_v5 = vld [vmem:[%s8909_s15 + $0x20] sm:$0xff] }
  0x26   : > { %v256_v3 = vpack.c.bf16 %v225_v1, %v224_v0  ;;  %v228_v6 = vld [vmem:[%s8909_s15 + $0x30] sm:$0xff]  ;;  %v229_v7 = vld [vmem:[%s8909_s15 + $0x38] sm:$0xff]  ;;  %v9036_v8 = vpack.c.bf16 %v227_v5, %v226_v4  ;;  %v230_v11 = vld [vmem:[%s8909_s15 + $0x48] sm:$0xff] }
  0x27   : > { %7307 = vmatpush3.bf16.msra.mxu0 %v8647_v9  ;;  %v8658_v9 = vld [vmem:[%s10250_s1 + $0x88] sm:$0xff]   ;;  %v231_v12 = vld [vmem:[%s8909_s15 + $0x50] sm:$0xff]  ;;  %v8660_v19 = vld [vmem:[%s10250_s1 + $0x98] sm:$0xff]  }
  0x28   : > { %7308 = vmatprep.subr.bf16.mxu0 %v8648_v10  ;;  %v233_v14 = vld [vmem:[%s8909_s15 + $0x68] sm:$0xff]  ;;  %v8659_v15 = vld [vmem:[%s10250_s1 + $0x90] sm:$0xff]   ;;  %v234_v21 = vld [vmem:[%s8909_s15 + $0x78] sm:$0xff] }
  0x29   : > { %v235_v22 = vld [vmem:[%s8909_s15 + $0x80] sm:$0xff]  ;;  %v8662_v29 = vld [vmem:[%s10250_s1 + $0xa8] sm:$0xff]   ;;  %v8663_v37 = vld [vmem:[%s10250_s1 + $0xb0] sm:$0xff]  }
  0x2a   : > { %v8661_v27 = vld [vmem:[%s10250_s1 + $0xa0] sm:$0xff]   ;;  %v9068_v28 = vpack.c.bf16 %v235_v22, %v234_v21  ;;  %v241_v36 = vld [vmem:[%s8909_s15 + $0xc8] sm:$0xff]  ;;  %v242_v43 = vld [vmem:[%s8909_s15 + $0xd8] sm:$0xff] }
  0x2b   : > { %7309 = vmatpush3.bf16.msra.mxu0 %v8648_v10  ;;  %v9041_v10 = vpack.c.bf16 %v229_v7, %v228_v6  ;;  %v240_v35 = vld [vmem:[%s8909_s15 + $0xc0] sm:$0xff]  ;;  %v244_v45 = vld [vmem:[%s8909_s15 + $0xf0] sm:$0xff]  ;;  %v245_v46 = vld [vmem:[%s8909_s15 + $0xf8] sm:$0xff] }
  0x2c   : > { %7342 = vmatprep.subr.bf16.mxu0 %v8649_v13  ;;  %v243_v44 = vld [vmem:[%s8909_s15 + $0xe0] sm:$0xff]  ;;  %v9102_v51 = vpack.c.bf16 %v245_v46, %v244_v45  ;;  %v246_v52 = vld [vmem:[%s8909_s15 + $0x108] sm:$0xff]  ;;  %v247_v53 = vld [vmem:[%s8909_s15 + $0x110] sm:$0xff] }
  0x2d   : > { %v9100_v50 = vpack.c.bf16 %v243_v44, %v242_v43  ;;  %v248_v56 = vld [vmem:[%s8909_s15 + $0x120] sm:$0xff]  ;;  %v249_v57 = vld [vmem:[%s8909_s15 + $0x128] sm:$0xff]  ;;  %v9110_v58 = vpack.c.bf16 %v247_v53, %v246_v52  ;;  %v250_v62 = vld [vmem:[%s8909_s15 + $0x138] sm:$0xff] }
  0x2e   : > { %7311 = vmatmul.mubr.bf16.vlgmr.msra.gmra.mrb[0].mxu0 %v8935_v16  ;;  %v9112_v59 = vpack.c.bf16 %v249_v57, %v248_v56  ;;  %v251_v63 = vld [vmem:[%s8909_s15 + $0x140] sm:$0xff]  ;;  %v252_v0 = vld [vmem:[%s8909_s15 + $0x150] sm:$0xff]  ;;  %v253_v1 = vld [vmem:[%s8909_s15 + $0x158] sm:$0xff] }
  0x2f   : > { %7343 = vmatpush3.bf16.msra.mxu0 %v8649_v13  ;;  %7314 = vmatprep.mubr.bf16.mxu0 %v8937_v17  ;;  %v232_v13 = vld [vmem:[%s8909_s15 + $0x60] sm:$0xff]  ;;  %v9122_v4 = vpack.c.bf16 %v253_v1, %v252_v0  ;;  %v254_v5 = vld [vmem:[%s8909_s15 + $0x168] sm:$0xff]  ;;  %v255_v6 = vld [vmem:[%s8909_s15 + $0x170] sm:$0xff] }
  0x30   : > { %7344 = vmatprep.subr.bf16.mxu0 %v8650_v18  ;;  %v9057_v20 = vpack.c.bf16 %v233_v14, %v232_v13  ;;  %v771_v7 = vld [vmem:[%s8909_s15 + $0x2] sm:$0xff]  ;;  %v773_v13 = vld [vmem:[%s8909_s15 + $0x1a] sm:$0xff]  ;;  %v783_v44 = vld [vmem:[%s8909_s15 + $0x92] sm:$0xff] }
  0x31   : > { %v774_v14 = vld [vmem:[%s8909_s15 + $0x22] sm:$0xff]  ;;  %v784_v45 = vld [vmem:[%s8909_s15 + $0x9a] sm:$0xff]  ;;  %v785_v56 = vld [vmem:[%s8909_s15 + $0xaa] sm:$0xff] }
  0x32   : > { %v9137_v21 = vpack.c.bf16 %v774_v14, %v773_v13  ;;  %v782_v43 = vld [vmem:[%s8909_s15 + $0x82] sm:$0xff]  ;;  %v9171_v52 = vpack.c.bf16 %v784_v45, %v783_v44  ;;  %v786_v57 = vld [vmem:[%s8909_s15 + $0xb2] sm:$0xff]  ;;  %v792_v13 = vld [vmem:[%s8909_s15 + $0xfa] sm:$0xff] }
  0x33   : > { %7345 = vmatpush3.bf16.msra.mxu0 %v8650_v18  ;;  %v9052_v18 = vpack.c.bf16 %v231_v12, %v230_v11  ;;  %v9130_v11 = vpack.c.bf16 %v255_v6, %v254_v5  ;;  %v8669_v46 = vld [vmem:[%s10250_s1 + $0xe0] sm:$0xff]   ;;  %v8670_v53 = vld [vmem:[%s10250_s1 + $0xe8] sm:$0xff]   ;;  %v8671_v0 = vld [vmem:[%s10250_s1 + $0xf0] sm:$0xff]   ;;  %v9185_v1 = vpack.c.bf16 %v786_v57, %v785_v56 }
  0x34   : > { %7346 = vmatprep.subr.bf16.mxu0 %v8651_v23  ;;  %v8672_v6 = vld [vmem:[%s10250_s1 + $0xf8] sm:$0xff]   ;;  %v8673_v14 = vld [vmem:[%s10250_s1 + $0x100] sm:$0xff]  }
  0x35   : > { %v800_v44 = vld [vmem:[%s8909_s15 + $0x15a] sm:$0xff]  ;;  %v802_v56 = vld [vmem:[%s8909_s15 + $0x172] sm:$0xff] }
  0x36   : > { %7315 = vmatmul.mubr.bf16.gmra.mrb[4].mxu0 %v8951_v24 }
  0x37   : > { %7318 = vmatprep.mubr.bf16.mxu0 %v8953_v25  ;;  %7347 = vmatpush3.bf16.msra.mxu0 %v8651_v23  ;;  %v236_v23 = vld [vmem:[%s8909_s15 + $0x90] sm:$0xff] }
  0x38   : > { %7348 = vmatprep.subr.bf16.mxu0 %v8652_v26 }
  0x3b   : > { %7349 = vmatpush3.bf16.msra.mxu0 %v8652_v26  ;;  %v237_v26 = vld [vmem:[%s8909_s15 + $0x98] sm:$0xff] }
  0x3c   : > { %7350 = vmatprep.subr.bf16.mxu0 %v8653_v31  ;;  %v9073_v30 = vpack.c.bf16 %v237_v26, %v236_v23  ;;  %v8666_v23 = vld [vmem:[%s10250_s1 + $0xc8] sm:$0xff]  }
  0x3d   : > { %v777_v26 = vld [vmem:[%s8909_s15 + $0x4a] sm:$0xff] }
  0x3e   : > { %7319 = vmatmul.mubr.bf16.gmra.mrb[8].mxu0 %v8967_v32 }
  0x3f   : > { %7322 = vmatprep.mubr.bf16.mxu0 %v8969_v33  ;;  %7351 = vmatpush3.bf16.msra.mxu0 %v8653_v31  ;;  %v238_v31 = vld [vmem:[%s8909_s15 + $0xa8] sm:$0xff] }
  0x40   : > { %7352 = vmatprep.subr.bf16.mxu0 %v8654_v34 }
  0x43   : > { %7353 = vmatpush3.bf16.msra.mxu0 %v8654_v34  ;;  %v239_v34 = vld [vmem:[%s8909_s15 + $0xb0] sm:$0xff] }
  0x44   : > { %7354 = vmatprep.subr.bf16.mxu0 %v8655_v39  ;;  %v9084_v38 = vpack.c.bf16 %v239_v34, %v238_v31  ;;  %v780_v31 = vld [vmem:[%s8909_s15 + $0x6a] sm:$0xff] }
  0x45   : > { %v8667_v34 = vld [vmem:[%s10250_s1 + $0xd0] sm:$0xff]  }
  0x46   : > { %7323 = vmatmul.mubr.bf16.gmra.mrb[12].mxu0 %v8983_v40 }
  0x47   : > { %7326 = vmatprep.mubr.bf16.mxu0 %v8988_v42  ;;  %7355 = vmatpush3.bf16.msra.mxu0 %v8655_v39  ;;  %v9086_v39 = vpack.c.bf16 %v241_v36, %v240_v35 }
  0x48   : > { %7356 = vmatprep.subr.bf16.mxu0 %v8656_v41 }
  0x4b   : > { %7357 = vmatpush3.bf16.msra.mxu0 %v8656_v41  ;;  %v8664_v41 = vld [vmem:[%s10250_s1 + $0xb8] sm:$0xff]  }
  0x4c   : > { %7390 = vmatprep.subr.bf16.mxu0 %v8657_v47 }
  0x4e   : > { %7327 = vmatmul.mubr.bf16.gmra.mrb[16].mxu0 %v8999_v48 }
  0x4f   : > { %7330 = vmatprep.mubr.bf16.mxu0 %v9001_v49 }
  0x56   : > { %7331 = vmatmul.mubr.bf16.gmra.mrb[20].mxu0 %v9009_v54 }
  0x57   : > { %7334 = vmatprep.mubr.bf16.mxu0 %v9011_v55 }
  0x5e   : > { %7335 = vmatmul.mubr.bf16.gmra.mrb[24].mxu0 %v9019_v60 }
  0x5f   : > { %7338 = vmatprep.mubr.bf16.mxu0 %v9021_v61 }
  0x66   : > { %7339 = vmatmul.mubr.bf16.gmra.mrb[28].mxu0 %v9029_v2 }
  0x67   : > { %7358 = vmatprep.mubr.bf16.mxu0 %v256_v3  ;;  %v9120_v3 = vpack.c.bf16 %v251_v63, %v250_v62  ;;  %v787_v62 = vld [vmem:[%s8909_s15 + $0xc2] sm:$0xff]  ;;  %v788_v63 = vld [vmem:[%s8909_s15 + $0xca] sm:$0xff] }
  0x68   : > { %v9187_v5 = vpack.c.bf16 %v788_v63, %v787_v62  ;;  %v8674_v62 = vld [vmem:[%s10250_s1 + $0x108] sm:$0xff]   ;;  %v8675_v63 = vld [vmem:[%s10250_s1 + $0x110] sm:$0xff]  }
  0x6e   : > { %7359 = vmatmul.mubr.bf16.vlgmr.msra.gmra.mrb[0].mxu0 %v9036_v8 }
  0x6f   : > { %7391 = vmatpush3.bf16.msra.mxu0 %v8657_v47  ;;  %7362 = vmatprep.mubr.bf16.mxu0 %v9041_v10  ;;  %v8665_v47 = vld [vmem:[%s10250_s1 + $0xc0] sm:$0xff]  }
  0x70   : > { %7392 = vmatprep.subr.bf16.mxu0 %v8658_v9 }
  0x73   : > { %7393 = vmatpush3.bf16.msra.mxu0 %v8658_v9  ;;  %v772_v9 = vld [vmem:[%s8909_s15 + $0xa] sm:$0xff] }
  0x74   : > { %7394 = vmatprep.subr.bf16.mxu0 %v8659_v15  ;;  %v803_v12 = vpack.c.bf16 %v772_v9, %v771_v7  ;;  %v789_v7 = vld [vmem:[%s8909_s15 + $0xda] sm:$0xff]  ;;  %v790_v9 = vld [vmem:[%s8909_s15 + $0xe2] sm:$0xff] }
  0x76   : > { %7363 = vmatmul.mubr.bf16.gmra.mrb[4].mxu0 %v9052_v18 }
  0x77   : > { %7366 = vmatprep.mubr.bf16.mxu0 %v9057_v20  ;;  %7395 = vmatpush3.bf16.msra.mxu0 %v8659_v15  ;;  %v775_v15 = vld [vmem:[%s8909_s15 + $0x32] sm:$0xff] }
  0x78   : > { %7396 = vmatprep.subr.bf16.mxu0 %v8660_v19 }
  0x7b   : > { %7397 = vmatpush3.bf16.msra.mxu0 %v8660_v19  ;;  %v776_v19 = vld [vmem:[%s8909_s15 + $0x3a] sm:$0xff] }
  0x7c   : > { %7398 = vmatprep.subr.bf16.mxu0 %v8661_v27  ;;  %v9139_v22 = vpack.c.bf16 %v776_v19, %v775_v15  ;;  %v9201_v15 = vpack.c.bf16 %v790_v9, %v789_v7  ;;  %v8679_v7 = vld [vmem:[%s10250_s1 + $0x130] sm:$0xff]   ;;  %v8680_v9 = vld [vmem:[%s10250_s1 + $0x138] sm:$0xff]  }
  0x7e   : > { %7367 = vmatmul.mubr.bf16.gmra.mrb[8].mxu0 %v9068_v28 }
  0x7f   : > { %7370 = vmatprep.mubr.bf16.mxu0 %v9073_v30  ;;  %7399 = vmatpush3.bf16.msra.mxu0 %v8661_v27  ;;  %v778_v27 = vld [vmem:[%s8909_s15 + $0x52] sm:$0xff] }
  0x80   : > { %7400 = vmatprep.subr.bf16.mxu0 %v8662_v29  ;;  %v9153_v35 = vpack.c.bf16 %v778_v27, %v777_v26  ;;  %v794_v26 = vld [vmem:[%s8909_s15 + $0x112] sm:$0xff]  ;;  %v795_v27 = vld [vmem:[%s8909_s15 + $0x122] sm:$0xff] }
  0x83   : > { %7401 = vmatpush3.bf16.msra.mxu0 %v8662_v29  ;;  %v779_v29 = vld [vmem:[%s8909_s15 + $0x62] sm:$0xff] }
  0x84   : > { %7402 = vmatprep.subr.bf16.mxu0 %v8663_v37  ;;  %v9155_v36 = vpack.c.bf16 %v780_v31, %v779_v29  ;;  %v796_v29 = vld [vmem:[%s8909_s15 + $0x12a] sm:$0xff] }
  0x86   : > { %7371 = vmatmul.mubr.bf16.gmra.mrb[12].mxu0 %v9084_v38 }
  0x87   : > { %7374 = vmatprep.mubr.bf16.mxu0 %v9086_v39  ;;  %7403 = vmatpush3.bf16.msra.mxu0 %v8663_v37  ;;  %v8668_v37 = vld [vmem:[%s10250_s1 + $0xd8] sm:$0xff]  }
  0x88   : > { %7404 = vmatprep.subr.bf16.mxu0 %v8664_v41 }
  0x8b   : > { %7405 = vmatpush3.bf16.msra.mxu0 %v8664_v41  ;;  %v781_v41 = vld [vmem:[%s8909_s15 + $0x7a] sm:$0xff] }
  0x8c   : > { %7438 = vmatprep.subr.bf16.mxu0 %v8665_v47 }
  0x8e   : > { %7375 = vmatmul.mubr.bf16.gmra.mrb[16].mxu0 %v9100_v50 }
  0x8f   : > { %7378 = vmatprep.mubr.bf16.mxu0 %v9102_v51 }
  0x96   : > { %7379 = vmatmul.mubr.bf16.gmra.mrb[20].mxu0 %v9110_v58 }
  0x97   : > { %7382 = vmatprep.mubr.bf16.mxu0 %v9112_v59 }
  0x9e   : > { %7383 = vmatmul.mubr.bf16.gmra.mrb[24].mxu0 %v9120_v3 }
  0x9f   : > { %7386 = vmatprep.mubr.bf16.mxu0 %v9122_v4 }
  0xa6   : > { %7387 = vmatmul.mubr.bf16.gmra.mrb[28].mxu0 %v9130_v11 }
  0xa7   : > { %7406 = vmatprep.mubr.bf16.mxu0 %v803_v12  ;;  %v791_v12 = vld [vmem:[%s8909_s15 + $0xf2] sm:$0xff] }
  0xa8   : > { %v9203_v19 = vpack.c.bf16 %v792_v13, %v791_v12  ;;  %v8681_v12 = vld [vmem:[%s10250_s1 + $0x140] sm:$0xff]  }
  0xa9   : > { %v6308_v13 = vld [vmem:[%s8909_s15 + $0x180] sm:$0xff] }
  0xae   : > { %7407 = vmatmul.mubr.bf16.vlgmr.msra.gmra.mrb[0].mxu0 %v9137_v21 }
  0xaf   : > { %7439 = vmatpush3.bf16.msra.mxu0 %v8665_v47  ;;  %7410 = vmatprep.mubr.bf16.mxu0 %v9139_v22  ;;  %v9169_v47 = vpack.c.bf16 %v782_v43, %v781_v41  ;;  %v798_v41 = vld [vmem:[%s8909_s15 + $0x142] sm:$0xff]  ;;  %v799_v43 = vld [vmem:[%s8909_s15 + $0x152] sm:$0xff] }
  0xb0   : > { %7440 = vmatprep.subr.bf16.mxu0 %v8666_v23 }
  0xb3   : > { %7441 = vmatpush3.bf16.msra.mxu0 %v8666_v23  ;;  %v793_v23 = vld [vmem:[%s8909_s15 + $0x10a] sm:$0xff] }
  0xb4   : > { %7442 = vmatprep.subr.bf16.mxu0 %v8667_v34  ;;  %v9211_v31 = vpack.c.bf16 %v794_v26, %v793_v23  ;;  %v8682_v26 = vld [vmem:[%s10250_s1 + $0x148] sm:$0xff]  }
  0xb6   : > { %7411 = vmatmul.mubr.bf16.gmra.mrb[4].mxu0 %v9153_v35 }
  0xb7   : > { %7414 = vmatprep.mubr.bf16.mxu0 %v9155_v36  ;;  %7443 = vmatpush3.bf16.msra.mxu0 %v8667_v34  ;;  %v9213_v34 = vpack.c.bf16 %v796_v29, %v795_v27  ;;  %v8683_v27 = vld [vmem:[%s10250_s1 + $0x150] sm:$0xff]  }
  0xb8   : > { %7444 = vmatprep.subr.bf16.mxu0 %v8668_v37 }
  0xbb   : > { %7445 = vmatpush3.bf16.msra.mxu0 %v8668_v37  ;;  %v797_v37 = vld [vmem:[%s8909_s15 + $0x13a] sm:$0xff] }
  0xbc   : > { %7446 = vmatprep.subr.bf16.mxu0 %v8669_v46  ;;  %v9221_v45 = vpack.c.bf16 %v798_v41, %v797_v37  ;;  %v6509_v37 = vld [vmem:[%s8909_s15 + $0x81] sm:$0xff]  ;;  %v6510_v41 = vld [vmem:[%s8909_s15 + $0x91] sm:$0xff] }
  0xbe   : > { %7415 = vmatmul.mubr.bf16.gmra.mrb[8].mxu0 %v9169_v47 }
  0xbf   : > { %7418 = vmatprep.mubr.bf16.mxu0 %v9171_v52  ;;  %7447 = vmatpush3.bf16.msra.mxu0 %v8669_v46  ;;  %v9223_v46 = vpack.c.bf16 %v800_v44, %v799_v43  ;;  %v6511_v43 = vld [vmem:[%s8909_s15 + $0x99] sm:$0xff]  ;;  %v8707_v44 = vld [vmem:[%s10250_s1 + $0x210] sm:$0xff]  }
  0xc0   : > { %7448 = vmatprep.subr.bf16.mxu0 %v8670_v53 }
  0xc3   : > { %7449 = vmatpush3.bf16.msra.mxu0 %v8670_v53  ;;  %v801_v53 = vld [vmem:[%s8909_s15 + $0x16a] sm:$0xff] }
  0xc4   : > { %7450 = vmatprep.subr.bf16.mxu0 %v8671_v0  ;;  %v9229_v57 = vpack.c.bf16 %v802_v56, %v801_v53  ;;  %v8708_v53 = vld [vmem:[%s10250_s1 + $0x218] sm:$0xff]   ;;  %v6512_v56 = vld [vmem:[%s8909_s15 + $0xa9] sm:$0xff] }
  0xc6   : > { %7419 = vmatmul.mubr.bf16.gmra.mrb[12].mxu0 %v9185_v1 }
  0xc7   : > { %7422 = vmatprep.mubr.bf16.mxu0 %v9187_v5  ;;  %7451 = vmatpush3.bf16.msra.mxu0 %v8671_v0  ;;  %v8677_v0 = vld [vmem:[%s10250_s1 + $0x120] sm:$0xff]  }
  0xc8   : > { %7452 = vmatprep.subr.bf16.mxu0 %v8672_v6 }
  0xcb   : > { %7453 = vmatpush3.bf16.msra.mxu0 %v8672_v6  ;;  %v8678_v6 = vld [vmem:[%s10250_s1 + $0x128] sm:$0xff]  }
  0xcc   : > { %7486 = vmatprep.subr.bf16.mxu0 %v8673_v14 }
  0xce   : > { %7423 = vmatmul.mubr.bf16.gmra.mrb[16].mxu0 %v9201_v15 }
  0xcf   : > { %7426 = vmatprep.mubr.bf16.mxu0 %v9203_v19 }
  0xd6   : > { %7427 = vmatmul.mubr.bf16.gmra.mrb[20].mxu0 %v9211_v31 }
  0xd7   : > { %7430 = vmatprep.mubr.bf16.mxu0 %v9213_v34 }
  0xde   : > { %7431 = vmatmul.mubr.bf16.gmra.mrb[24].mxu0 %v9221_v45 }
  0xdf   : > { %7434 = vmatprep.mubr.bf16.mxu0 %v9223_v46 }
  0xe6   : > { %7435 = vmatmul.mubr.bf16.gmra.mrb[28].mxu0 %v9229_v57 }
  0xe7   : > { %7454 = vmatprep.mubr.bf16.mxu0 %v9036_v8  ;;  %v8676_v8 = vld [vmem:[%s10250_s1 + $0x118] sm:$0xff]  }
  0xee   : > { %7455 = vmatmul.mubr.bf16.vlgmr.msra.gmra.mrb[0].mxu0 %v9041_v10 }
  0xef   : > { %7487 = vmatpush3.bf16.msra.mxu0 %v8673_v14  ;;  %7458 = vmatprep.mubr.bf16.mxu0 %v9052_v18  ;;  %v6309_v14 = vld [vmem:[%s8909_s15 + $0x188] sm:$0xff] }
  0xf0   : > { %7488 = vmatprep.subr.bf16.mxu0 %v8674_v62  ;;  %v9273_v23 = vpack.c.bf16 %v6309_v14, %v6308_v13  ;;  %v6518_v13 = vld [vmem:[%s8909_s15 + $0xf1] sm:$0xff]  ;;  %v6519_v14 = vld [vmem:[%s8909_s15 + $0xf9] sm:$0xff] }
  0xf3   : > { %7489 = vmatpush3.bf16.msra.mxu0 %v8674_v62  ;;  %v6514_v62 = vld [vmem:[%s8909_s15 + $0xc1] sm:$0xff] }
  0xf4   : > { %7490 = vmatprep.subr.bf16.mxu0 %v8675_v63 }
  0xf6   : > { %7459 = vmatmul.mubr.bf16.gmra.mrb[4].mxu0 %v9057_v20 }
  0xf7   : > { %7462 = vmatprep.mubr.bf16.mxu0 %v9068_v28  ;;  %7491 = vmatpush3.bf16.msra.mxu0 %v8675_v63  ;;  %v6515_v63 = vld [vmem:[%s8909_s15 + $0xc9] sm:$0xff] }
  0xf8   : > { %7492 = vmatprep.subr.bf16.mxu0 %v8676_v8 }
  0xfb   : > { %7493 = vmatpush3.bf16.msra.mxu0 %v8676_v8  ;;  %v8709_v8 = vld [vmem:[%s10250_s1 + $0x220] sm:$0xff]  }
  0xfc   : > { %7494 = vmatprep.subr.bf16.mxu0 %v8677_v0 }
  0xfe   : > { %7463 = vmatmul.mubr.bf16.gmra.mrb[8].mxu0 %v9073_v30 }
  0xff   : > { %7466 = vmatprep.mubr.bf16.mxu0 %v9084_v38  ;;  %7495 = vmatpush3.bf16.msra.mxu0 %v8677_v0 }
 0x100   : > { %7496 = vmatprep.subr.bf16.mxu0 %v8678_v6 }
 0x103   : > { %7497 = vmatpush3.bf16.msra.mxu0 %v8678_v6  ;;  %v2341_v6 = vpack.c.bf16 %v6515_v63, %v6514_v62 }
 0x104   : > { %7498 = vmatprep.subr.bf16.mxu0 %v8679_v7 }
 0x106   : > { %7467 = vmatmul.mubr.bf16.gmra.mrb[12].mxu0 %v9086_v39 }
 0x107   : > { %7470 = vmatprep.mubr.bf16.mxu0 %v9100_v50  ;;  %7499 = vmatpush3.bf16.msra.mxu0 %v8679_v7  ;;  %v8710_v7 = vld [vmem:[%s10250_s1 + $0x228] sm:$0xff]  }
 0x108   : > { %7500 = vmatprep.subr.bf16.mxu0 %v8680_v9 }
 0x10b   : > { %7501 = vmatpush3.bf16.msra.mxu0 %v8680_v9  ;;  %v6516_v9 = vld [vmem:[%s8909_s15 + $0xd9] sm:$0xff] }
 0x10c   : > { %7534 = vmatprep.subr.bf16.mxu0 %v8681_v12 }
 0x10e   : > { %7471 = vmatmul.mubr.bf16.gmra.mrb[16].mxu0 %v9102_v51 }
 0x10f   : > { %7474 = vmatprep.mubr.bf16.mxu0 %v9110_v58 }
 0x116   : > { %7475 = vmatmul.mubr.bf16.gmra.mrb[20].mxu0 %v9112_v59 }
 0x117   : > { %7478 = vmatprep.mubr.bf16.mxu0 %v9120_v3 }
 0x11e   : > { %7479 = vmatmul.mubr.bf16.gmra.mrb[24].mxu0 %v9122_v4 }
 0x11f   : > { %7482 = vmatprep.mubr.bf16.mxu0 %v9130_v11 }
 0x126   : > { %7483 = vmatmul.mubr.bf16.gmra.mrb[28].mxu0 %v9273_v23 }
 0x127   : > { %7502 = vmatprep.mubr.bf16.mxu0 %v8935_v16  ;;  %v8684_v16 = vld [vmem:[%s10250_s1 + $0x158] sm:$0xff]  }
 0x12e   : > { %7503 = vmatmul.mubr.bf16.vlgmr.msra.gmra.mrb[0].mxu0 %v8937_v17  ;;  %v8685_v17 = vld [vmem:[%s10250_s1 + $0x160] sm:$0xff]  }
 0x12f   : > { %7535 = vmatpush3.bf16.msra.mxu0 %v8681_v12  ;;  %7506 = vmatprep.mubr.bf16.mxu0 %v8951_v24  ;;  %v8686_v24 = vld [vmem:[%s10250_s1 + $0x168] sm:$0xff]  }
 0x130   : > { %7536 = vmatprep.subr.bf16.mxu0 %v8682_v26  ;;  %v6517_v12 = vld [vmem:[%s8909_s15 + $0xe1] sm:$0xff] }
 0x133   : > { %7537 = vmatpush3.bf16.msra.mxu0 %v8682_v26  ;;  %v2342_v26 = vpack.c.bf16 %v6517_v12, %v6516_v9 }
 0x134   : > { %7538 = vmatprep.subr.bf16.mxu0 %v8683_v27 }
 0x136   : > { %7507 = vmatmul.mubr.bf16.gmra.mrb[4].mxu0 %v8953_v25  ;;  %v8687_v25 = vld [vmem:[%s10250_s1 + $0x170] sm:$0xff]  }
 0x137   : > { %7510 = vmatprep.mubr.bf16.mxu0 %v8967_v32  ;;  %7539 = vmatpush3.bf16.msra.mxu0 %v8683_v27  ;;  %v8688_v32 = vld [vmem:[%s10250_s1 + $0x178] sm:$0xff]   ;;  %v2343_v27 = vpack.c.bf16 %v6519_v14, %v6518_v13  ;;  %v6584_v13 = vld [vmem:[%s8909_s15 + $0x16a] sm:$0xff] }
 0x138   : > { %7540 = vmatprep.subr.bf16.mxu0 %v8684_v16  ;;  %v6585_v14 = vld [vmem:[%s8909_s15 + $0x172] sm:$0xff] }
 0x13b   : > { %7541 = vmatpush3.bf16.msra.mxu0 %v8684_v16  ;;  %v8712_v16 = vld [vmem:[%s10250_s1 + $0x238] sm:$0xff]  }
 0x13c   : > { %7542 = vmatprep.subr.bf16.mxu0 %v8685_v17 }
 0x13e   : > { %7511 = vmatmul.mubr.bf16.gmra.mrb[8].mxu0 %v8969_v33  ;;  %v8689_v33 = vld [vmem:[%s10250_s1 + $0x180] sm:$0xff]  }
 0x13f   : > { %7514 = vmatprep.mubr.bf16.mxu0 %v8983_v40  ;;  %7543 = vmatpush3.bf16.msra.mxu0 %v8685_v17  ;;  %v6364_v40 = vld [vmem:[%s8909_s15 + $0x181] sm:$0xff]  ;;  %v6520_v17 = vld [vmem:[%s8909_s15 + $0x109] sm:$0xff] }
 0x140   : > { %7544 = vmatprep.subr.bf16.mxu0 %v8686_v24 }
 0x143   : > { %7545 = vmatpush3.bf16.msra.mxu0 %v8686_v24  ;;  %v6521_v24 = vld [vmem:[%s8909_s15 + $0x111] sm:$0xff] }
 0x144   : > { %7546 = vmatprep.subr.bf16.mxu0 %v8687_v25 }
 0x146   : > { %7515 = vmatmul.mubr.bf16.gmra.mrb[12].mxu0 %v8988_v42  ;;  %v6365_v42 = vld [vmem:[%s8909_s15 + $0x189] sm:$0xff] }
 0x147   : > { %7518 = vmatprep.mubr.bf16.mxu0 %v8999_v48  ;;  %7547 = vmatpush3.bf16.msra.mxu0 %v8687_v25  ;;  %v9317_v48 = vpack.c.bf16 %v6365_v42, %v6364_v40  ;;  %v6522_v25 = vld [vmem:[%s8909_s15 + $0x121] sm:$0xff]  ;;  %v6524_v42 = vld [vmem:[%s8909_s15 + $0x139] sm:$0xff] }
 0x148   : > { %7548 = vmatprep.subr.bf16.mxu0 %v8688_v32 }
 0x14b   : > { %7549 = vmatpush3.bf16.msra.mxu0 %v8688_v32  ;;  %v6523_v32 = vld [vmem:[%s8909_s15 + $0x129] sm:$0xff] }
 0x14c   : > { %7582 = vmatprep.subr.bf16.mxu0 %v8689_v33  ;;  %v2345_v40 = vpack.c.bf16 %v6523_v32, %v6522_v25  ;;  %v8715_v25 = vld [vmem:[%s10252_s3 + $0x30] sm:$0xff]   ;;  %v8716_v32 = vld [vmem:[%s10252_s3 + $0x38] sm:$0xff]  }
 0x14e   : > { %7519 = vmatmul.mubr.bf16.gmra.mrb[16].mxu0 %v9001_v49  ;;  %v8690_v49 = vld [vmem:[%s10250_s1 + $0x188] sm:$0xff]  }
 0x14f   : > { %7522 = vmatprep.mubr.bf16.mxu0 %v9009_v54  ;;  %v8691_v54 = vld [vmem:[%s10250_s1 + $0x190] sm:$0xff]  }
 0x156   : > { %7523 = vmatmul.mubr.bf16.gmra.mrb[20].mxu0 %v9011_v55  ;;  %v8692_v55 = vld [vmem:[%s10250_s1 + $0x198] sm:$0xff]  }
 0x157   : > { %7526 = vmatprep.mubr.bf16.mxu0 %v9019_v60  ;;  %v8693_v60 = vld [vmem:[%s10250_s1 + $0x1a0] sm:$0xff]  }
 0x15e   : > { %7527 = vmatmul.mubr.bf16.gmra.mrb[24].mxu0 %v9021_v61  ;;  %v8694_v61 = vld [vmem:[%s10250_s1 + $0x1a8] sm:$0xff]  }
 0x15f   : > { %7530 = vmatprep.mubr.bf16.mxu0 %v9029_v2  ;;  %v8695_v2 = vld [vmem:[%s10250_s1 + $0x1b0] sm:$0xff]  }
 0x166   : > { %7531 = vmatmul.mubr.bf16.gmra.mrb[28].mxu0 %v9317_v48 }
 0x167   : > { %7550 = vmatprep.mubr.bf16.mxu0 %v9137_v21  ;;  %v8696_v21 = vld [vmem:[%s10250_s1 + $0x1b8] sm:$0xff]  }
 0x16e   : > { %7551 = vmatmul.mubr.bf16.vlgmr.msra.gmra.mrb[0].mxu0 %v9139_v22  ;;  %v8697_v22 = vld [vmem:[%s10250_s1 + $0x1c0] sm:$0xff]  }
 0x16f   : > { %7583 = vmatpush3.bf16.msra.mxu0 %v8689_v33  ;;  %7554 = vmatprep.mubr.bf16.mxu0 %v9153_v35  ;;  %v6420_v35 = vld [vmem:[%s8909_s15 + $0x182] sm:$0xff]  ;;  %v2344_v33 = vpack.c.bf16 %v6521_v24, %v6520_v17  ;;  %v8813_v24 = vmov 0.0  }
 0x170   : > { %7584 = vmatprep.subr.bf16.mxu0 %v8690_v49  ;;  %v8713_v17 = vld [vmem:[%s10252_s3 + $0x20] sm:$0xff]   ;;  %3058 = vst.msk [vmem:[#allocation2 + $0x30] sm:$0xff] %vm3050_vm0, %v8813_v24  ;;  %3059 = vst.msk [vmem:[#allocation2 + $0x38] sm:$0xff] %vm3050_vm0, %v8813_v24 }
 0x171   : > { %7726 = vmatprep.subr.bf16.mxu1 %v8713_v17  ;;  %3051 = vst.msk [vmem:[#allocation2] sm:$0xff] %vm3050_vm0, %v8813_v24  ;;  %3052 = vst.msk [vmem:[#allocation2 + $0x8] sm:$0xff] %vm3050_vm0, %v8813_v24 }
 0x172   : > { %7727 = vmatpush3.bf16.msra.mxu1 %v8713_v17  ;;  %3055 = vst.msk [vmem:[#allocation2 + $0x18] sm:$0xff] %vm3050_vm0, %v8813_v24  ;;  %3056 = vst.msk [vmem:[#allocation2 + $0x20] sm:$0xff] %vm3050_vm0, %v8813_v24 }
 0x173   : > { %7585 = vmatpush3.bf16.msra.mxu0 %v8690_v49  ;;  %v6525_v49 = vld [vmem:[%s8909_s15 + $0x141] sm:$0xff]  ;;  %3061 = vst.msk [vmem:[#allocation2 + $0x48] sm:$0xff] %vm3050_vm0, %v8813_v24  ;;  %3062 = vst.msk [vmem:[#allocation2 + $0x50] sm:$0xff] %vm3050_vm0, %v8813_v24 }
 0x174   : > { %7586 = vmatprep.subr.bf16.mxu0 %v8691_v54  ;;  %3064 = vst.msk [vmem:[#allocation2 + $0x60] sm:$0xff] %vm3050_vm0, %v8813_v24  ;;  %3065 = vst.msk [vmem:[#allocation2 + $0x68] sm:$0xff] %vm3050_vm0, %v8813_v24 }
 0x175   : > { %3067 = vst.msk [vmem:[#allocation2 + $0x78] sm:$0xff] %vm3050_vm0, %v8813_v24  ;;  %3068 = vst.msk [vmem:[#allocation2 + $0x80] sm:$0xff] %vm3050_vm0, %v8813_v24 }
 0x176   : > { %7555 = vmatmul.mubr.bf16.gmra.mrb[4].mxu0 %v9155_v36  ;;  %v6421_v36 = vld [vmem:[%s8909_s15 + $0x18a] sm:$0xff]  ;;  %3070 = vst.msk [vmem:[#allocation2 + $0x90] sm:$0xff] %vm3050_vm0, %v8813_v24  ;;  %3071 = vst.msk [vmem:[#allocation2 + $0x98] sm:$0xff] %vm3050_vm0, %v8813_v24 }
 0x177   : > { %7558 = vmatprep.mubr.bf16.mxu0 %v9169_v47  ;;  %7587 = vmatpush3.bf16.msra.mxu0 %v8691_v54  ;;  %v9361_v47 = vpack.c.bf16 %v6421_v36, %v6420_v35  ;;  %v6526_v54 = vld [vmem:[%s8909_s15 + $0x151] sm:$0xff]  ;;  %v6532_v35 = vld [vmem:[%s8909_s15 + $0x199] sm:$0xff]  ;;  %v6533_v36 = vld [vmem:[%s8909_s15 + $0x1a1] sm:$0xff]  ;;  %3073 = vst.msk [vmem:[#allocation2 + $0xa8] sm:$0xff] %vm3050_vm0, %v8813_v24 }
 0x178   : > { %7588 = vmatprep.subr.bf16.mxu0 %v8692_v55  ;;  %3074 = vst.msk [vmem:[#allocation2 + $0xb0] sm:$0xff] %vm3050_vm0, %v8813_v24  ;;  %3076 = vst.msk [vmem:[#allocation2 + $0xc0] sm:$0xff] %vm3050_vm0, %v8813_v24 }
 0x179   : > { %3077 = vst.msk [vmem:[#allocation2 + $0xc8] sm:$0xff] %vm3050_vm0, %v8813_v24  ;;  %3079 = vst.msk [vmem:[#allocation2 + $0xd8] sm:$0xff] %vm3050_vm0, %v8813_v24 }
 0x17a   : > { %3080 = vst.msk [vmem:[#allocation2 + $0xe0] sm:$0xff] %vm3050_vm0, %v8813_v24  ;;  %3082 = vst.msk [vmem:[#allocation2 + $0xf0] sm:$0xff] %vm3050_vm0, %v8813_v24 }
 0x17b   : > { %7589 = vmatpush3.bf16.msra.mxu0 %v8692_v55  ;;  %v6527_v55 = vld [vmem:[%s8909_s15 + $0x159] sm:$0xff]  ;;  %3083 = vst.msk [vmem:[#allocation2 + $0xf8] sm:$0xff] %vm3050_vm0, %v8813_v24  ;;  %3085 = vst.msk [vmem:[#allocation2 + $0x108] sm:$0xff] %vm3050_vm0, %v8813_v24 }
 0x17c   : > { %7590 = vmatprep.subr.bf16.mxu0 %v8693_v60  ;;  %3086 = vst.msk [vmem:[#allocation2 + $0x110] sm:$0xff] %vm3050_vm0, %v8813_v24  ;;  %3088 = vst.msk [vmem:[#allocation2 + $0x120] sm:$0xff] %vm3050_vm0, %v8813_v24 }
 0x17d   : > { %3089 = vst.msk [vmem:[#allocation2 + $0x128] sm:$0xff] %vm3050_vm0, %v8813_v24  ;;  %3091 = vst.msk [vmem:[#allocation2 + $0x138] sm:$0xff] %vm3050_vm0, %v8813_v24 }
 0x17e   : > { %7559 = vmatmul.mubr.bf16.gmra.mrb[8].mxu0 %v9171_v52  ;;  %v8698_v52 = vld [vmem:[%s10250_s1 + $0x1c8] sm:$0xff]   ;;  %3092 = vst.msk [vmem:[#allocation2 + $0x140] sm:$0xff] %vm3050_vm0, %v8813_v24  ;;  %3094 = vst.msk [vmem:[#allocation2 + $0x150] sm:$0xff] %vm3050_vm0, %v8813_v24 }
 0x17f   : > { %7562 = vmatprep.mubr.bf16.mxu0 %v9185_v1  ;;  %7591 = vmatpush3.bf16.msra.mxu0 %v8693_v60  ;;  %v8699_v1 = vld [vmem:[%s10250_s1 + $0x1d0] sm:$0xff]   ;;  %v2346_v60 = vpack.c.bf16 %v6525_v49, %v6524_v42  ;;  %3095 = vst.msk [vmem:[#allocation2 + $0x158] sm:$0xff] %vm3050_vm0, %v8813_v24  ;;  %3097 = vst.msk [vmem:[#allocation2 + $0x168] sm:$0xff] %vm3050_vm0, %v8813_v24  ;;  %v9558_v49 = vld [vmem:[%s10252_s3] sm:$0xff]  }
 0x180   : > { %7592 = vmatprep.subr.bf16.mxu0 %v8694_v61  ;;  %3098 = vst.msk [vmem:[#allocation2 + $0x170] sm:$0xff] %vm3050_vm0, %v8813_v24  ;;  %3100 = vst.msk [vmem:[#allocation2 + $0x180] sm:$0xff] %vm3050_vm0, %v8813_v24 }
 0x181   : > { %3101 = vst.msk [vmem:[#allocation2 + $0x188] sm:$0xff] %vm3050_vm0, %v8813_v24  ;;  %3103 = vst.msk [vmem:[#allocation2 + $0x198] sm:$0xff] %vm3050_vm0, %v8813_v24 }
 0x182   : > { %3104 = vst.msk [vmem:[#allocation2 + $0x1a0] sm:$0xff] %vm3050_vm0, %v8813_v24 }
 0x183   : > { %7593 = vmatpush3.bf16.msra.mxu0 %v8694_v61  ;;  %v2347_v61 = vpack.c.bf16 %v6527_v55, %v6526_v54  ;;  %3060 = vst.msk [vmem:[#allocation2 + $0x40] sm:$0x3] %vm3053_vm1, %v8813_v24  ;;  %3054 = vst.msk [vmem:[#allocation2 + $0x10] sm:$0x3] %vm3053_vm1, %v8813_v24  ;;  %v9564_v54 = vld [vmem:[%s10251_s2] ss:$0 sm:$0xff] }
 0x184   : > { %7594 = vmatprep.subr.bf16.mxu0 %v8695_v2  ;;  %3057 = vst.msk [vmem:[#allocation2 + $0x28] sm:$0x3] %vm3053_vm1, %v8813_v24  ;;  %3063 = vst.msk [vmem:[#allocation2 + $0x58] sm:$0x3] %vm3053_vm1, %v8813_v24 }
 0x185   : > { %3066 = vst.msk [vmem:[#allocation2 + $0x70] sm:$0x3] %vm3053_vm1, %v8813_v24  ;;  %3069 = vst.msk [vmem:[#allocation2 + $0x88] sm:$0x3] %vm3053_vm1, %v8813_v24 }
 0x186   : > { %7563 = vmatmul.mubr.bf16.gmra.mrb[12].mxu0 %v9187_v5  ;;  %v6503_v5 = vld [vmem:[%s8909_s15 + $0x39] sm:$0xff]  ;;  %3072 = vst.msk [vmem:[#allocation2 + $0xa0] sm:$0x3] %vm3053_vm1, %v8813_v24  ;;  %3075 = vst.msk [vmem:[#allocation2 + $0xb8] sm:$0x3] %vm3053_vm1, %v8813_v24 }
 0x187   : > { %7566 = vmatprep.mubr.bf16.mxu0 %v9201_v15  ;;  %7595 = vmatpush3.bf16.msra.mxu0 %v8695_v2  ;;  %v6528_v2 = vld [vmem:[%s8909_s15 + $0x169] sm:$0xff]  ;;  %3078 = vst.msk [vmem:[#allocation2 + $0xd0] sm:$0x3] %vm3053_vm1, %v8813_v24  ;;  %3081 = vst.msk [vmem:[#allocation2 + $0xe8] sm:$0x3] %vm3053_vm1, %v8813_v24 }
 0x188   : > { %7596 = vmatprep.subr.bf16.mxu0 %v8696_v21  ;;  %3084 = vst.msk [vmem:[#allocation2 + $0x100] sm:$0x3] %vm3053_vm1, %v8813_v24  ;;  %3087 = vst.msk [vmem:[#allocation2 + $0x118] sm:$0x3] %vm3053_vm1, %v8813_v24 }
 0x189   : > { %3090 = vst.msk [vmem:[#allocation2 + $0x130] sm:$0x3] %vm3053_vm1, %v8813_v24  ;;  %3093 = vst.msk [vmem:[#allocation2 + $0x148] sm:$0x3] %vm3053_vm1, %v8813_v24 }
 0x18a   : > { %3096 = vst.msk [vmem:[#allocation2 + $0x160] sm:$0x3] %vm3053_vm1, %v8813_v24  ;;  %3099 = vst.msk [vmem:[#allocation2 + $0x178] sm:$0x3] %vm3053_vm1, %v8813_v24 }
 0x18b   : > { %7597 = vmatpush3.bf16.msra.mxu0 %v8696_v21  ;;  %v6529_v21 = vld [vmem:[%s8909_s15 + $0x171] sm:$0xff]  ;;  %3102 = vst.msk [vmem:[#allocation2 + $0x190] sm:$0x3] %vm3053_vm1, %v8813_v24  ;;  %3105 = vst.msk [vmem:[#allocation2 + $0x1a8] sm:$0x3] %vm3053_vm1, %v8813_v24 }
 0x18c   : > { %7630 = vmatprep.subr.bf16.mxu0 %v8697_v22 }
 0x18e   : > { %7567 = vmatmul.mubr.bf16.gmra.mrb[16].mxu0 %v9203_v19  ;;  %v6506_v19 = vld [vmem:[%s8909_s15 + $0x61] sm:$0xff] }
 0x18f   : > { %7570 = vmatprep.mubr.bf16.mxu0 %v9211_v31  ;;  %v8706_v31 = vld [vmem:[%s10250_s1 + $0x208] sm:$0xff]  }
 0x196   : > { %7571 = vmatmul.mubr.bf16.gmra.mrb[20].mxu0 %v9213_v34  ;;  %v6508_v34 = vld [vmem:[%s8909_s15 + $0x79] sm:$0xff] }
 0x197   : > { %7574 = vmatprep.mubr.bf16.mxu0 %v9221_v45  ;;  %v2338_v45 = vpack.c.bf16 %v6509_v37, %v6508_v34  ;;  %v6572_v34 = vld [vmem:[%s8909_s15 + $0xda] sm:$0xff]  ;;  %v6573_v37 = vld [vmem:[%s8909_s15 + $0xe2] sm:$0xff] }
 0x19e   : > { %7575 = vmatmul.mubr.bf16.gmra.mrb[24].mxu0 %v9223_v46  ;;  %v2339_v46 = vpack.c.bf16 %v6511_v43, %v6510_v41  ;;  %v6574_v41 = vld [vmem:[%s8909_s15 + $0xf2] sm:$0xff]  ;;  %v6575_v43 = vld [vmem:[%s8909_s15 + $0xfa] sm:$0xff] }
 0x19f   : > { %7578 = vmatprep.mubr.bf16.mxu0 %v9229_v57  ;;  %v6513_v57 = vld [vmem:[%s8909_s15 + $0xb1] sm:$0xff] }
 0x1a0   : > { %v2340_v0 = vpack.c.bf16 %v6513_v57, %v6512_v56  ;;  %v6578_v56 = vld [vmem:[%s8909_s15 + $0x122] sm:$0xff]  ;;  %v6579_v57 = vld [vmem:[%s8909_s15 + $0x12a] sm:$0xff] }
 0x1a1   : > { %v2651_v63 = vpack.c.bf16 %v6579_v57, %v6578_v56 }
 0x1a6   : > { %7579 = vmatmul.mubr.bf16.gmra.mrb[28].mxu0 %v9361_v47 }
 0x1a7   : > { %7598 = vmatprep.mubr.bf16.mxu0 %v9041_v10  ;;  %v8700_v10 = vld [vmem:[%s10250_s1 + $0x1d8] sm:$0xff]  }
 0x1ae   : > { %7599 = vmatmul.mubr.bf16.vlgmr.msra.gmra.mrb[0].mxu0 %v9052_v18  ;;  %v8701_v18 = vld [vmem:[%s10250_s1 + $0x1e0] sm:$0xff]  }
 0x1af   : > { %7631 = vmatpush3.bf16.msra.mxu0 %v8697_v22  ;;  %7602 = vmatprep.mubr.bf16.mxu0 %v9057_v20  ;;  %v8702_v20 = vld [vmem:[%s10250_s1 + $0x1e8] sm:$0xff]   ;;  %v2348_v22 = vpack.c.bf16 %v6529_v21, %v6528_v2 }
 0x1b0   : > { %7632 = vmatprep.subr.bf16.mxu0 %v8698_v52 }
 0x1b3   : > { %7633 = vmatpush3.bf16.msra.mxu0 %v8698_v52  ;;  %v6558_v52 = vld [vmem:[%s8909_s15 + $0x32] sm:$0xff] }
 0x1b4   : > { %7634 = vmatprep.subr.bf16.mxu0 %v8699_v1 }
 0x1b6   : > { %7603 = vmatmul.mubr.bf16.gmra.mrb[4].mxu0 %v9068_v28  ;;  %v8703_v28 = vld [vmem:[%s10250_s1 + $0x1f0] sm:$0xff]  }
 0x1b7   : > { %7606 = vmatprep.mubr.bf16.mxu0 %v9073_v30  ;;  %7635 = vmatpush3.bf16.msra.mxu0 %v8699_v1  ;;  %v8704_v30 = vld [vmem:[%s10250_s1 + $0x1f8] sm:$0xff]  }
 0x1b8   : > { %7636 = vmatprep.subr.bf16.mxu0 %v8700_v10  ;;  %v6559_v1 = vld [vmem:[%s8909_s15 + $0x3a] sm:$0xff] }
 0x1bb   : > { %7637 = vmatpush3.bf16.msra.mxu0 %v8700_v10  ;;  %v2350_v10 = vpack.c.bf16 %v6533_v36, %v6532_v35 }
 0x1bc   : > { %7638 = vmatprep.subr.bf16.mxu0 %v8701_v18 }
 0x1be   : > { %7607 = vmatmul.mubr.bf16.gmra.mrb[8].mxu0 %v9084_v38  ;;  %v8705_v38 = vld [vmem:[%s10250_s1 + $0x200] sm:$0xff]  }
 0x1bf   : > { %7610 = vmatprep.mubr.bf16.mxu0 %v9086_v39  ;;  %7639 = vmatpush3.bf16.msra.mxu0 %v8701_v18  ;;  %v6476_v39 = vld [vmem:[%s8909_s15 + $0x198] sm:$0xff]  ;;  %v2641_v18 = vpack.c.bf16 %v6559_v1, %v6558_v52 }
 0x1c0   : > { %7640 = vmatprep.subr.bf16.mxu0 %v8702_v20 }
 0x1c3   : > { %7641 = vmatpush3.bf16.msra.mxu0 %v8702_v20  ;;  %v6560_v20 = vld [vmem:[%s8909_s15 + $0x4a] sm:$0xff] }
 0x1c4   : > { %7642 = vmatprep.subr.bf16.mxu0 %v8703_v28 }
 0x1c6   : > { %7611 = vmatmul.mubr.bf16.gmra.mrb[12].mxu0 %v9100_v50  ;;  %v6477_v50 = vld [vmem:[%s8909_s15 + $0x1a0] sm:$0xff] }
 0x1c7   : > { %7614 = vmatprep.mubr.bf16.mxu0 %v9102_v51  ;;  %7643 = vmatpush3.bf16.msra.mxu0 %v8703_v28  ;;  %v6502_v51 = vld [vmem:[%s8909_s15 + $0x31] sm:$0xff]  ;;  %v2044_v15 = vpack.c.bf16 %v6477_v50, %v6476_v39  ;;  %v6564_v50 = vld [vmem:[%s8909_s15 + $0x7a] sm:$0xff] }
 0x1c8   : > { %7644 = vmatprep.subr.bf16.mxu0 %v8704_v30  ;;  %v6561_v28 = vld [vmem:[%s8909_s15 + $0x52] sm:$0xff] }
 0x1cb   : > { %7645 = vmatpush3.bf16.msra.mxu0 %v8704_v30  ;;  %v6562_v30 = vld [vmem:[%s8909_s15 + $0x62] sm:$0xff] }
 0x1cc   : > { %7678 = vmatprep.subr.bf16.mxu0 %v8705_v38 }
 0x1ce   : > { %7615 = vmatmul.mubr.bf16.gmra.mrb[16].mxu0 %v9110_v58  ;;  %v2335_v58 = vpack.c.bf16 %v6503_v5, %v6502_v51  ;;  %v6565_v51 = vld [vmem:[%s8909_s15 + $0x82] sm:$0xff]  ;;  %v6566_v5 = vld [vmem:[%s8909_s15 + $0x92] sm:$0xff] }
 0x1cf   : > { %7618 = vmatprep.mubr.bf16.mxu0 %v9112_v59  ;;  %v6504_v59 = vld [vmem:[%s8909_s15 + $0x49] sm:$0xff] }
 0x1d6   : > { %7619 = vmatmul.mubr.bf16.gmra.mrb[20].mxu0 %v9120_v3  ;;  %v6505_v3 = vld [vmem:[%s8909_s15 + $0x51] sm:$0xff] }
 0x1d7   : > { %7622 = vmatprep.mubr.bf16.mxu0 %v9122_v4  ;;  %v6507_v4 = vld [vmem:[%s8909_s15 + $0x69] sm:$0xff]  ;;  %v2336_v29 = vpack.c.bf16 %v6505_v3, %v6504_v59 }
 0x1d8   : > { %v6568_v3 = vld [vmem:[%s8909_s15 + $0xaa] sm:$0xff] }
 0x1de   : > { %7623 = vmatmul.mubr.bf16.gmra.mrb[24].mxu0 %v9130_v11  ;;  %v2337_v11 = vpack.c.bf16 %v6507_v4, %v6506_v19  ;;  %v6569_v19 = vld [vmem:[%s8909_s15 + $0xb2] sm:$0xff]  ;;  %v6570_v4 = vld [vmem:[%s8909_s15 + $0xc2] sm:$0xff] }
 0x1df   : > { %7626 = vmatprep.mubr.bf16.mxu0 %v9273_v23  ;;  %v8711_v23 = vld [vmem:[%s10250_s1 + $0x230] sm:$0xff]  }
 0x1e6   : > { %7627 = vmatmul.mubr.bf16.gmra.mrb[28].mxu0 %v2044_v15  ;;  %v6567_v15 = vld [vmem:[%s8909_s15 + $0x9a] sm:$0xff] }
 0x1e7   : > { %7646 = vmatprep.mubr.bf16.mxu0 %v2335_v58  ;;  %v2644_v58 = vpack.c.bf16 %v6565_v51, %v6564_v50  ;;  %v2645_v59 = vpack.c.bf16 %v6567_v15, %v6566_v5 }
 0x1ee   : > { %7647 = vmatmul.mubr.bf16.vlgmr.msra.gmra.mrb[0].mxu0 %v2336_v29  ;;  %v6571_v29 = vld [vmem:[%s8909_s15 + $0xca] sm:$0xff] }
 0x1ef   : > { %7679 = vmatpush3.bf16.msra.mxu0 %v8705_v38  ;;  %7650 = vmatprep.mubr.bf16.mxu0 %v2337_v11  ;;  %v6563_v38 = vld [vmem:[%s8909_s15 + $0x6a] sm:$0xff]  ;;  %v2646_v11 = vpack.c.bf16 %v6569_v19, %v6568_v3 }
 0x1f0   : > { %7680 = vmatprep.subr.bf16.mxu0 %v8706_v31  ;;  %v2643_v39 = vpack.c.bf16 %v6563_v38, %v6562_v30 }
 0x1f3   : > { %7681 = vmatpush3.bf16.msra.mxu0 %v8706_v31  ;;  %v2647_v31 = vpack.c.bf16 %v6571_v29, %v6570_v4 }
 0x1f4   : > { %7682 = vmatprep.subr.bf16.mxu0 %v8707_v44 }
 0x1f6   : > { %7651 = vmatmul.mubr.bf16.gmra.mrb[4].mxu0 %v2338_v45  ;;  %v2649_v45 = vpack.c.bf16 %v6575_v43, %v6574_v41 }
 0x1f7   : > { %7654 = vmatprep.mubr.bf16.mxu0 %v2339_v46  ;;  %7683 = vmatpush3.bf16.msra.mxu0 %v8707_v44  ;;  %v2648_v44 = vpack.c.bf16 %v6573_v37, %v6572_v34  ;;  %v6576_v46 = vld [vmem:[%s8909_s15 + $0x10a] sm:$0xff] }
 0x1f8   : > { %7684 = vmatprep.subr.bf16.mxu0 %v8708_v53 }
 0x1fb   : > { %7685 = vmatpush3.bf16.msra.mxu0 %v8708_v53  ;;  %v6577_v53 = vld [vmem:[%s8909_s15 + $0x112] sm:$0xff] }
 0x1fc   : > { %7686 = vmatprep.subr.bf16.mxu0 %v8709_v8  ;;  %v2650_v62 = vpack.c.bf16 %v6577_v53, %v6576_v46 }
 0x1fe   : > { %7655 = vmatmul.mubr.bf16.gmra.mrb[8].mxu0 %v2340_v0  ;;  %v6581_v0 = vld [vmem:[%s8909_s15 + $0x142] sm:$0xff] }
 0x1ff   : > { %7658 = vmatprep.mubr.bf16.mxu0 %v2341_v6  ;;  %7687 = vmatpush3.bf16.msra.mxu0 %v8709_v8  ;;  %v6580_v8 = vld [vmem:[%s8909_s15 + $0x13a] sm:$0xff]  ;;  %v6582_v6 = vld [vmem:[%s8909_s15 + $0x152] sm:$0xff] }
 0x200   : > { %7688 = vmatprep.subr.bf16.mxu0 %v8710_v7  ;;  %v2652_v9 = vpack.c.bf16 %v6581_v0, %v6580_v8 }
 0x203   : > { %7689 = vmatpush3.bf16.msra.mxu0 %v8710_v7  ;;  %v6583_v7 = vld [vmem:[%s8909_s15 + $0x15a] sm:$0xff] }
 0x204   : > { %7690 = vmatprep.subr.bf16.mxu0 %v8711_v23  ;;  %v2653_v12 = vpack.c.bf16 %v6583_v7, %v6582_v6 }
 0x206   : > { %7659 = vmatmul.mubr.bf16.gmra.mrb[12].mxu0 %v2342_v26  ;;  %v6588_v26 = vld [vmem:[%s8909_s15 + $0x19a] sm:$0xff] }
 0x207   : > { %7662 = vmatprep.mubr.bf16.mxu0 %v2343_v27  ;;  %7691 = vmatpush3.bf16.msra.mxu0 %v8711_v23  ;;  %v2654_v23 = vpack.c.bf16 %v6585_v14, %v6584_v13  ;;  %v6589_v27 = vld [vmem:[%s8909_s15 + $0x1a2] sm:$0xff] }
 0x208   : > { %7692 = vmatprep.subr.bf16.mxu0 %v8712_v16 }
 0x20b   : > { %7693 = vmatpush3.bf16.msra.mxu0 %v8712_v16  ;;  %v2656_v16 = vpack.c.bf16 %v6589_v27, %v6588_v26  ;;  %v8719_v26 = vld [vmem:[%s10252_s3 + $0x10] sm:$0xff]  }
 0x20e   : > { %7663 = vmatmul.mubr.bf16.gmra.mrb[16].mxu0 %v2344_v33  ;;  %v3195_v33 = vld [vmem:[#allocation2 + $0x1] sm:$0xff] }
 0x20f   : > { %7666 = vmatprep.mubr.bf16.mxu0 %v2345_v40  ;;  %v3196_v40 = vld [vmem:[#allocation2 + $0x9] sm:$0xff] }
 0x210   : > { %v3227_v42 = vpack.c.bf16 %v3196_v40, %v3195_v33 }
 0x212   : > { %7734 = vmatprep.mubr.msk.bf16.mxu1 %vm3050_vm0, %v3227_v42 }
 0x216   : > { %7667 = vmatmul.mubr.bf16.gmra.mrb[20].mxu0 %v2346_v60 }
 0x217   : > { %7670 = vmatprep.mubr.bf16.mxu0 %v2347_v61 }
 0x21e   : > { %7671 = vmatmul.mubr.bf16.gmra.mrb[24].mxu0 %v2348_v22 }
 0x21f   : > { %7674 = vmatprep.mubr.bf16.mxu0 %v9317_v48  ;;  %v2642_v48 = vpack.c.bf16 %v6561_v28, %v6560_v20 }
 0x226   : > { %7675 = vmatmul.mubr.bf16.gmra.mrb[28].mxu0 %v2350_v10 }
 0x227   : > { %7694 = vmatprep.mubr.bf16.mxu0 %v2641_v18 }
 0x22e   : > { %7695 = vmatmul.mubr.bf16.vlgmr.msra.gmra.mrb[0].mxu0 %v2642_v48 }
 0x22f   : > { %7698 = vmatprep.mubr.bf16.mxu0 %v2643_v39 }
 0x236   : > { %7699 = vmatmul.mubr.bf16.gmra.mrb[4].mxu0 %v2644_v58 }
 0x237   : > { %7702 = vmatprep.mubr.bf16.mxu0 %v2645_v59 }
 0x23e   : > { %7703 = vmatmul.mubr.bf16.gmra.mrb[8].mxu0 %v2646_v11 }
 0x23f   : > { %7706 = vmatprep.mubr.bf16.mxu0 %v2647_v31 }
 0x246   : > { %7707 = vmatmul.mubr.bf16.gmra.mrb[12].mxu0 %v2648_v44 }
 0x247   : > { %7710 = vmatprep.mubr.bf16.mxu0 %v2649_v45 }
 0x24e   : > { %7711 = vmatmul.mubr.bf16.gmra.mrb[16].mxu0 %v2650_v62  ;;  %v8718_v62 = vld [vmem:[%s10252_s3 + $0x8] sm:$0xff]  }
 0x24f   : > { %7714 = vmatprep.mubr.bf16.mxu0 %v2651_v63 }
 0x256   : > { %7715 = vmatmul.mubr.bf16.gmra.mrb[20].mxu0 %v2652_v9 }
 0x257   : > { %7718 = vmatprep.mubr.bf16.mxu0 %v2653_v12 }
 0x25e   : > { %7719 = vmatmul.mubr.bf16.gmra.mrb[24].mxu0 %v2654_v23 }
 0x25f   : > { %7722 = vmatprep.mubr.bf16.mxu0 %v9361_v47  ;;  %v8714_v47 = vld [vmem:[%s10252_s3 + $0x28] sm:$0xff]  }
 0x260   : > { %7728 = vmatprep.subr.bf16.mxu1 %v8714_v47 }
 0x261   : > { %7729 = vmatpush3.bf16.msra.mxu1 %v8714_v47 }
 0x262   : > { %7730 = vmatprep.subr.bf16.mxu1 %v8715_v25 }
 0x265   : > { %7731 = vmatpush3.bf16.msra.mxu1 %v8715_v25 }
 0x266   : > { %7723 = vmatmul.mubr.bf16.gmra.mrb[28].mxu0 %v2656_v16  ;;  %7732 = vmatprep.subr.bf16.mxu1 %v8716_v32 }
 0x269   : > { %7733 = vmatpush3.bf16.msra.mxu1 %v8716_v32 }
 0x26a   : > { %7766 = vmatprep.subr.bf16.mxu1 %v9558_v49 }
 0x301   : > { %v7696_v55 = vpop.f32.mrb[0].mxu0 }
 0x302   : > { %v2924_v60 = vadd.f32 %v7696_v55, %v9564_v54  ;;  %v2756_v61 = vpop.f32.mrb[1].mxu0 }
 0x303   : > { %v2922_v2 = vadd.f32 %v9564_v54, %v2756_v61  ;;  %v7697_v21 = vpop.f32.mrb[2].mxu0 }
 0x304   : > { %vm2956_vm2 = vcmp.ge.f32.partialorder %v2924_v60, 0.0  ;;  %v2988_v22 = vmul.f32 0.2, %v2924_v60  ;;  %v2925_v35 = vadd.f32 %v7697_v21, %v9564_v54  ;;  %v2759_v36 = vpop.f32.mrb[3].mxu0 }
 0x305   : > { %vm2954_vm3 = vcmp.ge.f32.partialorder %v2922_v2, 0.0  ;;  %v2986_v52 = vmul.f32 0.2, %v2922_v2  ;;  %v2923_v1 = vadd.f32 %v9564_v54, %v2759_v36 }
 0x306   : > { %v3020_v10 = vsel %vm2956_vm2, %v2924_v60, %v2988_v22  ;;  %vm2957_vm4 = vcmp.ge.f32.partialorder %v2925_v35, 0.0  ;;  %v2989_v18 = vmul.f32 0.2, %v2925_v35  ;;  %v8720_v60 = vld [vmem:[%s10252_s3 + $0x18] sm:$0xff]  }
 0x307   : > { %3109 = vst.msk [vmem:[#allocation2 + $0x31] sm:$0xff] %vm3050_vm0, %v3020_v10  ;;  %v3018_v20 = vsel %vm2954_vm3, %v2922_v2, %v2986_v52  ;;  %vm2955_vm5 = vcmp.ge.f32.partialorder %v2923_v1, 0.0  ;;  %v2987_v28 = vmul.f32 0.2, %v2923_v1 }
 0x308   : > { %3107 = vst.msk [vmem:[#allocation2 + $0x19] sm:$0xff] %vm3050_vm0, %v3018_v20  ;;  %v3021_v30 = vsel %vm2957_vm4, %v2925_v35, %v2989_v18  ;;  %v9623_v20 = vld [vmem:[%s10252_s3 + $0x40] sm:$0xff]  }
 0x309   : > { %3110 = vst.msk [vmem:[#allocation2 + $0x39] sm:$0xff] %vm3050_vm0, %v3021_v30  ;;  %v3019_v38 = vsel %vm2955_vm5, %v2923_v1, %v2987_v28  ;;  %v7700_v48 = vpop.f32.mrb[4].mxu0 }
 0x30a   : > { %3108 = vst.msk [vmem:[#allocation2 + $0x21] sm:$0xff] %vm3050_vm0, %v3019_v38  ;;  %v2928_v39 = vadd.f32 %v7700_v48, %v9564_v54  ;;  %v2772_v50 = vpop.f32.mrb[5].mxu0 }
 0x30b   : > { %v2926_v51 = vadd.f32 %v9564_v54, %v2772_v50  ;;  %v7701_v5 = vpop.f32.mrb[6].mxu0 }
 0x30c   : > { %vm2960_vm6 = vcmp.ge.f32.partialorder %v2928_v39, 0.0  ;;  %v2992_v15 = vmul.f32 0.2, %v2928_v39  ;;  %v2929_v58 = vadd.f32 %v7701_v5, %v9564_v54  ;;  %v2775_v59 = vpop.f32.mrb[7].mxu0 }
 0x30d   : > { %vm2958_vm7 = vcmp.ge.f32.partialorder %v2926_v51, 0.0  ;;  %v2990_v3 = vmul.f32 0.2, %v2926_v51  ;;  %v2927_v19 = vadd.f32 %v9564_v54, %v2775_v59 }
 0x30e   : > { %v3024_v4 = vsel %vm2960_vm6, %v2928_v39, %v2992_v15  ;;  %vm2961_vm8 = vcmp.ge.f32.partialorder %v2929_v58, 0.0  ;;  %v2993_v29 = vmul.f32 0.2, %v2929_v58  ;;  %v3199_v57 = vld [vmem:[#allocation2 + $0x31] sm:$0xff] }
 0x30f   : > { %3113 = vst.msk [vmem:[#allocation2 + $0x61] sm:$0xff] %vm3050_vm0, %v3024_v4  ;;  %v3022_v11 = vsel %vm2958_vm7, %v2926_v51, %v2990_v3  ;;  %vm2959_vm9 = vcmp.ge.f32.partialorder %v2927_v19, 0.0  ;;  %v2991_v31 = vmul.f32 0.2, %v2927_v19  ;;  %v3197_v44 = vld [vmem:[#allocation2 + $0x19] sm:$0xff] }
 0x310   : > { %3111 = vst.msk [vmem:[#allocation2 + $0x49] sm:$0xff] %vm3050_vm0, %v3022_v11  ;;  %v3025_v34 = vsel %vm2961_vm8, %v2929_v58, %v2993_v29  ;;  %v3200_v37 = vld [vmem:[#allocation2 + $0x39] sm:$0xff] }
 0x311   : > { %3114 = vst.msk [vmem:[#allocation2 + $0x69] sm:$0xff] %vm3050_vm0, %v3025_v34  ;;  %v3023_v41 = vsel %vm2959_vm9, %v2927_v19, %v2991_v31  ;;  %v7704_v43 = vpop.f32.mrb[8].mxu0  ;;  %v3198_v45 = vld [vmem:[#allocation2 + $0x21] sm:$0xff]  ;;  %v9589_v0 = vpack.c.bf16 %v3200_v37, %v3199_v57 }
 0x312   : > { %3112 = vst.msk [vmem:[#allocation2 + $0x51] sm:$0xff] %vm3050_vm0, %v3023_v41  ;;  %v2932_v46 = vadd.f32 %v7704_v43, %v9564_v54  ;;  %v2788_v53 = vpop.f32.mrb[9].mxu0  ;;  %v9583_v56 = vpack.c.bf16 %v3198_v45, %v3197_v44 }
 0x313   : > { %v2930_v63 = vadd.f32 %v9564_v54, %v2788_v53  ;;  %v7705_v8 = vpop.f32.mrb[10].mxu0 }
 0x314   : > { %vm2964_vm10 = vcmp.ge.f32.partialorder %v2932_v46, 0.0  ;;  %v2996_v6 = vmul.f32 0.2, %v2932_v46  ;;  %v2933_v7 = vadd.f32 %v7705_v8, %v9564_v54  ;;  %v2791_v9 = vpop.f32.mrb[11].mxu0  ;;  %7735 = vmatmul.mubr.msk.bf16.vlgmr.msra.gmra.mrb[0].mxu1 %vm3050_vm0, %v9583_v56 }
 0x315   : > { %vm2962_vm11 = vcmp.ge.f32.partialorder %v2930_v63, 0.0  ;;  %v2994_v12 = vmul.f32 0.2, %v2930_v63  ;;  %v2931_v13 = vadd.f32 %v9564_v54, %v2791_v9  ;;  %7738 = vmatprep.mubr.msk.bf16.mxu1 %vm3050_vm0, %v9589_v0  ;;  %7767 = vmatpush3.bf16.msra.mxu1 %v9558_v49 }
 0x316   : > { %v3028_v14 = vsel %vm2964_vm10, %v2932_v46, %v2996_v6  ;;  %vm2965_vm12 = vcmp.ge.f32.partialorder %v2933_v7, 0.0  ;;  %v2997_v23 = vmul.f32 0.2, %v2933_v7  ;;  %7768 = vmatprep.subr.bf16.mxu1 %v8718_v62  ;;  %v3203_v55 = vld [vmem:[#allocation2 + $0x61] sm:$0xff] }
 0x317   : > { %3117 = vst.msk [vmem:[#allocation2 + $0x91] sm:$0xff] %vm3050_vm0, %v3028_v14  ;;  %v3026_v27 = vsel %vm2962_vm11, %v2930_v63, %v2994_v12  ;;  %vm2963_vm13 = vcmp.ge.f32.partialorder %v2931_v13, 0.0  ;;  %v2995_v16 = vmul.f32 0.2, %v2931_v13  ;;  %v3201_v32 = vld [vmem:[#allocation2 + $0x49] sm:$0xff] }
 0x318   : > { %3115 = vst.msk [vmem:[#allocation2 + $0x79] sm:$0xff] %vm3050_vm0, %v3026_v27  ;;  %v3029_v17 = vsel %vm2965_vm12, %v2933_v7, %v2997_v23  ;;  %v3204_v24 = vld [vmem:[#allocation2 + $0x69] sm:$0xff] }
 0x319   : > { %3118 = vst.msk [vmem:[#allocation2 + $0x99] sm:$0xff] %vm3050_vm0, %v3029_v17  ;;  %v3027_v47 = vsel %vm2963_vm13, %v2931_v13, %v2995_v16  ;;  %v7708_v25 = vpop.f32.mrb[12].mxu0  ;;  %v3202_v33 = vld [vmem:[#allocation2 + $0x51] sm:$0xff]  ;;  %7769 = vmatpush3.bf16.msra.mxu1 %v8718_v62  ;;  %v9612_v21 = vpack.c.bf16 %v3204_v24, %v3203_v55 }
 0x31a   : > { %3116 = vst.msk [vmem:[#allocation2 + $0x81] sm:$0xff] %vm3050_vm0, %v3027_v47  ;;  %v2936_v40 = vadd.f32 %v7708_v25, %v9564_v54  ;;  %v2804_v42 = vpop.f32.mrb[13].mxu0  ;;  %v9606_v49 = vpack.c.bf16 %v3202_v33, %v3201_v32  ;;  %7770 = vmatprep.subr.bf16.mxu1 %v8719_v26 }
 0x31b   : > { %v2934_v61 = vadd.f32 %v9564_v54, %v2804_v42  ;;  %v7709_v2 = vpop.f32.mrb[14].mxu0 }
 0x31c   : > { %vm2968_vm14 = vcmp.ge.f32.partialorder %v2936_v40, 0.0  ;;  %v3000_v22 = vmul.f32 0.2, %v2936_v40  ;;  %v2937_v35 = vadd.f32 %v7709_v2, %v9564_v54  ;;  %v2807_v36 = vpop.f32.mrb[15].mxu0  ;;  %7739 = vmatmul.mubr.msk.bf16.gmra.mrb[4].mxu1 %vm3050_vm0, %v9606_v49 }
 0x31d   : > { %vm2966_vm15 = vcmp.ge.f32.partialorder %v2934_v61, 0.0  ;;  %v2998_v52 = vmul.f32 0.2, %v2934_v61  ;;  %v2935_v1 = vadd.f32 %v9564_v54, %v2807_v36  ;;  %7742 = vmatprep.mubr.msk.bf16.mxu1 %vm3050_vm0, %v9612_v21  ;;  %7771 = vmatpush3.bf16.msra.mxu1 %v8719_v26 }
 0x31e   : > { %v3032_v10 = vsel %vm2968_vm14, %v2936_v40, %v3000_v22  ;;  %vm2969_vm1 = vcmp.ge.f32.partialorder %v2937_v35, 0.0  ;;  %v3001_v18 = vmul.f32 0.2, %v2937_v35  ;;  %7772 = vmatprep.subr.bf16.mxu1 %v8720_v60  ;;  %v3207_v3 = vld [vmem:[#allocation2 + $0x91] sm:$0xff] }
 0x31f   : > { %3121 = vst.msk [vmem:[#allocation2 + $0xc1] sm:$0xff] %vm3050_vm0, %v3032_v10  ;;  %v3030_v28 = vsel %vm2966_vm15, %v2934_v61, %v2998_v52  ;;  %vm2967_vm2 = vcmp.ge.f32.partialorder %v2935_v1, 0.0  ;;  %v2999_v30 = vmul.f32 0.2, %v2935_v1  ;;  %v3205_v51 = vld [vmem:[#allocation2 + $0x79] sm:$0xff] }
 0x320   : > { %3119 = vst.msk [vmem:[#allocation2 + $0xa9] sm:$0xff] %vm3050_vm0, %v3030_v28  ;;  %v3033_v38 = vsel %vm2969_vm1, %v2937_v35, %v3001_v18  ;;  %v3208_v48 = vld [vmem:[#allocation2 + $0x99] sm:$0xff] }
 0x321   : > { %3122 = vst.msk [vmem:[#allocation2 + $0xc9] sm:$0xff] %vm3050_vm0, %v3033_v38  ;;  %v3031_v39 = vsel %vm2967_vm2, %v2935_v1, %v2999_v30  ;;  %v7712_v50 = vpop.f32.mrb[16].mxu0  ;;  %v3206_v5 = vld [vmem:[#allocation2 + $0x81] sm:$0xff]  ;;  %7773 = vmatpush3.bf16.msra.mxu1 %v8720_v60  ;;  %v9634_v29 = vpack.c.bf16 %v3208_v48, %v3207_v3 }
 0x322   : > { %3120 = vst.msk [vmem:[#allocation2 + $0xb1] sm:$0xff] %vm3050_vm0, %v3031_v39  ;;  %v2940_v15 = vadd.f32 %v7712_v50, %v9564_v54  ;;  %v2820_v58 = vpop.f32.mrb[17].mxu0  ;;  %v9630_v59 = vpack.c.bf16 %v3206_v5, %v3205_v51  ;;  %7806 = vmatprep.subr.bf16.mxu1 %v9623_v20 }
 0x323   : > { %v2938_v19 = vadd.f32 %v9564_v54, %v2820_v58  ;;  %v7713_v4 = vpop.f32.mrb[18].mxu0 }
 0x324   : > { %vm2972_vm3 = vcmp.ge.f32.partialorder %v2940_v15, 0.0  ;;  %v3004_v11 = vmul.f32 0.2, %v2940_v15  ;;  %v2941_v31 = vadd.f32 %v7713_v4, %v9564_v54  ;;  %v2823_v34 = vpop.f32.mrb[19].mxu0  ;;  %7743 = vmatmul.mubr.msk.bf16.gmra.mrb[8].mxu1 %vm3050_vm0, %v9630_v59 }
 0x325   : > { %vm2970_vm4 = vcmp.ge.f32.partialorder %v2938_v19, 0.0  ;;  %v3002_v37 = vmul.f32 0.2, %v2938_v19  ;;  %v2939_v41 = vadd.f32 %v9564_v54, %v2823_v34  ;;  %7746 = vmatprep.mubr.msk.bf16.mxu1 %vm3050_vm0, %v9634_v29 }
 0x326   : > { %v3036_v43 = vsel %vm2972_vm3, %v2940_v15, %v3004_v11  ;;  %vm2973_vm5 = vcmp.ge.f32.partialorder %v2941_v31, 0.0  ;;  %v3005_v44 = vmul.f32 0.2, %v2941_v31  ;;  %v3211_v13 = vld [vmem:[#allocation2 + $0xc1] sm:$0xff] }
 0x327   : > { %3125 = vst.msk [vmem:[#allocation2 + $0xf1] sm:$0xff] %vm3050_vm0, %v3036_v43  ;;  %v3034_v45 = vsel %vm2970_vm4, %v2938_v19, %v3002_v37  ;;  %vm2971_vm6 = vcmp.ge.f32.partialorder %v2939_v41, 0.0  ;;  %v3003_v46 = vmul.f32 0.2, %v2939_v41  ;;  %v3209_v8 = vld [vmem:[#allocation2 + $0xa9] sm:$0xff] }
 0x328   : > { %3123 = vst.msk [vmem:[#allocation2 + $0xd9] sm:$0xff] %vm3050_vm0, %v3034_v45  ;;  %v3037_v53 = vsel %vm2973_vm5, %v2941_v31, %v3005_v44  ;;  %v3212_v57 = vld [vmem:[#allocation2 + $0xc9] sm:$0xff] }
 0x329   : > { %3126 = vst.msk [vmem:[#allocation2 + $0xf9] sm:$0xff] %vm3050_vm0, %v3037_v53  ;;  %v3035_v62 = vsel %vm2971_vm6, %v2939_v41, %v3003_v46  ;;  %v7716_v63 = vpop.f32.mrb[20].mxu0  ;;  %v3210_v6 = vld [vmem:[#allocation2 + $0xb1] sm:$0xff]  ;;  %v9650_v26 = vpack.c.bf16 %v3212_v57, %v3211_v13 }
 0x32a   : > { %3124 = vst.msk [vmem:[#allocation2 + $0xe1] sm:$0xff] %vm3050_vm0, %v3035_v62  ;;  %v2944_v7 = vadd.f32 %v7716_v63, %v9564_v54  ;;  %v2836_v9 = vpop.f32.mrb[21].mxu0  ;;  %v9647_v12 = vpack.c.bf16 %v3210_v6, %v3209_v8 }
 0x32b   : > { %v2942_v14 = vadd.f32 %v9564_v54, %v2836_v9  ;;  %v7717_v23 = vpop.f32.mrb[22].mxu0 }
 0x32c   : > { %vm2976_vm7 = vcmp.ge.f32.partialorder %v2944_v7, 0.0  ;;  %v3008_v27 = vmul.f32 0.2, %v2944_v7  ;;  %v2945_v16 = vadd.f32 %v7717_v23, %v9564_v54  ;;  %v2839_v17 = vpop.f32.mrb[23].mxu0  ;;  %7747 = vmatmul.mubr.msk.bf16.gmra.mrb[12].mxu1 %vm3050_vm0, %v9647_v12 }
 0x32d   : > { %vm2974_vm8 = vcmp.ge.f32.partialorder %v2942_v14, 0.0  ;;  %v3006_v24 = vmul.f32 0.2, %v2942_v14  ;;  %v2943_v47 = vadd.f32 %v9564_v54, %v2839_v17  ;;  %7750 = vmatprep.mubr.msk.bf16.mxu1 %vm3050_vm0, %v9650_v26 }
 0x32e   : > { %v3040_v25 = vsel %vm2976_vm7, %v2944_v7, %v3008_v27  ;;  %vm2977_vm9 = vcmp.ge.f32.partialorder %v2945_v16, 0.0  ;;  %v3009_v32 = vmul.f32 0.2, %v2945_v16  ;;  %v3215_v1 = vld [vmem:[#allocation2 + $0xf1] sm:$0xff] }
 0x32f   : > { %3129 = vst.msk [vmem:[#allocation2 + $0x121] sm:$0xff] %vm3050_vm0, %v3040_v25  ;;  %v3038_v33 = vsel %vm2974_vm8, %v2942_v14, %v3006_v24  ;;  %vm2975_vm10 = vcmp.ge.f32.partialorder %v2943_v47, 0.0  ;;  %v3007_v40 = vmul.f32 0.2, %v2943_v47  ;;  %v3213_v2 = vld [vmem:[#allocation2 + $0xd9] sm:$0xff] }
 0x330   : > { %3127 = vst.msk [vmem:[#allocation2 + $0x109] sm:$0xff] %vm3050_vm0, %v3038_v33  ;;  %v3041_v42 = vsel %vm2977_vm9, %v2945_v16, %v3009_v32  ;;  %v3216_v55 = vld [vmem:[#allocation2 + $0xf9] sm:$0xff]  ;;  %v3140_v33 = vld [vmem:[#allocation2 + $0x8] sm:$0xff] }
 0x331   : > { %3130 = vst.msk [vmem:[#allocation2 + $0x129] sm:$0xff] %vm3050_vm0, %v3041_v42  ;;  %v3039_v60 = vsel %vm2975_vm10, %v2943_v47, %v3007_v40  ;;  %v7720_v61 = vpop.f32.mrb[24].mxu0  ;;  %v3214_v22 = vld [vmem:[#allocation2 + $0xe1] sm:$0xff]  ;;  %v9666_v28 = vpack.c.bf16 %v3216_v55, %v3215_v1 }
 0x332   : > { %3128 = vst.msk [vmem:[#allocation2 + $0x111] sm:$0xff] %vm3050_vm0, %v3039_v60  ;;  %v2948_v35 = vadd.f32 %v7720_v61, %v9564_v54  ;;  %v2852_v36 = vpop.f32.mrb[25].mxu0  ;;  %v9663_v52 = vpack.c.bf16 %v3214_v22, %v3213_v2  ;;  %v3139_v32 = vld [vmem:[#allocation2] sm:$0xff]  ;;  %v3144_v2 = vld [vmem:[#allocation2 + $0x38] sm:$0xff]  ;;  %v8722_v1 = vld [vmem:[%s10252_s3 + $0x48] sm:$0xff]  }
 0x333   : > { %v2946_v10 = vadd.f32 %v9564_v54, %v2852_v36  ;;  %v7721_v18 = vpop.f32.mrb[26].mxu0  ;;  %v3171_v55 = vpack.c.bf16 %v3140_v33, %v3139_v32  ;;  %v3142_v61 = vld [vmem:[#allocation2 + $0x20] sm:$0xff]  ;;  %v3141_v22 = vld [vmem:[#allocation2 + $0x18] sm:$0xff]  ;;  %v3143_v36 = vld [vmem:[#allocation2 + $0x30] sm:$0xff] }
 0x334   : > { %vm2980_vm11 = vcmp.ge.f32.partialorder %v2948_v35, 0.0  ;;  %v3012_v30 = vmul.f32 0.2, %v2948_v35  ;;  %v2949_v38 = vadd.f32 %v7721_v18, %v9564_v54  ;;  %v2855_v48 = vpop.f32.mrb[27].mxu0  ;;  %7751 = vmatmul.mubr.msk.bf16.gmra.mrb[16].mxu1 %vm3050_vm0, %v9663_v52  ;;  %v8723_v18 = vld [vmem:[%s10252_s3 + $0x50] sm:$0xff]  }
 0x335   : > { %vm2978_vm12 = vcmp.ge.f32.partialorder %v2946_v10, 0.0  ;;  %v3010_v39 = vmul.f32 0.2, %v2946_v10  ;;  %v2947_v50 = vadd.f32 %v9564_v54, %v2855_v48  ;;  %7754 = vmatprep.mubr.msk.bf16.mxu1 %vm3050_vm0, %v9666_v28  ;;  %v3145_v48 = vld [vmem:[#allocation2 + $0x48] sm:$0xff] }
 0x336   : > { %v3044_v51 = vsel %vm2980_vm11, %v2948_v35, %v3012_v30  ;;  %vm2981_vm13 = vcmp.ge.f32.partialorder %v2949_v38, 0.0  ;;  %v3013_v5 = vmul.f32 0.2, %v2949_v38  ;;  %v3219_v44 = vld [vmem:[#allocation2 + $0x121] sm:$0xff]  ;;  %v9707_v35 = vpack.c.bf16 %v3142_v61, %v3141_v22  ;;  %v3146_v30 = vld [vmem:[#allocation2 + $0x50] sm:$0xff] }
 0x337   : > { %3133 = vst.msk [vmem:[#allocation2 + $0x151] sm:$0xff] %vm3050_vm0, %v3044_v51  ;;  %v3042_v15 = vsel %vm2978_vm12, %v2946_v10, %v3010_v39  ;;  %vm2979_vm14 = vcmp.ge.f32.partialorder %v2947_v50, 0.0  ;;  %v3011_v58 = vmul.f32 0.2, %v2947_v50  ;;  %v3217_v31 = vld [vmem:[#allocation2 + $0x109] sm:$0xff]  ;;  %v9712_v10 = vpack.c.bf16 %v3144_v2, %v3143_v36  ;;  %v8724_v51 = vld [vmem:[%s10252_s3 + $0x58] sm:$0xff]  }
 0x338   : > { %3131 = vst.msk [vmem:[#allocation2 + $0x139] sm:$0xff] %vm3050_vm0, %v3042_v15  ;;  %v3045_v3 = vsel %vm2981_vm13, %v2949_v38, %v3013_v5  ;;  %v3220_v19 = vld [vmem:[#allocation2 + $0x129] sm:$0xff]  ;;  %v9722_v39 = vpack.c.bf16 %v3146_v30, %v3145_v48  ;;  %v3150_v15 = vld [vmem:[#allocation2 + $0x80] sm:$0xff] }
 0x339   : > { %3134 = vst.msk [vmem:[#allocation2 + $0x159] sm:$0xff] %vm3050_vm0, %v3045_v3  ;;  %v3043_v4 = vsel %vm2979_vm14, %v2947_v50, %v3011_v58  ;;  %v7724_v11 = vpop.f32.mrb[28].mxu0  ;;  %v3218_v34 = vld [vmem:[#allocation2 + $0x111] sm:$0xff]  ;;  %v9682_v53 = vpack.c.bf16 %v3220_v19, %v3219_v44  ;;  %v3148_v38 = vld [vmem:[#allocation2 + $0x68] sm:$0xff]  ;;  %v3147_v50 = vld [vmem:[#allocation2 + $0x60] sm:$0xff] }
 0x33a   : > { %3132 = vst.msk [vmem:[#allocation2 + $0x141] sm:$0xff] %vm3050_vm0, %v3043_v4  ;;  %v2952_v37 = vadd.f32 %v7724_v11, %v9564_v54  ;;  %v2868_v41 = vpop.f32.mrb[29].mxu0  ;;  %v9679_v43 = vpack.c.bf16 %v3218_v34, %v3217_v31  ;;  %v9727_v5 = vpack.c.bf16 %v3148_v38, %v3147_v50  ;;  %v3152_v58 = vld [vmem:[#allocation2 + $0x98] sm:$0xff]  ;;  %v3151_v4 = vld [vmem:[#allocation2 + $0x90] sm:$0xff]  ;;  %v3156_v34 = vld [vmem:[#allocation2 + $0xc8] sm:$0xff] }
 0x33b   : > { %v2950_v45 = vadd.f32 %v9564_v54, %v2868_v41  ;;  %v7725_v46 = vpop.f32.mrb[30].mxu0  ;;  %v3149_v3 = vld [vmem:[#allocation2 + $0x78] sm:$0xff]  ;;  %v9738_v11 = vpack.c.bf16 %v3152_v58, %v3151_v4  ;;  %v3154_v31 = vld [vmem:[#allocation2 + $0xb0] sm:$0xff]  ;;  %v3155_v44 = vld [vmem:[#allocation2 + $0xc0] sm:$0xff] }
 0x33c   : > { %vm2984_vm15 = vcmp.ge.f32.partialorder %v2952_v37, 0.0  ;;  %v3016_v57 = vmul.f32 0.2, %v2952_v37  ;;  %v2953_v62 = vadd.f32 %v7725_v46, %v9564_v54  ;;  %v2871_v63 = vpop.f32.mrb[31].mxu0  ;;  %7755 = vmatmul.mubr.msk.bf16.gmra.mrb[20].mxu1 %vm3050_vm0, %v9679_v43  ;;  %v9736_v19 = vpack.c.bf16 %v3150_v15, %v3149_v3  ;;  %v3158_v46 = vld [vmem:[#allocation2 + $0xe0] sm:$0xff]  ;;  %v8726_v48 = vld [vmem:[%s10252_s3 + $0x68] sm:$0xff]  }
 0x33d   : > { %vm2982_vm1 = vcmp.ge.f32.partialorder %v2950_v45, 0.0  ;;  %v3014_v8 = vmul.f32 0.2, %v2950_v45  ;;  %v2951_v6 = vadd.f32 %v9564_v54, %v2871_v63  ;;  %7758 = vmatprep.mubr.msk.bf16.mxu1 %vm3050_vm0, %v9682_v53  ;;  %v3720_v36 = vld [vmem:[#allocation2 + $0x1a] sm:$0xff]  ;;  %v3724_v15 = vld [vmem:[#allocation2 + $0x4a] sm:$0xff]  ;;  %v3725_v58 = vld [vmem:[#allocation2 + $0x52] sm:$0xff] }
 0x33e   : > { %v3048_v7 = vsel %vm2984_vm15, %v2952_v37, %v3016_v57  ;;  %vm2985_vm2 = vcmp.ge.f32.partialorder %v2953_v62, 0.0  ;;  %v3017_v9 = vmul.f32 0.2, %v2953_v62  ;;  %v3223_v47 = vld [vmem:[#allocation2 + $0x151] sm:$0xff]  ;;  %v3153_v37 = vld [vmem:[#allocation2 + $0xa8] sm:$0xff]  ;;  %v3723_v30 = vld [vmem:[#allocation2 + $0x3a] sm:$0xff] }
 0x33f   : > { %3137 = vst.msk [vmem:[#allocation2 + $0x181] sm:$0xff] %vm3050_vm0, %v3048_v7  ;;  %v3046_v13 = vsel %vm2982_vm1, %v2950_v45, %v3014_v8  ;;  %vm2983_vm3 = vcmp.ge.f32.partialorder %v2951_v6, 0.0  ;;  %v3015_v14 = vmul.f32 0.2, %v2951_v6  ;;  %v3221_v17 = vld [vmem:[#allocation2 + $0x139] sm:$0xff]  ;;  %v9744_v41 = vpack.c.bf16 %v3154_v31, %v3153_v37  ;;  %v3159_v8 = vld [vmem:[#allocation2 + $0xf0] sm:$0xff] }
 0x340   : > { %3135 = vst.msk [vmem:[#allocation2 + $0x169] sm:$0xff] %vm3050_vm0, %v3046_v13  ;;  %v3049_v23 = vsel %vm2985_vm2, %v2953_v62, %v3017_v9  ;;  %v3224_v27 = vld [vmem:[#allocation2 + $0x159] sm:$0xff]  ;;  %v9746_v45 = vpack.c.bf16 %v3156_v34, %v3155_v44  ;;  %v3162_v7 = vld [vmem:[#allocation2 + $0x110] sm:$0xff]  ;;  %v3164_v9 = vld [vmem:[#allocation2 + $0x128] sm:$0xff]  ;;  %v9795_v31 = vpack.c.bf16 %v3725_v58, %v3724_v15 }
 0x341   : > { %3138 = vst.msk [vmem:[#allocation2 + $0x189] sm:$0xff] %vm3050_vm0, %v3049_v23  ;;  %v3047_v16 = vsel %vm2983_vm3, %v2951_v6, %v3015_v14  ;;  %v3222_v54 = vld [vmem:[#allocation2 + $0x141] sm:$0xff]  ;;  %v9696_v25 = vpack.c.bf16 %v3224_v27, %v3223_v47  ;;  %v3160_v57 = vld [vmem:[#allocation2 + $0xf8] sm:$0xff]  ;;  %v3167_v32 = vld [vmem:[#allocation2 + $0x150] sm:$0xff] }
 0x342   : > { %3136 = vst.msk [vmem:[#allocation2 + $0x171] sm:$0xff] %vm3050_vm0, %v3047_v16  ;;  %v9694_v24 = vpack.c.bf16 %v3222_v54, %v3221_v17  ;;  %v3157_v62 = vld [vmem:[#allocation2 + $0xd8] sm:$0xff]  ;;  %v9754_v6 = vpack.c.bf16 %v3160_v57, %v3159_v8  ;;  %v3161_v13 = vld [vmem:[#allocation2 + $0x108] sm:$0xff]  ;;  %v3163_v23 = vld [vmem:[#allocation2 + $0x120] sm:$0xff] }
 0x343   : > { %v9752_v63 = vpack.c.bf16 %v3158_v46, %v3157_v62  ;;  %v9760_v14 = vpack.c.bf16 %v3162_v7, %v3161_v13  ;;  %v9762_v27 = vpack.c.bf16 %v3164_v9, %v3163_v23  ;;  %v3166_v16 = vld [vmem:[#allocation2 + $0x140] sm:$0xff]  ;;  %v3168_v17 = vld [vmem:[#allocation2 + $0x158] sm:$0xff]  ;;  %v3727_v4 = vld [vmem:[#allocation2 + $0x6a] sm:$0xff] }
 0x344   : > { %7759 = vmatmul.mubr.msk.bf16.gmra.mrb[24].mxu1 %vm3050_vm0, %v9694_v24  ;;  %v3165_v54 = vld [vmem:[#allocation2 + $0x138] sm:$0xff]  ;;  %v9770_v33 = vpack.c.bf16 %v3168_v17, %v3167_v32  ;;  %v3726_v3 = vld [vmem:[#allocation2 + $0x62] sm:$0xff]  ;;  %v3732_v9 = vld [vmem:[#allocation2 + $0xaa] sm:$0xff] }
 0x345   : > { %7762 = vmatprep.mubr.msk.bf16.mxu1 %vm3050_vm0, %v9696_v25  ;;  %v9768_v47 = vpack.c.bf16 %v3166_v16, %v3165_v54  ;;  %v8728_v34 = vld [vmem:[%s10252_s3 + $0x78] sm:$0xff]   ;;  %v9800_v37 = vpack.c.bf16 %v3727_v4, %v3726_v3  ;;  %v3729_v46 = vld [vmem:[#allocation2 + $0x82] sm:$0xff]  ;;  %v3735_v16 = vld [vmem:[#allocation2 + $0xca] sm:$0xff] }
 0x346   : > { %v3728_v44 = vld [vmem:[#allocation2 + $0x7a] sm:$0xff]  ;;  %v3730_v57 = vld [vmem:[#allocation2 + $0x92] sm:$0xff]  ;;  %v3734_v23 = vld [vmem:[#allocation2 + $0xc2] sm:$0xff] }
 0x347   : > { %v3225_v40 = vld [vmem:[#allocation2 + $0x169] sm:$0xff]  ;;  %v3731_v62 = vld [vmem:[#allocation2 + $0x9a] sm:$0xff]  ;;  %v9809_v8 = vpack.c.bf16 %v3729_v46, %v3728_v44  ;;  %v3733_v13 = vld [vmem:[#allocation2 + $0xb2] sm:$0xff]  ;;  %v9819_v54 = vpack.c.bf16 %v3735_v16, %v3734_v23 }
 0x348   : > { %v3169_v61 = vld [vmem:[#allocation2 + $0x168] sm:$0xff]  ;;  %v9811_v7 = vpack.c.bf16 %v3731_v62, %v3730_v57  ;;  %v9817_v17 = vpack.c.bf16 %v3733_v13, %v3732_v9  ;;  %v3736_v32 = vld [vmem:[#allocation2 + $0xda] sm:$0xff]  ;;  %v3746_v3 = vld [vmem:[#allocation2 + $0x152] sm:$0xff] }
 0x349   : > { %v3226_v42 = vld [vmem:[#allocation2 + $0x171] sm:$0xff]  ;;  %v3744_v15 = vld [vmem:[#allocation2 + $0x13a] sm:$0xff]  ;;  %v3745_v58 = vld [vmem:[#allocation2 + $0x142] sm:$0xff] }
 0x34a   : > { %v9702_v60 = vpack.c.bf16 %v3226_v42, %v3225_v40  ;;  %v3718_v40 = vld [vmem:[#allocation2 + $0x2] sm:$0xff]  ;;  %v3719_v42 = vld [vmem:[#allocation2 + $0xa] sm:$0xff]  ;;  %v3747_v4 = vld [vmem:[#allocation2 + $0x15a] sm:$0xff] }
 0x34b   : > { %v3750_v2 = vpack.c.bf16 %v3719_v42, %v3718_v40  ;;  %v3737_v40 = vld [vmem:[#allocation2 + $0xe2] sm:$0xff]  ;;  %v3738_v42 = vld [vmem:[#allocation2 + $0xf2] sm:$0xff]  ;;  %v9843_v44 = vpack.c.bf16 %v3747_v4, %v3746_v3  ;;  %v3748_v46 = vld [vmem:[#allocation2 + $0x16a] sm:$0xff] }
 0x34c   : > { %7763 = vmatmul.mubr.msk.bf16.gmra.mrb[28].mxu1 %vm3050_vm0, %v9702_v60  ;;  %v3749_v57 = vld [vmem:[#allocation2 + $0x172] sm:$0xff]  ;;  %v8730_v9 = vld [vmem:[%s10252_s3 + $0x88] sm:$0xff]   ;;  %v4070_v16 = vld [vmem:[#allocation2 + $0x180] sm:$0xff] }
 0x34d   : > { %7774 = vmatprep.mubr.msk.bf16.mxu1 %vm3050_vm0, %v3171_v55  ;;  %v3170_v55 = vld [vmem:[#allocation2 + $0x170] sm:$0xff]  ;;  %v9849_v62 = vpack.c.bf16 %v3749_v57, %v3748_v46  ;;  %v4071_v23 = vld [vmem:[#allocation2 + $0x188] sm:$0xff] }
 0x34e   : > { %v9776_v22 = vpack.c.bf16 %v3170_v55, %v3169_v61  ;;  %v3739_v55 = vld [vmem:[#allocation2 + $0xfa] sm:$0xff]  ;;  %v9825_v61 = vpack.c.bf16 %v3737_v40, %v3736_v32  ;;  %v8731_v13 = vld [vmem:[%s10252_s3 + $0x90] sm:$0xff]   ;;  %v9895_v32 = vpack.c.bf16 %v4071_v23, %v4070_v16  ;;  %v8734_v40 = vld [vmem:[%s10252_s3 + $0xa8] sm:$0xff]  }
 0x34f   : > { %v5340_v3 = vld [vmem:[#allocation2 + $0xb1] sm:$0xff]  ;;  %v5342_v4 = vld [vmem:[#allocation2 + $0xc9] sm:$0xff]  ;;  %v5343_v23 = vld [vmem:[#allocation2 + $0xd9] sm:$0xff] }
 0x350   : > { %v5339_v46 = vld [vmem:[#allocation2 + $0xa9] sm:$0xff] }
 0x351   : > { %v5366_v57 = vpack.c.bf16 %v5340_v3, %v5339_v46 }
 0x354   : > { %7775 = vmatmul.mubr.msk.bf16.vlgmr.msra.gmra.mrb[0].mxu1 %vm3050_vm0, %v9707_v35 }
 0x355   : > { %7778 = vmatprep.mubr.msk.bf16.mxu1 %vm3050_vm0, %v9712_v10  ;;  %7807 = vmatpush3.bf16.msra.mxu1 %v9623_v20  ;;  %v8725_v20 = vld [vmem:[%s10252_s3 + $0x60] sm:$0xff]  }
 0x356   : > { %7808 = vmatprep.subr.bf16.mxu1 %v8722_v1 }
 0x359   : > { %7809 = vmatpush3.bf16.msra.mxu1 %v8722_v1  ;;  %v3721_v1 = vld [vmem:[#allocation2 + $0x22] sm:$0xff] }
 0x35a   : > { %7810 = vmatprep.subr.bf16.mxu1 %v8723_v18  ;;  %v9781_v38 = vpack.c.bf16 %v3721_v1, %v3720_v36  ;;  %v3740_v36 = vld [vmem:[#allocation2 + $0x10a] sm:$0xff]  ;;  %v3741_v1 = vld [vmem:[#allocation2 + $0x112] sm:$0xff] }
 0x35c   : > { %7779 = vmatmul.mubr.msk.bf16.gmra.mrb[4].mxu1 %vm3050_vm0, %v9722_v39 }
 0x35d   : > { %7782 = vmatprep.mubr.msk.bf16.mxu1 %vm3050_vm0, %v9727_v5  ;;  %7811 = vmatpush3.bf16.msra.mxu1 %v8723_v18  ;;  %v3722_v18 = vld [vmem:[#allocation2 + $0x32] sm:$0xff] }
 0x35e   : > { %7812 = vmatprep.subr.bf16.mxu1 %v8724_v51  ;;  %v9786_v50 = vpack.c.bf16 %v3723_v30, %v3722_v18  ;;  %v3742_v18 = vld [vmem:[#allocation2 + $0x122] sm:$0xff]  ;;  %v3743_v30 = vld [vmem:[#allocation2 + $0x12a] sm:$0xff] }
 0x361   : > { %7813 = vmatpush3.bf16.msra.mxu1 %v8724_v51  ;;  %v8727_v51 = vld [vmem:[%s10252_s3 + $0x70] sm:$0xff]  }
 0x362   : > { %7846 = vmatprep.subr.bf16.mxu1 %v8725_v20 }
 0x364   : > { %7783 = vmatmul.mubr.msk.bf16.gmra.mrb[8].mxu1 %vm3050_vm0, %v9736_v19 }
 0x365   : > { %7786 = vmatprep.mubr.msk.bf16.mxu1 %vm3050_vm0, %v9738_v11 }
 0x36c   : > { %7787 = vmatmul.mubr.msk.bf16.gmra.mrb[12].mxu1 %vm3050_vm0, %v9744_v41 }
 0x36d   : > { %7790 = vmatprep.mubr.msk.bf16.mxu1 %vm3050_vm0, %v9746_v45 }
 0x374   : > { %7791 = vmatmul.mubr.msk.bf16.gmra.mrb[16].mxu1 %vm3050_vm0, %v9752_v63 }
 0x375   : > { %7794 = vmatprep.mubr.msk.bf16.mxu1 %vm3050_vm0, %v9754_v6 }
 0x37c   : > { %7795 = vmatmul.mubr.msk.bf16.gmra.mrb[20].mxu1 %vm3050_vm0, %v9760_v14 }
 0x37d   : > { %7798 = vmatprep.mubr.msk.bf16.mxu1 %vm3050_vm0, %v9762_v27 }
 0x384   : > { %7799 = vmatmul.mubr.msk.bf16.gmra.mrb[24].mxu1 %vm3050_vm0, %v9768_v47 }
 0x385   : > { %7802 = vmatprep.mubr.msk.bf16.mxu1 %vm3050_vm0, %v9770_v33 }
 0x38c   : > { %7803 = vmatmul.mubr.msk.bf16.gmra.mrb[28].mxu1 %vm3050_vm0, %v9776_v22 }
 0x38d   : > { %7814 = vmatprep.mubr.msk.bf16.mxu1 %vm3050_vm0, %v3750_v2  ;;  %v9827_v2 = vpack.c.bf16 %v3739_v55, %v3738_v42  ;;  %v8735_v42 = vld [vmem:[%s10252_s3 + $0xb0] sm:$0xff]   ;;  %v5336_v55 = vld [vmem:[#allocation2 + $0x81] sm:$0xff] }
 0x394   : > { %7815 = vmatmul.mubr.msk.bf16.vlgmr.msra.gmra.mrb[0].mxu1 %vm3050_vm0, %v9781_v38 }
 0x395   : > { %7818 = vmatprep.mubr.msk.bf16.mxu1 %vm3050_vm0, %v9786_v50  ;;  %7847 = vmatpush3.bf16.msra.mxu1 %v8725_v20  ;;  %v8729_v20 = vld [vmem:[%s10252_s3 + $0x80] sm:$0xff]  }
 0x396   : > { %7848 = vmatprep.subr.bf16.mxu1 %v8726_v48 }
 0x399   : > { %7849 = vmatpush3.bf16.msra.mxu1 %v8726_v48  ;;  %v9833_v48 = vpack.c.bf16 %v3741_v1, %v3740_v36  ;;  %v5338_v36 = vld [vmem:[#allocation2 + $0x99] sm:$0xff] }
 0x39a   : > { %7850 = vmatprep.subr.bf16.mxu1 %v8727_v51  ;;  %v5335_v1 = vld [vmem:[#allocation2 + $0x79] sm:$0xff] }
 0x39c   : > { %7819 = vmatmul.mubr.msk.bf16.gmra.mrb[4].mxu1 %vm3050_vm0, %v9795_v31 }
 0x39d   : > { %7822 = vmatprep.mubr.msk.bf16.mxu1 %vm3050_vm0, %v9800_v37  ;;  %7851 = vmatpush3.bf16.msra.mxu1 %v8727_v51  ;;  %v9835_v51 = vpack.c.bf16 %v3743_v30, %v3742_v18  ;;  %v5364_v18 = vpack.c.bf16 %v5336_v55, %v5335_v1  ;;  %v5337_v30 = vld [vmem:[#allocation2 + $0x91] sm:$0xff] }
 0x39e   : > { %7852 = vmatprep.subr.bf16.mxu1 %v8728_v34 }
 0x3a1   : > { %7853 = vmatpush3.bf16.msra.mxu1 %v8728_v34  ;;  %v9841_v34 = vpack.c.bf16 %v3745_v58, %v3744_v15  ;;  %v8748_v15 = vld [vmem:[%s10252_s3 + $0x118] sm:$0xff]   ;;  %v5365_v58 = vpack.c.bf16 %v5338_v36, %v5337_v30 }
 0x3a2   : > { %7886 = vmatprep.subr.bf16.mxu1 %v8729_v20  ;;  %v6865_v36 = vld [vmem:[%s8909_s15 + $0x51] sm:$0xff] }
 0x3a3   : > { %v6049_v46 = vmul.f32 0.2, %v6865_v36 }
 0x3a4   : > { %7823 = vmatmul.mubr.msk.bf16.gmra.mrb[8].mxu1 %vm3050_vm0, %v9809_v8 }
 0x3a5   : > { %7826 = vmatprep.mubr.msk.bf16.mxu1 %vm3050_vm0, %v9811_v7 }
 0x3ac   : > { %7827 = vmatmul.mubr.msk.bf16.gmra.mrb[12].mxu1 %vm3050_vm0, %v9817_v17 }
 0x3ad   : > { %7830 = vmatprep.mubr.msk.bf16.mxu1 %vm3050_vm0, %v9819_v54 }
 0x3b4   : > { %7831 = vmatmul.mubr.msk.bf16.gmra.mrb[16].mxu1 %vm3050_vm0, %v9825_v61 }
 0x3b5   : > { %7834 = vmatprep.mubr.msk.bf16.mxu1 %vm3050_vm0, %v9827_v2 }
 0x3bc   : > { %7835 = vmatmul.mubr.msk.bf16.gmra.mrb[20].mxu1 %vm3050_vm0, %v9833_v48 }
 0x3bd   : > { %7838 = vmatprep.mubr.msk.bf16.mxu1 %vm3050_vm0, %v9835_v51 }
 0x3c4   : > { %7839 = vmatmul.mubr.msk.bf16.gmra.mrb[24].mxu1 %vm3050_vm0, %v9841_v34 }
 0x3c5   : > { %7842 = vmatprep.mubr.msk.bf16.mxu1 %vm3050_vm0, %v9843_v44 }
 0x3cc   : > { %7843 = vmatmul.mubr.msk.bf16.gmra.mrb[28].mxu1 %vm3050_vm0, %v9849_v62 }
 0x3cd   : > { %7854 = vmatprep.mubr.msk.bf16.mxu1 %vm3050_vm0, %v9707_v35  ;;  %v8732_v35 = vld [vmem:[%s10252_s3 + $0x98] sm:$0xff]  }
 0x3d4   : > { %7855 = vmatmul.mubr.msk.bf16.vlgmr.msra.gmra.mrb[0].mxu1 %vm3050_vm0, %v9712_v10 }
 0x3d5   : > { %7858 = vmatprep.mubr.msk.bf16.mxu1 %vm3050_vm0, %v9722_v39  ;;  %7887 = vmatpush3.bf16.msra.mxu1 %v8729_v20  ;;  %v8733_v20 = vld [vmem:[%s10252_s3 + $0xa0] sm:$0xff]  }
 0x3d6   : > { %7888 = vmatprep.subr.bf16.mxu1 %v8730_v9 }
 0x3d9   : > { %7889 = vmatpush3.bf16.msra.mxu1 %v8730_v9  ;;  %v5341_v9 = vld [vmem:[#allocation2 + $0xc1] sm:$0xff] }
 0x3da   : > { %7890 = vmatprep.subr.bf16.mxu1 %v8731_v13 }
 0x3dc   : > { %7859 = vmatmul.mubr.msk.bf16.gmra.mrb[4].mxu1 %vm3050_vm0, %v9727_v5 }
 0x3dd   : > { %7862 = vmatprep.mubr.msk.bf16.mxu1 %vm3050_vm0, %v9736_v19  ;;  %7891 = vmatpush3.bf16.msra.mxu1 %v8731_v13  ;;  %v5367_v13 = vpack.c.bf16 %v5342_v4, %v5341_v9 }
 0x3de   : > { %7892 = vmatprep.subr.bf16.mxu1 %v8732_v35 }
 0x3e1   : > { %7893 = vmatpush3.bf16.msra.mxu1 %v8732_v35  ;;  %v5344_v35 = vld [vmem:[#allocation2 + $0xe1] sm:$0xff] }
 0x3e2   : > { %7926 = vmatprep.subr.bf16.mxu1 %v8733_v20  ;;  %v5368_v16 = vpack.c.bf16 %v5344_v35, %v5343_v23  ;;  %v6870_v23 = vld [vmem:[%s8909_s15 + $0x91] sm:$0xff] }
 0x3e4   : > { %7863 = vmatmul.mubr.msk.bf16.gmra.mrb[8].mxu1 %vm3050_vm0, %v9738_v11 }
 0x3e5   : > { %7866 = vmatprep.mubr.msk.bf16.mxu1 %vm3050_vm0, %v9744_v41 }
 0x3ec   : > { %7867 = vmatmul.mubr.msk.bf16.gmra.mrb[12].mxu1 %vm3050_vm0, %v9746_v45 }
 0x3ed   : > { %7870 = vmatprep.mubr.msk.bf16.mxu1 %vm3050_vm0, %v9752_v63 }
 0x3f4   : > { %7871 = vmatmul.mubr.msk.bf16.gmra.mrb[16].mxu1 %vm3050_vm0, %v9754_v6 }
 0x3f5   : > { %7874 = vmatprep.mubr.msk.bf16.mxu1 %vm3050_vm0, %v9760_v14 }
 0x3fc   : > { %7875 = vmatmul.mubr.msk.bf16.gmra.mrb[20].mxu1 %vm3050_vm0, %v9762_v27 }
 0x3fd   : > { %7878 = vmatprep.mubr.msk.bf16.mxu1 %vm3050_vm0, %v9768_v47 }
 0x404   : > { %7879 = vmatmul.mubr.msk.bf16.gmra.mrb[24].mxu1 %vm3050_vm0, %v9770_v33 }
 0x405   : > { %7882 = vmatprep.mubr.msk.bf16.mxu1 %vm3050_vm0, %v9776_v22 }
 0x40c   : > { %7883 = vmatmul.mubr.msk.bf16.gmra.mrb[28].mxu1 %vm3050_vm0, %v9895_v32 }
 0x40d   : > { %7894 = vmatprep.mubr.msk.bf16.mxu1 %vm3050_vm0, %v9583_v56  ;;  %v8736_v56 = vld [vmem:[%s10252_s3 + $0xb8] sm:$0xff]  }
 0x414   : > { %7895 = vmatmul.mubr.msk.bf16.vlgmr.msra.gmra.mrb[0].mxu1 %vm3050_vm0, %v9589_v0  ;;  %v8737_v0 = vld [vmem:[%s10252_s3 + $0xc0] sm:$0xff]  }
 0x415   : > { %7898 = vmatprep.mubr.msk.bf16.mxu1 %vm3050_vm0, %v9606_v49  ;;  %7927 = vmatpush3.bf16.msra.mxu1 %v8733_v20  ;;  %v4393_v49 = vld [vmem:[#allocation2 + $0x189] sm:$0xff]  ;;  %v5346_v20 = vld [vmem:[#allocation2 + $0xf9] sm:$0xff] }
 0x416   : > { %7928 = vmatprep.subr.bf16.mxu1 %v8734_v40 }
 0x419   : > { %7929 = vmatpush3.bf16.msra.mxu1 %v8734_v40 }
 0x41a   : > { %7930 = vmatprep.subr.bf16.mxu1 %v8735_v42 }
 0x41c   : > { %7899 = vmatmul.mubr.msk.bf16.gmra.mrb[4].mxu1 %vm3050_vm0, %v9612_v21  ;;  %v4392_v21 = vld [vmem:[#allocation2 + $0x181] sm:$0xff] }
 0x41d   : > { %7902 = vmatprep.mubr.msk.bf16.mxu1 %vm3050_vm0, %v9630_v59  ;;  %7931 = vmatpush3.bf16.msra.mxu1 %v8735_v42  ;;  %v9941_v59 = vpack.c.bf16 %v4393_v49, %v4392_v21  ;;  %v5348_v42 = vld [vmem:[#allocation2 + $0x111] sm:$0xff]  ;;  %v5349_v21 = vld [vmem:[#allocation2 + $0x121] sm:$0xff] }
 0x41e   : > { %7932 = vmatprep.subr.bf16.mxu1 %v8736_v56 }
 0x421   : > { %7933 = vmatpush3.bf16.msra.mxu1 %v8736_v56  ;;  %v5350_v56 = vld [vmem:[#allocation2 + $0x129] sm:$0xff] }
 0x422   : > { %7966 = vmatprep.subr.bf16.mxu1 %v8737_v0 }
 0x424   : > { %7903 = vmatmul.mubr.msk.bf16.gmra.mrb[8].mxu1 %vm3050_vm0, %v9634_v29  ;;  %v8738_v29 = vld [vmem:[%s10252_s3 + $0xc8] sm:$0xff]  }
 0x425   : > { %7906 = vmatprep.mubr.msk.bf16.mxu1 %vm3050_vm0, %v9647_v12  ;;  %v8739_v12 = vld [vmem:[%s10252_s3 + $0xd0] sm:$0xff]  }
 0x42c   : > { %7907 = vmatmul.mubr.msk.bf16.gmra.mrb[12].mxu1 %vm3050_vm0, %v9650_v26  ;;  %v8740_v26 = vld [vmem:[%s10252_s3 + $0xd8] sm:$0xff]  }
 0x42d   : > { %7910 = vmatprep.mubr.msk.bf16.mxu1 %vm3050_vm0, %v9663_v52  ;;  %v8741_v52 = vld [vmem:[%s10252_s3 + $0xe0] sm:$0xff]  }
 0x434   : > { %7911 = vmatmul.mubr.msk.bf16.gmra.mrb[16].mxu1 %vm3050_vm0, %v9666_v28  ;;  %v4714_v28 = vld [vmem:[#allocation2 + $0x182] sm:$0xff] }
 0x435   : > { %7914 = vmatprep.mubr.msk.bf16.mxu1 %vm3050_vm0, %v9679_v43  ;;  %v4715_v43 = vld [vmem:[#allocation2 + $0x18a] sm:$0xff] }
 0x43c   : > { %7915 = vmatmul.mubr.msk.bf16.gmra.mrb[20].mxu1 %vm3050_vm0, %v9682_v53  ;;  %v9987_v53 = vpack.c.bf16 %v4715_v43, %v4714_v28  ;;  %v5353_v43 = vld [vmem:[#allocation2 + $0x151] sm:$0xff] }
 0x43d   : > { %7918 = vmatprep.mubr.msk.bf16.mxu1 %vm3050_vm0, %v9694_v24  ;;  %v8742_v24 = vld [vmem:[%s10252_s3 + $0xe8] sm:$0xff]  }
 0x444   : > { %7919 = vmatmul.mubr.msk.bf16.gmra.mrb[24].mxu1 %vm3050_vm0, %v9696_v25  ;;  %v8743_v25 = vld [vmem:[%s10252_s3 + $0xf0] sm:$0xff]  }
 0x445   : > { %7922 = vmatprep.mubr.msk.bf16.mxu1 %vm3050_vm0, %v9702_v60  ;;  %v8744_v60 = vld [vmem:[%s10252_s3 + $0xf8] sm:$0xff]  }
 0x44c   : > { %7923 = vmatmul.mubr.msk.bf16.gmra.mrb[28].mxu1 %vm3050_vm0, %v9941_v59 }
 0x44d   : > { %7934 = vmatprep.mubr.msk.bf16.mxu1 %vm3050_vm0, %v9781_v38  ;;  %v8747_v38 = vld [vmem:[%s10252_s3 + $0x110] sm:$0xff]  }
 0x454   : > { %7935 = vmatmul.mubr.msk.bf16.vlgmr.msra.gmra.mrb[0].mxu1 %vm3050_vm0, %v9786_v50 }
 0x455   : > { %7938 = vmatprep.mubr.msk.bf16.mxu1 %vm3050_vm0, %v9795_v31  ;;  %7967 = vmatpush3.bf16.msra.mxu1 %v8737_v0  ;;  %v5347_v0 = vld [vmem:[#allocation2 + $0x109] sm:$0xff] }
 0x456   : > { %7968 = vmatprep.subr.bf16.mxu1 %v8738_v29  ;;  %v5370_v49 = vpack.c.bf16 %v5348_v42, %v5347_v0  ;;  %v6871_v42 = vld [vmem:[%s8909_s15 + $0x99] sm:$0xff]  ;;  %v6869_v0 = vld [vmem:[%s8909_s15 + $0x81] sm:$0xff] }
 0x459   : > { %7969 = vmatpush3.bf16.msra.mxu1 %v8738_v29  ;;  %v5371_v29 = vpack.c.bf16 %v5350_v56, %v5349_v21  ;;  %v6054_v56 = vmul.f32 0.2, %v6870_v23 }
 0x45a   : > { %7970 = vmatprep.subr.bf16.mxu1 %v8739_v12 }
 0x45c   : > { %7939 = vmatmul.mubr.msk.bf16.gmra.mrb[4].mxu1 %vm3050_vm0, %v9800_v37 }
 0x45d   : > { %7942 = vmatprep.mubr.msk.bf16.mxu1 %vm3050_vm0, %v9809_v8  ;;  %7971 = vmatpush3.bf16.msra.mxu1 %v8739_v12  ;;  %v5352_v12 = vld [vmem:[#allocation2 + $0x141] sm:$0xff] }
 0x45e   : > { %7972 = vmatprep.subr.bf16.mxu1 %v8740_v26 }
 0x461   : > { %7973 = vmatpush3.bf16.msra.mxu1 %v8740_v26  ;;  %v5354_v26 = vld [vmem:[#allocation2 + $0x159] sm:$0xff] }
 0x462   : > { %8006 = vmatprep.subr.bf16.mxu1 %v8741_v52 }
 0x464   : > { %7943 = vmatmul.mubr.msk.bf16.gmra.mrb[8].mxu1 %vm3050_vm0, %v9811_v7 }
 0x465   : > { %7946 = vmatprep.mubr.msk.bf16.mxu1 %vm3050_vm0, %v9817_v17 }
 0x46c   : > { %7947 = vmatmul.mubr.msk.bf16.gmra.mrb[12].mxu1 %vm3050_vm0, %v9819_v54 }
 0x46d   : > { %7950 = vmatprep.mubr.msk.bf16.mxu1 %vm3050_vm0, %v9825_v61 }
 0x474   : > { %7951 = vmatmul.mubr.msk.bf16.gmra.mrb[16].mxu1 %vm3050_vm0, %v9827_v2 }
 0x475   : > { %7954 = vmatprep.mubr.msk.bf16.mxu1 %vm3050_vm0, %v9833_v48 }
 0x47c   : > { %7955 = vmatmul.mubr.msk.bf16.gmra.mrb[20].mxu1 %vm3050_vm0, %v9835_v51 }
 0x47d   : > { %7958 = vmatprep.mubr.msk.bf16.mxu1 %vm3050_vm0, %v9841_v34 }
 0x484   : > { %7959 = vmatmul.mubr.msk.bf16.gmra.mrb[24].mxu1 %vm3050_vm0, %v9843_v44 }
 0x485   : > { %7962 = vmatprep.mubr.msk.bf16.mxu1 %vm3050_vm0, %v9849_v62 }
 0x48c   : > { %7963 = vmatmul.mubr.msk.bf16.gmra.mrb[28].mxu1 %vm3050_vm0, %v9987_v53 }
 0x48d   : > { %7974 = vmatprep.mubr.msk.bf16.mxu1 %vm3050_vm0, %v9712_v10  ;;  %v8745_v10 = vld [vmem:[%s10252_s3 + $0x100] sm:$0xff]  }
 0x494   : > { %7975 = vmatmul.mubr.msk.bf16.vlgmr.msra.gmra.mrb[0].mxu1 %vm3050_vm0, %v9722_v39  ;;  %v5037_v39 = vld [vmem:[#allocation2 + $0x198] sm:$0xff] }
 0x495   : > { %7978 = vmatprep.mubr.msk.bf16.mxu1 %vm3050_vm0, %v9727_v5  ;;  %8007 = vmatpush3.bf16.msra.mxu1 %v8741_v52  ;;  %v5038_v5 = vld [vmem:[#allocation2 + $0x1a0] sm:$0xff] }
 0x496   : > { %8008 = vmatprep.subr.bf16.mxu1 %v8742_v24  ;;  %v5351_v52 = vld [vmem:[#allocation2 + $0x139] sm:$0xff] }
 0x497   : > { %v5372_v28 = vpack.c.bf16 %v5352_v12, %v5351_v52 }
 0x499   : > { %8009 = vmatpush3.bf16.msra.mxu1 %v8742_v24  ;;  %v5373_v24 = vpack.c.bf16 %v5354_v26, %v5353_v43  ;;  %v6055_v26 = vmul.f32 0.2, %v6871_v42  ;;  %v6053_v43 = vmul.f32 0.2, %v6869_v0 }
 0x49a   : > { %8010 = vmatprep.subr.bf16.mxu1 %v8743_v25 }
 0x49c   : > { %7979 = vmatmul.mubr.msk.bf16.gmra.mrb[4].mxu1 %vm3050_vm0, %v9736_v19  ;;  %v5054_v19 = vpack.c.bf16 %v5038_v5, %v5037_v39  ;;  %v5359_v39 = vld [vmem:[#allocation2 + $0x199] sm:$0xff]  ;;  %v5360_v5 = vld [vmem:[#allocation2 + $0x1a1] sm:$0xff] }
 0x49d   : > { %7982 = vmatprep.mubr.msk.bf16.mxu1 %vm3050_vm0, %v9738_v11  ;;  %8011 = vmatpush3.bf16.msra.mxu1 %v8743_v25  ;;  %v5330_v11 = vld [vmem:[#allocation2 + $0x39] sm:$0xff]  ;;  %v5356_v25 = vld [vmem:[#allocation2 + $0x171] sm:$0xff] }
 0x49e   : > { %8012 = vmatprep.subr.bf16.mxu1 %v8744_v60 }
 0x4a1   : > { %8013 = vmatpush3.bf16.msra.mxu1 %v8744_v60  ;;  %v5355_v60 = vld [vmem:[#allocation2 + $0x169] sm:$0xff] }
 0x4a2   : > { %8046 = vmatprep.subr.bf16.mxu1 %v8745_v10 }
 0x4a4   : > { %7983 = vmatmul.mubr.msk.bf16.gmra.mrb[8].mxu1 %vm3050_vm0, %v9744_v41  ;;  %v5329_v41 = vld [vmem:[#allocation2 + $0x31] sm:$0xff] }
 0x4a5   : > { %7986 = vmatprep.mubr.msk.bf16.mxu1 %vm3050_vm0, %v9746_v45  ;;  %v5361_v45 = vpack.c.bf16 %v5330_v11, %v5329_v41 }
 0x4ac   : > { %7987 = vmatmul.mubr.msk.bf16.gmra.mrb[12].mxu1 %vm3050_vm0, %v9752_v63  ;;  %v5332_v63 = vld [vmem:[#allocation2 + $0x51] sm:$0xff] }
 0x4ad   : > { %7990 = vmatprep.mubr.msk.bf16.mxu1 %vm3050_vm0, %v9754_v6  ;;  %v5334_v6 = vld [vmem:[#allocation2 + $0x69] sm:$0xff] }
 0x4b4   : > { %7991 = vmatmul.mubr.msk.bf16.gmra.mrb[16].mxu1 %vm3050_vm0, %v9760_v14  ;;  %v5331_v14 = vld [vmem:[#allocation2 + $0x49] sm:$0xff] }
 0x4b5   : > { %7994 = vmatprep.mubr.msk.bf16.mxu1 %vm3050_vm0, %v9762_v27  ;;  %v5362_v27 = vpack.c.bf16 %v5332_v63, %v5331_v14 }
 0x4bc   : > { %7995 = vmatmul.mubr.msk.bf16.gmra.mrb[20].mxu1 %vm3050_vm0, %v9768_v47  ;;  %v5333_v47 = vld [vmem:[#allocation2 + $0x61] sm:$0xff] }
 0x4bd   : > { %7998 = vmatprep.mubr.msk.bf16.mxu1 %vm3050_vm0, %v9770_v33  ;;  %v8746_v33 = vld [vmem:[%s10252_s3 + $0x108] sm:$0xff]  }
 0x4c4   : > { %7999 = vmatmul.mubr.msk.bf16.gmra.mrb[24].mxu1 %vm3050_vm0, %v9776_v22  ;;  %v5363_v22 = vpack.c.bf16 %v5334_v6, %v5333_v47 }
 0x4c5   : > { %8002 = vmatprep.mubr.msk.bf16.mxu1 %vm3050_vm0, %v9895_v32  ;;  %v5345_v32 = vld [vmem:[#allocation2 + $0xf1] sm:$0xff] }
 0x4c6   : > { %v5369_v40 = vpack.c.bf16 %v5346_v20, %v5345_v32  ;;  %v6868_v32 = vld [vmem:[%s8909_s15 + $0x79] sm:$0xff] }
 0x4c7   : > { %v6052_v21 = vmul.f32 0.2, %v6868_v32 }
 0x4cc   : > { %8003 = vmatmul.mubr.msk.bf16.gmra.mrb[28].mxu1 %vm3050_vm0, %v5054_v19  ;;  %v5376_v19 = vpack.c.bf16 %v5360_v5, %v5359_v39  ;;  %v6874_v5 = vld [vmem:[%s8909_s15 + $0xc1] sm:$0xff] }
 0x4cd   : > { %8014 = vmatprep.mubr.msk.bf16.mxu1 %vm3050_vm0, %v5361_v45 }
 0x4d4   : > { %8015 = vmatmul.mubr.msk.bf16.vlgmr.msra.gmra.mrb[0].mxu1 %vm3050_vm0, %v5362_v27  ;;  %v6866_v27 = vld [vmem:[%s8909_s15 + $0x61] sm:$0xff] }
 0x4d5   : > { %8018 = vmatprep.mubr.msk.bf16.mxu1 %vm3050_vm0, %v5363_v22  ;;  %8047 = vmatpush3.bf16.msra.mxu1 %v8745_v10  ;;  %v5374_v10 = vpack.c.bf16 %v5356_v25, %v5355_v60  ;;  %v6050_v55 = vmul.f32 0.2, %v6866_v27 }
 0x4d6   : > { %8048 = vmatprep.subr.bf16.mxu1 %v8746_v33 }
 0x4d9   : > { %8049 = vmatpush3.bf16.msra.mxu1 %v8746_v33  ;;  %v6864_v33 = vld [vmem:[%s8909_s15 + $0x49] sm:$0xff] }
 0x4da   : > { %8050 = vmatprep.subr.bf16.mxu1 %v8747_v38 }
 0x4dc   : > { %8019 = vmatmul.mubr.msk.bf16.gmra.mrb[4].mxu1 %vm3050_vm0, %v5364_v18  ;;  %v6048_v18 = vmul.f32 0.2, %v6864_v33 }
 0x4dd   : > { %8022 = vmatprep.mubr.msk.bf16.mxu1 %vm3050_vm0, %v5365_v58  ;;  %8051 = vmatpush3.bf16.msra.mxu1 %v8747_v38  ;;  %v6867_v38 = vld [vmem:[%s8909_s15 + $0x69] sm:$0xff] }
 0x4de   : > { %8052 = vmatprep.subr.bf16.mxu1 %v8748_v15  ;;  %v6051_v58 = vmul.f32 0.2, %v6867_v38 }
 0x4e1   : > { %8053 = vmatpush3.bf16.msra.mxu1 %v8748_v15 }
 0x4e4   : > { %8023 = vmatmul.mubr.msk.bf16.gmra.mrb[8].mxu1 %vm3050_vm0, %v5366_v57 }
 0x4e5   : > { %8026 = vmatprep.mubr.msk.bf16.mxu1 %vm3050_vm0, %v5367_v13 }
 0x4ec   : > { %8027 = vmatmul.mubr.msk.bf16.gmra.mrb[12].mxu1 %vm3050_vm0, %v5368_v16 }
 0x4ed   : > { %8030 = vmatprep.mubr.msk.bf16.mxu1 %vm3050_vm0, %v5369_v40 }
 0x4f4   : > { %8031 = vmatmul.mubr.msk.bf16.gmra.mrb[16].mxu1 %vm3050_vm0, %v5370_v49 }
 0x4f5   : > { %8034 = vmatprep.mubr.msk.bf16.mxu1 %vm3050_vm0, %v5371_v29 }
 0x4fc   : > { %8035 = vmatmul.mubr.msk.bf16.gmra.mrb[20].mxu1 %vm3050_vm0, %v5372_v28 }
 0x4fd   : > { %8038 = vmatprep.mubr.msk.bf16.mxu1 %vm3050_vm0, %v5373_v24 }
 0x504   : > { %8039 = vmatmul.mubr.msk.bf16.gmra.mrb[24].mxu1 %vm3050_vm0, %v5374_v10 }
 0x505   : > { %8042 = vmatprep.mubr.msk.bf16.mxu1 %vm3050_vm0, %v9941_v59 }
 0x50c   : > { %8043 = vmatmul.mubr.msk.bf16.gmra.mrb[28].mxu1 %vm3050_vm0, %v5376_v19 }
 0x50d   : > { %8054 = vmatprep.mubr.msk.bf16.mxu1 %vm3050_vm0, %v9786_v50  ;;  %v5681_v50 = vld [vmem:[#allocation2 + $0x19a] sm:$0xff] }
 0x514   : > { %8055 = vmatmul.mubr.msk.bf16.vlgmr.msra.gmra.mrb[0].mxu1 %vm3050_vm0, %v9795_v31  ;;  %v5682_v31 = vld [vmem:[#allocation2 + $0x1a2] sm:$0xff] }
 0x515   : > { %8058 = vmatprep.mubr.msk.bf16.mxu1 %vm3050_vm0, %v9800_v37  ;;  %v5698_v37 = vpack.c.bf16 %v5682_v31, %v5681_v50  ;;  %v6872_v50 = vld [vmem:[%s8909_s15 + $0xa9] sm:$0xff] }
 0x51c   : > { %8059 = vmatmul.mubr.msk.bf16.gmra.mrb[4].mxu1 %vm3050_vm0, %v9809_v8  ;;  %v6862_v8 = vld [vmem:[%s8909_s15 + $0x31] sm:$0xff] }
 0x51d   : > { %8062 = vmatprep.mubr.msk.bf16.mxu1 %vm3050_vm0, %v9811_v7  ;;  %v6860_v7 = vld [vmem:[%s8909_s15 + $0x19] sm:$0xff] }
 0x524   : > { %8063 = vmatmul.mubr.msk.bf16.gmra.mrb[8].mxu1 %vm3050_vm0, %v9817_v17  ;;  %v10097_v17 = vld [vmem:[%s10253_s4] ss:$0 sm:$0xff] }
 0x525   : > { %8066 = vmatprep.mubr.msk.bf16.mxu1 %vm3050_vm0, %v9819_v54  ;;  %v6863_v54 = vld [vmem:[%s8909_s15 + $0x39] sm:$0xff] }
 0x52c   : > { %8067 = vmatmul.mubr.msk.bf16.gmra.mrb[12].mxu1 %vm3050_vm0, %v9825_v61  ;;  %v6046_v61 = vmul.f32 0.2, %v6862_v8  ;;  %v6058_v8 = vmul.f32 0.2, %v6874_v5 }
 0x52d   : > { %8070 = vmatprep.mubr.msk.bf16.mxu1 %vm3050_vm0, %v9827_v2  ;;  %v6861_v2 = vld [vmem:[%s8909_s15 + $0x21] sm:$0xff] }
 0x52e   : > { %v6045_v11 = vmul.f32 0.2, %v6861_v2 }
 0x534   : > { %8071 = vmatmul.mubr.msk.bf16.gmra.mrb[16].mxu1 %vm3050_vm0, %v9833_v48 }
 0x535   : > { %8074 = vmatprep.mubr.msk.bf16.mxu1 %vm3050_vm0, %v9835_v51  ;;  %v6044_v51 = vmul.f32 0.2, %v6860_v7  ;;  %v6873_v7 = vld [vmem:[%s8909_s15 + $0xb1] sm:$0xff] }
 0x53c   : > { %8075 = vmatmul.mubr.msk.bf16.gmra.mrb[20].mxu1 %vm3050_vm0, %v9841_v34 }
 0x53d   : > { %8078 = vmatprep.mubr.msk.bf16.mxu1 %vm3050_vm0, %v9843_v44 }
 0x544   : > { %8079 = vmatmul.mubr.msk.bf16.gmra.mrb[24].mxu1 %vm3050_vm0, %v9849_v62  ;;  %v6047_v62 = vmul.f32 0.2, %v6863_v54 }
 0x545   : > { %8082 = vmatprep.mubr.msk.bf16.mxu1 %vm3050_vm0, %v9987_v53 }
 0x54c   : > { %8083 = vmatmul.mubr.msk.bf16.gmra.mrb[28].mxu1 %vm3050_vm0, %v5698_v37  ;;  %v6875_v37 = vld [vmem:[%s8909_s15 + $0xc9] sm:$0xff] }
 0x5e7   : > { %v8056_v48 = vpop.f32.mrb[0].mxu1 }
 0x5e8   : > { %v5982_v34 = vadd.f32 %v8056_v48, %v10097_v17  ;;  %v5814_v44 = vpop.f32.mrb[1].mxu1 }
 0x5e9   : > { %v5980_v59 = vadd.f32 %v10097_v17, %v5814_v44  ;;  %v8057_v53 = vpop.f32.mrb[2].mxu1 }
 0x5ea   : > { %v6078_v41 = vadd.f32 %v6046_v61, %v5982_v34  ;;  %v5983_v45 = vadd.f32 %v8057_v53, %v10097_v17  ;;  %v5817_v63 = vpop.f32.mrb[3].mxu1  ;;  %v6056_v61 = vmul.f32 0.2, %v6872_v50 }
 0x5eb   : > { %v6076_v6 = vadd.f32 %v6044_v51, %v5980_v59  ;;  %v5981_v14 = vadd.f32 %v10097_v17, %v5817_v63  ;;  %v6059_v51 = vmul.f32 0.2, %v6875_v37  ;;  %v6878_v63 = vld [vmem:[%s8909_s15 + $0xf1] sm:$0xff] }
 0x5ec   : > { %6110 = vst [vmem:[%s10108_s6 + $0x10] sm:$0xff] %v6078_v41  ;;  %v6079_v47 = vadd.f32 %v6047_v62, %v5983_v45  ;;  %v6057_v62 = vmul.f32 0.2, %v6873_v7  ;;  %v6062_v33 = vmul.f32 0.2, %v6878_v63 }
 0x5ed   : > { %6108 = vst [vmem:[%s10108_s6] sm:$0xff] %v6076_v6  ;;  %v6077_v22 = vadd.f32 %v6045_v11, %v5981_v14  ;;  %v6876_v14 = vld [vmem:[%s8909_s15 + $0xd9] sm:$0xff] }
 0x5ee   : > { %6111 = vst [vmem:[%s10108_s6 + $0x18] sm:$0xff] %v6079_v47  ;;  %v6879_v47 = vld [vmem:[%s8909_s15 + $0xf9] sm:$0xff] }
 0x5ef   : > { %6109 = vst [vmem:[%s10108_s6 + $0x8] sm:$0xff] %v6077_v22  ;;  %v8060_v1 = vpop.f32.mrb[4].mxu1  ;;  %v6877_v22 = vld [vmem:[%s8909_s15 + $0xe1] sm:$0xff] }
 0x5f0   : > { %v5986_v30 = vadd.f32 %v8060_v1, %v10097_v17  ;;  %v5830_v15 = vpop.f32.mrb[5].mxu1 }
 0x5f1   : > { %v5984_v3 = vadd.f32 %v10097_v17, %v5830_v15  ;;  %v8061_v4 = vpop.f32.mrb[6].mxu1 }
 0x5f2   : > { %v6082_v57 = vadd.f32 %v6050_v55, %v5986_v30  ;;  %v5987_v9 = vadd.f32 %v8061_v4, %v10097_v17  ;;  %v5833_v13 = vpop.f32.mrb[7].mxu1  ;;  %v6060_v55 = vmul.f32 0.2, %v6876_v14 }
 0x5f3   : > { %v6080_v35 = vadd.f32 %v6048_v18, %v5984_v3  ;;  %v5985_v20 = vadd.f32 %v10097_v17, %v5833_v13  ;;  %v6063_v18 = vmul.f32 0.2, %v6879_v47  ;;  %v6882_v13 = vld [vmem:[%s8909_s15 + $0x121] sm:$0xff] }
 0x5f4   : > { %6114 = vst [vmem:[%s10108_s6 + $0x30] sm:$0xff] %v6082_v57  ;;  %v6083_v16 = vadd.f32 %v6051_v58, %v5987_v9  ;;  %v6061_v58 = vmul.f32 0.2, %v6877_v22  ;;  %v6066_v32 = vmul.f32 0.2, %v6882_v13 }
 0x5f5   : > { %6112 = vst [vmem:[%s10108_s6 + $0x20] sm:$0xff] %v6080_v35  ;;  %v6081_v40 = vadd.f32 %v6049_v46, %v5985_v20  ;;  %v6880_v20 = vld [vmem:[%s8909_s15 + $0x109] sm:$0xff] }
 0x5f6   : > { %6115 = vst [vmem:[%s10108_s6 + $0x38] sm:$0xff] %v6083_v16  ;;  %v6883_v16 = vld [vmem:[%s8909_s15 + $0x129] sm:$0xff] }
 0x5f7   : > { %6113 = vst [vmem:[%s10108_s6 + $0x28] sm:$0xff] %v6081_v40  ;;  %v8064_v49 = vpop.f32.mrb[8].mxu1  ;;  %v6881_v40 = vld [vmem:[%s8909_s15 + $0x111] sm:$0xff] }
 0x5f8   : > { %v5990_v29 = vadd.f32 %v8064_v49, %v10097_v17  ;;  %v5846_v12 = vpop.f32.mrb[9].mxu1 }
 0x5f9   : > { %v5988_v52 = vadd.f32 %v10097_v17, %v5846_v12  ;;  %v8065_v28 = vpop.f32.mrb[10].mxu1 }
 0x5fa   : > { %v6086_v24 = vadd.f32 %v6054_v56, %v5990_v29  ;;  %v5991_v25 = vadd.f32 %v8065_v28, %v10097_v17  ;;  %v5849_v60 = vpop.f32.mrb[11].mxu1  ;;  %v6064_v56 = vmul.f32 0.2, %v6880_v20 }
 0x5fb   : > { %v6084_v10 = vadd.f32 %v6052_v21, %v5988_v52  ;;  %v5989_v39 = vadd.f32 %v10097_v17, %v5849_v60  ;;  %v6067_v21 = vmul.f32 0.2, %v6883_v16  ;;  %v6886_v60 = vld [vmem:[%s8909_s15 + $0x151] sm:$0xff] }
 0x5fc   : > { %6118 = vst [vmem:[%s10108_s6 + $0x50] sm:$0xff] %v6086_v24  ;;  %v6087_v19 = vadd.f32 %v6055_v26, %v5991_v25  ;;  %v6065_v26 = vmul.f32 0.2, %v6881_v40  ;;  %v6070_v50 = vmul.f32 0.2, %v6886_v60 }
 0x5fd   : > { %6116 = vst [vmem:[%s10108_s6 + $0x40] sm:$0xff] %v6084_v10  ;;  %v6085_v31 = vadd.f32 %v6053_v43, %v5989_v39  ;;  %v6884_v39 = vld [vmem:[%s8909_s15 + $0x139] sm:$0xff] }
 0x5fe   : > { %6119 = vst [vmem:[%s10108_s6 + $0x58] sm:$0xff] %v6087_v19  ;;  %v6887_v19 = vld [vmem:[%s8909_s15 + $0x159] sm:$0xff] }
 0x5ff   : > { %6117 = vst [vmem:[%s10108_s6 + $0x48] sm:$0xff] %v6085_v31  ;;  %v8068_v54 = vpop.f32.mrb[12].mxu1  ;;  %v6885_v31 = vld [vmem:[%s8909_s15 + $0x141] sm:$0xff] }
 0x600   : > { %v5994_v2 = vadd.f32 %v8068_v54, %v10097_v17  ;;  %v5862_v48 = vpop.f32.mrb[13].mxu1 }
 0x601   : > { %v5992_v34 = vadd.f32 %v10097_v17, %v5862_v48  ;;  %v8069_v44 = vpop.f32.mrb[14].mxu1 }
 0x602   : > { %v6090_v59 = vadd.f32 %v6058_v8, %v5994_v2  ;;  %v5995_v53 = vadd.f32 %v8069_v44, %v10097_v17  ;;  %v5865_v11 = vpop.f32.mrb[15].mxu1  ;;  %v6068_v8 = vmul.f32 0.2, %v6884_v39 }
 0x603   : > { %v6088_v41 = vadd.f32 %v6056_v61, %v5992_v34  ;;  %v5993_v45 = vadd.f32 %v10097_v17, %v5865_v11  ;;  %v6071_v61 = vmul.f32 0.2, %v6887_v19  ;;  %v6890_v11 = vld [vmem:[%s8909_s15 + $0x181] sm:$0xff] }
 0x604   : > { %6122 = vst [vmem:[%s10108_s6 + $0x70] sm:$0xff] %v6090_v59  ;;  %v6091_v6 = vadd.f32 %v6059_v51, %v5995_v53  ;;  %v6069_v51 = vmul.f32 0.2, %v6885_v31  ;;  %v6074_v14 = vmul.f32 0.2, %v6890_v11 }
 0x605   : > { %6120 = vst [vmem:[%s10108_s6 + $0x60] sm:$0xff] %v6088_v41  ;;  %v6089_v27 = vadd.f32 %v6057_v62, %v5993_v45  ;;  %v6888_v45 = vld [vmem:[%s8909_s15 + $0x169] sm:$0xff] }
 0x606   : > { %6123 = vst [vmem:[%s10108_s6 + $0x78] sm:$0xff] %v6091_v6  ;;  %v6891_v6 = vld [vmem:[%s8909_s15 + $0x189] sm:$0xff] }
 0x607   : > { %6121 = vst [vmem:[%s10108_s6 + $0x68] sm:$0xff] %v6089_v27  ;;  %v8072_v38 = vpop.f32.mrb[16].mxu1  ;;  %v6889_v27 = vld [vmem:[%s8909_s15 + $0x171] sm:$0xff] }
 0x608   : > { %v5998_v36 = vadd.f32 %v8072_v38, %v10097_v17  ;;  %v5878_v1 = vpop.f32.mrb[17].mxu1 }
 0x609   : > { %v5996_v30 = vadd.f32 %v10097_v17, %v5878_v1  ;;  %v8073_v15 = vpop.f32.mrb[18].mxu1 }
 0x60a   : > { %v6094_v3 = vadd.f32 %v6062_v33, %v5998_v36  ;;  %v5999_v4 = vadd.f32 %v8073_v15, %v10097_v17  ;;  %v5881_v46 = vpop.f32.mrb[19].mxu1  ;;  %v6072_v33 = vmul.f32 0.2, %v6888_v45 }
 0x60b   : > { %v6092_v57 = vadd.f32 %v6060_v55, %v5996_v30  ;;  %v5997_v9 = vadd.f32 %v10097_v17, %v5881_v46  ;;  %v6075_v55 = vmul.f32 0.2, %v6891_v6 }
 0x60c   : > { %6126 = vst [vmem:[%s10108_s6 + $0x90] sm:$0xff] %v6094_v3  ;;  %v6095_v35 = vadd.f32 %v6063_v18, %v5999_v4  ;;  %v6073_v18 = vmul.f32 0.2, %v6889_v27 }
 0x60d   : > { %6124 = vst [vmem:[%s10108_s6 + $0x80] sm:$0xff] %v6092_v57  ;;  %v6093_v23 = vadd.f32 %v6061_v58, %v5997_v9 }
 0x60e   : > { %6127 = vst [vmem:[%s10108_s6 + $0x98] sm:$0xff] %v6095_v35 }
 0x60f   : > { %6125 = vst [vmem:[%s10108_s6 + $0x88] sm:$0xff] %v6093_v23  ;;  %v8076_v42 = vpop.f32.mrb[20].mxu1 }
 0x610   : > { %v6002_v0 = vadd.f32 %v8076_v42, %v10097_v17  ;;  %v5894_v49 = vpop.f32.mrb[21].mxu1 }
 0x611   : > { %v6000_v29 = vadd.f32 %v10097_v17, %v5894_v49  ;;  %v8077_v12 = vpop.f32.mrb[22].mxu1 }
 0x612   : > { %v6098_v52 = vadd.f32 %v6066_v32, %v6002_v0  ;;  %v6003_v28 = vadd.f32 %v8077_v12, %v10097_v17  ;;  %v5897_v43 = vpop.f32.mrb[23].mxu1 }
 0x613   : > { %v6096_v24 = vadd.f32 %v6064_v56, %v6000_v29  ;;  %v6001_v25 = vadd.f32 %v10097_v17, %v5897_v43 }
 0x614   : > { %6130 = vst [vmem:[%s10108_s6 + $0xb0] sm:$0xff] %v6098_v52  ;;  %v6099_v10 = vadd.f32 %v6067_v21, %v6003_v28 }
 0x615   : > { %6128 = vst [vmem:[%s10108_s6 + $0xa0] sm:$0xff] %v6096_v24  ;;  %v6097_v5 = vadd.f32 %v6065_v26, %v6001_v25 }
 0x616   : > { %6131 = vst [vmem:[%s10108_s6 + $0xb8] sm:$0xff] %v6099_v10 }
 0x617   : > { %6129 = vst [vmem:[%s10108_s6 + $0xa8] sm:$0xff] %v6097_v5  ;;  %v8080_v37 = vpop.f32.mrb[24].mxu1 }
 0x618   : > { %v6006_v7 = vadd.f32 %v8080_v37, %v10097_v17  ;;  %v5910_v54 = vpop.f32.mrb[25].mxu1 }
 0x619   : > { %v6004_v2 = vadd.f32 %v10097_v17, %v5910_v54  ;;  %v8081_v48 = vpop.f32.mrb[26].mxu1 }
 0x61a   : > { %v6102_v34 = vadd.f32 %v6070_v50, %v6006_v7  ;;  %v6007_v44 = vadd.f32 %v8081_v48, %v10097_v17  ;;  %v5913_v62 = vpop.f32.mrb[27].mxu1 }
 0x61b   : > { %v6100_v59 = vadd.f32 %v6068_v8, %v6004_v2  ;;  %v6005_v53 = vadd.f32 %v10097_v17, %v5913_v62 }
 0x61c   : > { %6134 = vst [vmem:[%s10108_s6 + $0xd0] sm:$0xff] %v6102_v34  ;;  %v6103_v41 = vadd.f32 %v6071_v61, %v6007_v44 }
 0x61d   : > { %6132 = vst [vmem:[%s10108_s6 + $0xc0] sm:$0xff] %v6100_v59  ;;  %v6101_v63 = vadd.f32 %v6069_v51, %v6005_v53 }
 0x61e   : > { %6135 = vst [vmem:[%s10108_s6 + $0xd8] sm:$0xff] %v6103_v41 }
 0x61f   : > { %6133 = vst [vmem:[%s10108_s6 + $0xc8] sm:$0xff] %v6101_v63  ;;  %v8084_v47 = vpop.f32.mrb[28].mxu1 }
 0x620   : > { %v6010_v22 = vadd.f32 %v8084_v47, %v10097_v17  ;;  %v5926_v38 = vpop.f32.mrb[29].mxu1 }
 0x621   : > { %v6008_v36 = vadd.f32 %v10097_v17, %v5926_v38  ;;  %v8085_v1 = vpop.f32.mrb[30].mxu1 }
 0x622   : > { %v6106_v30 = vadd.f32 %v6074_v14, %v6010_v22  ;;  %v6011_v15 = vadd.f32 %v8085_v1, %v10097_v17  ;;  %v5929_v58 = vpop.f32.mrb[31].mxu1 }
 0x623   : > { %v6104_v3 = vadd.f32 %v6072_v33, %v6008_v36  ;;  %v6009_v4 = vadd.f32 %v10097_v17, %v5929_v58 }
 0x624   : > { %6138 = vst [vmem:[%s10108_s6 + $0xf0] sm:$0xff] %v6106_v30  ;;  %v6107_v46 = vadd.f32 %v6075_v55, %v6011_v15 }
 0x625   : > { %6136 = vst [vmem:[%s10108_s6 + $0xe0] sm:$0xff] %v6104_v3  ;;  %v6105_v57 = vadd.f32 %v6073_v18, %v6009_v4 }
 0x626   : > { %6139 = vst [vmem:[%s10108_s6 + $0xf8] sm:$0xff] %v6107_v46 }
 0x627   : > { %6137 = vst [vmem:[%s10108_s6 + $0xe8] sm:$0xff] %v6105_v57 }
 0x628   : > { %8762 = shalt.err (!%p8759_p3)
}
 0x629   : > { %s8763_s16 = scalar_lea.hbm %s10199_s10, 4096  ;;  %s8767_s25 = scalar_lea.hbm %s10254_s5, 8192 }
 0x62a   : > { %p8764_p4 = scmp.ne.s32.totalorder %s10199_s10, %s8763_s16  ;;  %p8768_p9 = scmp.lt.u32.totalorder %s10199_s10, %s10254_s5 }
 0x62b   : > { %p8769_p10 = scmp.lt.u32.totalorder %s8767_s25, %s8763_s16  ;;  %p8771_p12 = scmp.lt.u32.totalorder %s8763_s16, %s10199_s10 }
 0x62c   : > { %p8765_p7 = pnand %p8764_p4, %p8885_p5 }
 0x62d   : > { %p8770_p11 = por %p8769_p10, %p8768_p9 }
 0x62e   : > { %p8766_p8 = pneg %p8765_p7 }
 0x62f   : > { %p8772_p13 = por %p8771_p12, %p8770_p11 }
 0x631   : > { %p8773_p0 = pnand %p8772_p13, %p8766_p8 }
 0x633   : > { %8776 = shalt.err (!%p8773_p0)
}
 0x634   : > { %s8815_s6 = smov 128   ;;  %s8816_s7 = smov 8  }
 0x635   : > { %8599 = dma.vmem_to_hbm [thread:$0]  (%p8885_p5), %s10201_s8, 4096, %s10199_s10, %s10208_s22, %s8815_s6, %s8815_s6, %s8816_s7  }
 0x636 PF: > { %p8605_p1 = scmp.ge.s32.totalorder %s8811_s21, 2  ;;  %s6169_s15 = sand.u32 1, %s8799_s18  }
 0x637   : > { %s6170_s9 = scalar_lea.sflag [#allocation4], %s6169_s15 }
 0x638   : > { %p8602_p2 = pnand %p8605_p1, %p8889_p6 }
 0x63a   : > { %8794 = dma.done.wait (!%p8602_p2), %s6170_s9, 4096  }
 0x63b   : > { %8796 = vsyncadd (!%p8602_p2), %s6170_s9, 4294963200  ;;  %p15_p3 = scmp.ge.s32.totalorder %s8872_s24, 4   ;;  %s10257_s18 = smov %s8803_s19 }
 0x63c   : > { %s10258_s19 = smov %s8807_s20  ;;  %s10259_s20 = smov %s8883_s27 }
 0x63d   : > { %s10260_s21 = smov %s8872_s24  ;;  %17 = sbr.rel (!%p15_p3) target bundleno = 3 (0x3), region = 95 }
 0x644   :  { %6175 = vsyncpa [#allocation4], 1 }
 0x645   :  { %6177 = vsyncpa [#allocation4 + $0x1], 1 }

</bundles_post_ra>
